<compile_context>
chip_gen: v7x
topology: tpu7x:2x2x1
jax: 0.10.0
libtpu: 0.0.40
codegen_flags: <defaults>
</compile_context>

<pallas_src>
import functools
import math

import jax
import jax.numpy as jnp
from jax.experimental import pallas as pl
from jax.experimental.pallas import tpu as pltpu

LN_EPS = 1e-5                    # PyTorch nn.LayerNorm default
ACT_DTYPE = jnp.bfloat16         # activation dtype between kernels (MXU operand)
PARAM_DTYPE = jnp.bfloat16       # stored matmul-weight dtype (MXU operand)
SUBLANE = 16                     # bf16 minimum sublane tile
LANE = 128


def _default_vmem_limit():
    """Generation-aware scoped-VMEM budget: ~96 MiB on v5e/v6e, ~48 MiB on v7x."""
    try:
        cap = pltpu.get_tpu_info().vmem_capacity_bytes
    except Exception:  # unknown backend / interpret mode
        cap = 64 * 1024 * 1024
    return int(min(cap * 3 // 4, 100 * 1024 * 1024))


VMEM_LIMIT = _default_vmem_limit()


# ----------------------------- tiling helpers ------------------------------

def _pick_tile(dim, preferred, align):
    """Largest tile <= preferred that divides dim and respects alignment.

    Falls back to the full dim (always legal: block == full array dim)."""
    if dim <= preferred:
        return dim
    t = (preferred // align) * align
    while t >= align:
        if dim % t == 0:
            return t
        t -= align
    return dim


# ----------------------------- Pallas kernels ------------------------------

def _matmul_kernel(x_ref, w_ref, b_ref, o_ref, acc_ref, *, activation):
    """Tiled X @ W + b (optional ReLU). bf16 operands, f32 accumulation.

    Grid = (M-tiles, N-tiles, K-tiles)."""
    @pl.when(pl.program_id(2) == 0)
    def _():
        acc_ref[...] = jnp.zeros_like(acc_ref)

    acc_ref[...] += jnp.dot(x_ref[...], w_ref[...],
                            preferred_element_type=jnp.float32)

    @pl.when(pl.program_id(2) == pl.num_programs(2) - 1)
    def _():
        y = acc_ref[...] + b_ref[...].astype(jnp.float32)
        if activation == "relu":
            y = jnp.maximum(y, 0.0)
        o_ref[...] = y.astype(o_ref.dtype)


def linear(x2d, w, b, activation=None, tm=512, tn=512, tk=512):
    """x2d: [M, K] (bf16); w: [K, N] (bf16, input-major); b: [N] (f32) -> [M, N]."""
    M, K = x2d.shape
    N = w.shape[1]
    tm = _pick_tile(M, tm, SUBLANE)
    tn = _pick_tile(N, tn, LANE)
    tk = _pick_tile(K, tk, LANE)
    grid = (M // tm, N // tn, K // tk)
    return pl.pallas_call(
        functools.partial(_matmul_kernel, activation=activation),
        out_shape=jax.ShapeDtypeStruct((M, N), x2d.dtype),
        grid=grid,
        in_specs=[
            pl.BlockSpec((tm, tk), lambda i, j, k: (i, k)),
            pl.BlockSpec((tk, tn), lambda i, j, k: (k, j)),
            pl.BlockSpec((1, tn), lambda i, j, k: (0, j)),
        ],
        out_specs=pl.BlockSpec((tm, tn), lambda i, j, k: (i, j)),
        scratch_shapes=[pltpu.VMEM((tm, tn), jnp.float32)],
        compiler_params=pltpu.CompilerParams(
            dimension_semantics=("parallel", "parallel", "arbitrary"),
            vmem_limit_bytes=VMEM_LIMIT),
    )(x2d, w, b.reshape(1, N))


def _matmul_add_ln_kernel(x_ref, w_ref, b_ref, r_ref, g_ref, bb_ref,
                          o_ref, acc_ref, *, eps):
    """Tiled (X @ W + b) with fused residual add + LayerNorm epilogue (f32).

    N (= d_model) is one full-extent block so the LN reduction stays in-block.
    Grid = (M-tiles, K-tiles)."""
    @pl.when(pl.program_id(1) == 0)
    def _():
        acc_ref[...] = jnp.zeros_like(acc_ref)

    acc_ref[...] += jnp.dot(x_ref[...], w_ref[...],
                            preferred_element_type=jnp.float32)

    @pl.when(pl.program_id(1) == pl.num_programs(1) - 1)
    def _():
        y = (acc_ref[...] + b_ref[...].astype(jnp.float32)
             + r_ref[...].astype(jnp.float32))
        mean = jnp.mean(y, axis=-1, keepdims=True)
        var = jnp.mean(jnp.square(y - mean), axis=-1, keepdims=True)
        yn = (y - mean) * jax.lax.rsqrt(var + eps)
        o_ref[...] = (yn * g_ref[...].astype(jnp.float32)
                      + bb_ref[...].astype(jnp.float32)).astype(o_ref.dtype)


def linear_add_ln(x2d, w, b, res2d, gamma, beta, tm=512, tk=512):
    """LayerNorm(res + X @ W + b) over the last dim (torch post-norm)."""
    M, K = x2d.shape
    N = w.shape[1]
    tm = _pick_tile(M, tm, SUBLANE)
    tk = _pick_tile(K, tk, LANE)
    grid = (M // tm, K // tk)
    return pl.pallas_call(
        functools.partial(_matmul_add_ln_kernel, eps=LN_EPS),
        out_shape=jax.ShapeDtypeStruct((M, N), x2d.dtype),
        grid=grid,
        in_specs=[
            pl.BlockSpec((tm, tk), lambda i, k: (i, k)),
            pl.BlockSpec((tk, N), lambda i, k: (k, 0)),
            pl.BlockSpec((1, N), lambda i, k: (0, 0)),
            pl.BlockSpec((tm, N), lambda i, k: (i, 0)),
            pl.BlockSpec((1, N), lambda i, k: (0, 0)),
            pl.BlockSpec((1, N), lambda i, k: (0, 0)),
        ],
        out_specs=pl.BlockSpec((tm, N), lambda i, k: (i, 0)),
        scratch_shapes=[pltpu.VMEM((tm, N), jnp.float32)],
        compiler_params=pltpu.CompilerParams(
            dimension_semantics=("parallel", "arbitrary"),
            vmem_limit_bytes=VMEM_LIMIT),
    )(x2d, w, b.reshape(1, N), res2d, gamma.reshape(1, N), beta.reshape(1, N))


def _ffn_add_ln_kernel(x_ref, w1_ref, b1_ref, w2_ref, b2_ref,
                       g_ref, bb_ref, o_ref, *, eps):
    """Fused FFN: LayerNorm(x + lin2(relu(lin1(x)))). [tm, dff] stays in VMEM.

    Matmuls take bf16 operands straight from the refs (no f32 upcast); bias,
    ReLU and LayerNorm run in f32."""
    x = x_ref[...]                                                   # bf16
    h = jnp.dot(x, w1_ref[...], preferred_element_type=jnp.float32)  # f32
    h = jnp.maximum(h + b1_ref[...].astype(jnp.float32), 0.0)
    y = jnp.dot(h.astype(w2_ref.dtype), w2_ref[...],
                preferred_element_type=jnp.float32)
    y = y + b2_ref[...].astype(jnp.float32) + x.astype(jnp.float32)  # residual
    mean = jnp.mean(y, axis=-1, keepdims=True)
    var = jnp.mean(jnp.square(y - mean), axis=-1, keepdims=True)
    yn = (y - mean) * jax.lax.rsqrt(var + eps)
    o_ref[...] = (yn * g_ref[...].astype(jnp.float32)
                  + bb_ref[...].astype(jnp.float32)).astype(o_ref.dtype)


def ffn_add_ln(x2d, w1, b1, w2, b2, gamma, beta, tm=512):
    M, D = x2d.shape
    dff = w1.shape[1]
    tm = _pick_tile(M, tm, SUBLANE)

    # Resident-footprint guard for v7x (64 MiB VMEM): the two full-extent
    # weight blocks get double-buffered by the pipeline even though their
    # index_map is constant.  Fall back to two tiled matmuls if too big.
    weight_bytes = 2 * 2 * D * dff * w1.dtype.itemsize       # w1 + w2, 2 buffers
    act_bytes = 2 * tm * D * x2d.dtype.itemsize * 3 + tm * dff * 4
    if weight_bytes + act_bytes > (VMEM_LIMIT * 2) // 3:
        h = linear(x2d, w1, b1, activation="relu")
        return linear_add_ln(h, w2, b2, x2d, gamma, beta)

    grid = (M // tm,)
    return pl.pallas_call(
        functools.partial(_ffn_add_ln_kernel, eps=LN_EPS),
        out_shape=jax.ShapeDtypeStruct((M, D), x2d.dtype),
        grid=grid,
        in_specs=[
            pl.BlockSpec((tm, D), lambda i: (i, 0)),
            pl.BlockSpec((D, dff), lambda i: (0, 0)),
            pl.BlockSpec((1, dff), lambda i: (0, 0)),
            pl.BlockSpec((dff, D), lambda i: (0, 0)),
            pl.BlockSpec((1, D), lambda i: (0, 0)),
            pl.BlockSpec((1, D), lambda i: (0, 0)),
            pl.BlockSpec((1, D), lambda i: (0, 0)),
        ],
        out_specs=pl.BlockSpec((tm, D), lambda i: (i, 0)),
        compiler_params=pltpu.CompilerParams(
            dimension_semantics=("parallel",),
            vmem_limit_bytes=VMEM_LIMIT),
    )(x2d, w1, b1.reshape(1, dff), w2, b2.reshape(1, D),
      gamma.reshape(1, D), beta.reshape(1, D))


def _attention_kernel(q_ref, k_ref, v_ref, o_ref):
    """One (batch, head) per grid step.  1/sqrt(dk) is pre-folded into Wq."""
    q = q_ref[0, 0]                                              # [Sq, dk] bf16
    k = k_ref[0, 0]                                              # [Sk, dk] bf16
    v = v_ref[0, 0]                                              # [Sk, dk] bf16
    s = jax.lax.dot_general(q, k, (((1,), (1,)), ((), ())),
                            preferred_element_type=jnp.float32)  # [Sq, Sk] f32
    s = s - jnp.max(s, axis=-1, keepdims=True)
    p = jnp.exp(s)
    denom = jnp.sum(p, axis=-1, keepdims=True)
    p = p * pl.reciprocal(denom, approx=True)                    # EUP slot
    ctx = jnp.dot(p.astype(v.dtype), v,
                  preferred_element_type=jnp.float32)            # [Sq, dk]
    o_ref[0, 0] = ctx.astype(o_ref.dtype)


def attention(q, k, v):
    """q: [B, H, Sq, dk]; k, v: [B, H, Sk, dk] -> [B, H, Sq, dk] (no masks).

    Grid over (B, H): bounds the score intermediate to one [Sq, Sk] tile and
    exposes two parallel axes (v7x megacore).
    TODO(synk): flash-style online softmax over Sk tiles for long sequences."""
    B, H, Sq, dk = q.shape
    Sk = k.shape[2]
    return pl.pallas_call(
        _attention_kernel,
        out_shape=jax.ShapeDtypeStruct((B, H, Sq, dk), q.dtype),
        grid=(B, H),
        in_specs=[
            pl.BlockSpec((1, 1, Sq, dk), lambda b, h: (b, h, 0, 0)),
            pl.BlockSpec((1, 1, Sk, dk), lambda b, h: (b, h, 0, 0)),
            pl.BlockSpec((1, 1, Sk, dk), lambda b, h: (b, h, 0, 0)),
        ],
        out_specs=pl.BlockSpec((1, 1, Sq, dk), lambda b, h: (b, h, 0, 0)),
        compiler_params=pltpu.CompilerParams(
            dimension_semantics=("parallel", "parallel"),
            vmem_limit_bytes=VMEM_LIMIT),
    )(q, k, v)


# ----------------------------- attention blocks ----------------------------

def _split_heads(z2d, B, S, H, dk):
    # TODO(synk): head split/merge permutes are XLA ops between pallas_calls.
    return z2d.reshape(B, S, H, dk).transpose(0, 2, 1, 3)


def _merge_heads(z, B, S, D):
    return z.transpose(0, 2, 1, 3).reshape(B * S, D)


def self_attention_block(x, mha_p, ln_g, ln_b, nhead):
    """Fused QKV proj -> per-(batch,head) attention -> out-proj + add + LN."""
    B, S, D = x.shape
    dk = D // nhead
    x2d = x.reshape(B * S, D)
    qkv = linear(x2d, mha_p["wqkv"], mha_p["bqkv"])          # [B*S, 3D]
    q = _split_heads(qkv[:, :D], B, S, nhead, dk)
    k = _split_heads(qkv[:, D:2 * D], B, S, nhead, dk)
    v = _split_heads(qkv[:, 2 * D:], B, S, nhead, dk)
    ctx = attention(q, k, v)                                  # [B, H, S, dk]
    ctx2d = _merge_heads(ctx, B, S, D)
    out = linear_add_ln(ctx2d, mha_p["wo"], mha_p["bo"], x2d, ln_g, ln_b)
    return out.reshape(B, S, D)


def cross_attention_block(t, memory, mha_p, ln_g, ln_b, nhead):
    B, T, D = t.shape
    S = memory.shape[1]
    dk = D // nhead
    t2d = t.reshape(B * T, D)
    m2d = memory.reshape(B * S, D)
    q = _split_heads(linear(t2d, mha_p["wq"], mha_p["bq"]), B, T, nhead, dk)
    kv = linear(m2d, mha_p["wkv"], mha_p["bkv"])             # fused K|V
    k = _split_heads(kv[:, :D], B, S, nhead, dk)
    v = _split_heads(kv[:, D:], B, S, nhead, dk)
    ctx = attention(q, k, v)
    ctx2d = _merge_heads(ctx, B, T, D)
    out = linear_add_ln(ctx2d, mha_p["wo"], mha_p["bo"], t2d, ln_g, ln_b)
    return out.reshape(B, T, D)


# ----------------------------- parameters ----------------------------------

def xavier_uniform(key, fan_in, fan_out):
    limit = math.sqrt(6.0 / (fan_in + fan_out))
    return jax.random.uniform(key, (fan_in, fan_out), jnp.float32, -limit, limit)


def init_self_attn(key, d_model, nhead):
    ks = jax.random.split(key, 2)
    scale = 1.0 / math.sqrt(d_model // nhead)
    wqkv = xavier_uniform(ks[0], d_model, 3 * d_model)
    wqkv = wqkv.at[:, :d_model].multiply(scale)     # fold 1/sqrt(dk) into Q proj
    bqkv = jnp.zeros((3 * d_model,), jnp.float32)
    bqkv = bqkv.at[:d_model].multiply(scale)        # no-op for zero bias
    return {
        "wqkv": wqkv.astype(PARAM_DTYPE),
        "bqkv": bqkv,
        "wo": xavier_uniform(ks[1], d_model, d_model).astype(PARAM_DTYPE),
        "bo": jnp.zeros((d_model,), jnp.float32),
    }


def init_cross_attn(key, d_model, nhead):
    ks = jax.random.split(key, 3)
    scale = 1.0 / math.sqrt(d_model // nhead)
    wq = xavier_uniform(ks[0], d_model, d_model) * scale
    bq = jnp.zeros((d_model,), jnp.float32) * scale
    return {
        "wq": wq.astype(PARAM_DTYPE),
        "bq": bq,
        "wkv": xavier_uniform(ks[1], d_model, 2 * d_model).astype(PARAM_DTYPE),
        "bkv": jnp.zeros((2 * d_model,), jnp.float32),
        "wo": xavier_uniform(ks[2], d_model, d_model).astype(PARAM_DTYPE),
        "bo": jnp.zeros((d_model,), jnp.float32),
    }


def init_encoder_layer(key, d_model, dff, nhead):
    ks = jax.random.split(key, 3)
    return {
        "self_attn": init_self_attn(ks[0], d_model, nhead),
        "lin1_w": xavier_uniform(ks[1], d_model, dff).astype(PARAM_DTYPE),
        "lin1_b": jnp.zeros((dff,), jnp.float32),
        "lin2_w": xavier_uniform(ks[2], dff, d_model).astype(PARAM_DTYPE),
        "lin2_b": jnp.zeros((d_model,), jnp.float32),
        "ln1_g": jnp.ones((d_model,), jnp.float32),
        "ln1_b": jnp.zeros((d_model,), jnp.float32),
        "ln2_g": jnp.ones((d_model,), jnp.float32),
        "ln2_b": jnp.zeros((d_model,), jnp.float32),
    }


def init_decoder_layer(key, d_model, dff, nhead):
    ks = jax.random.split(key, 4)
    return {
        "self_attn": init_self_attn(ks[0], d_model, nhead),
        "cross_attn": init_cross_attn(ks[1], d_model, nhead),
        "lin1_w": xavier_uniform(ks[2], d_model, dff).astype(PARAM_DTYPE),
        "lin1_b": jnp.zeros((dff,), jnp.float32),
        "lin2_w": xavier_uniform(ks[3], dff, d_model).astype(PARAM_DTYPE),
        "lin2_b": jnp.zeros((d_model,), jnp.float32),
        "ln1_g": jnp.ones((d_model,), jnp.float32),
        "ln1_b": jnp.zeros((d_model,), jnp.float32),
        "ln2_g": jnp.ones((d_model,), jnp.float32),
        "ln2_b": jnp.zeros((d_model,), jnp.float32),
        "ln3_g": jnp.ones((d_model,), jnp.float32),
        "ln3_b": jnp.zeros((d_model,), jnp.float32),
    }


def init_model_params(key, input_dim, d_model, output_dim, dff, n_enc, n_dec,
                      nhead):
    keys = jax.random.split(key, 3 + n_enc + n_dec)
    return {
        "input_proj_w": xavier_uniform(keys[0], input_dim, d_model).astype(PARAM_DTYPE),
        "input_proj_b": jnp.zeros((d_model,), jnp.float32),
        "tgt_emb_w": xavier_uniform(keys[1], output_dim, d_model).astype(PARAM_DTYPE),
        "tgt_emb_b": jnp.zeros((d_model,), jnp.float32),
        "output_proj_w": xavier_uniform(keys[2], d_model, output_dim).astype(PARAM_DTYPE),
        "output_proj_b": jnp.zeros((output_dim,), jnp.float32),
        "enc_layers": [init_encoder_layer(keys[3 + i], d_model, dff, nhead)
                       for i in range(n_enc)],
        "dec_layers": [init_decoder_layer(keys[3 + n_enc + i], d_model, dff, nhead)
                       for i in range(n_dec)],
    }


def positional_encoding(max_len, d_model):
    position = jnp.arange(max_len, dtype=jnp.float32)[:, None]
    div_term = jnp.exp(jnp.arange(0, d_model, 2, dtype=jnp.float32)
                       * (-math.log(10000.0) / d_model))
    pe = jnp.zeros((max_len, d_model), dtype=jnp.float32)
    pe = pe.at[:, 0::2].set(jnp.sin(position * div_term))
    pe = pe.at[:, 1::2].set(jnp.cos(position * div_term))
    return pe


# ----------------------------- model forward -------------------------------

def encoder_layer_fwd(x, p, nhead):
    B, S, D = x.shape
    x = self_attention_block(x, p["self_attn"], p["ln1_g"], p["ln1_b"], nhead)
    y = ffn_add_ln(x.reshape(B * S, D), p["lin1_w"], p["lin1_b"],
                   p["lin2_w"], p["lin2_b"], p["ln2_g"], p["ln2_b"])
    return y.reshape(B, S, D)


def decoder_layer_fwd(t, memory, p, nhead):
    B, T, D = t.shape
    t = self_attention_block(t, p["self_attn"], p["ln1_g"], p["ln1_b"], nhead)
    t = cross_attention_block(t, memory, p["cross_attn"],
                              p["ln2_g"], p["ln2_b"], nhead)
    y = ffn_add_ln(t.reshape(B * T, D), p["lin1_w"], p["lin1_b"],
                   p["lin2_w"], p["lin2_b"], p["ln3_g"], p["ln3_b"])
    return y.reshape(B, T, D)


def output_projection(t2d, w, b):
    """Final projection computed into a lane-dense (>=128, multiple of 128)
    slab to avoid masked partial stores; sliced back outside the kernel."""
    M, D = t2d.shape
    N = w.shape[1]
    n_pad = max(128, ((N + 127) // 128) * 128)
    if n_pad != N:
        w = jnp.pad(w, ((0, 0), (0, n_pad - N)))
        b = jnp.pad(b, (0, n_pad - N))
    out = linear(t2d, w, b)
    return out[:, :N]


@functools.partial(jax.jit, static_argnames=("nhead",))
def transformer_forward(params, src, tgt, pe, nhead):
    """src: [B, S, input_dim]; tgt: [B, T, output_dim] -> [B, T, output_dim]."""
    B, S, _ = src.shape
    _, T, out_dim = tgt.shape
    D = params["input_proj_w"].shape[1]

    # ---- AudioEncoder ----
    x = linear(src.astype(ACT_DTYPE).reshape(B * S, src.shape[-1]),
               params["input_proj_w"], params["input_proj_b"])
    x = (x.astype(jnp.float32).reshape(B, S, D) + pe[:S][None]).astype(ACT_DTYPE)
    for lp in params["enc_layers"]:
        x = encoder_layer_fwd(x, lp, nhead)
    memory = x

    # ---- tgt embedding + BeatmapDecoder ----
    t = linear(tgt.astype(ACT_DTYPE).reshape(B * T, out_dim),
               params["tgt_emb_w"], params["tgt_emb_b"])
    t = (t.astype(jnp.float32).reshape(B, T, D) + pe[:T][None]).astype(ACT_DTYPE)
    for lp in params["dec_layers"]:
        t = decoder_layer_fwd(t, memory, lp, nhead)

    out = output_projection(t.reshape(B * T, D),
                            params["output_proj_w"], params["output_proj_b"])
    return out.reshape(B, T, out_dim).astype(jnp.float32)


# ----------------------------- demo -----------------------------------------

if __name__ == "__main__":
    INPUT_DIM, D_MODEL, OUTPUT_DIM = 32, 64, 16
    NHEAD, N_ENC, N_DEC, DFF = 4, 2, 2, 128
    B, S_SRC, S_TGT = 2, 16, 8

    key = jax.random.PRNGKey(0)
    pkey, skey, tkey = jax.random.split(key, 3)

    params = init_model_params(pkey, INPUT_DIM, D_MODEL, OUTPUT_DIM,
                               DFF, N_ENC, N_DEC, NHEAD)
    pe = positional_encoding(max(S_SRC, S_TGT), D_MODEL)

    src = jax.random.normal(skey, (B, S_SRC, INPUT_DIM), dtype=jnp.float32)
    tgt = jax.random.normal(tkey, (B, S_TGT, OUTPUT_DIM), dtype=jnp.float32)

    out = transformer_forward(params, src, tgt, pe, nhead=NHEAD)
    out = jax.block_until_ready(out)
    assert out.shape == (B, S_TGT, OUTPUT_DIM)
    assert bool(jnp.all(jnp.isfinite(out)))
    print("KERNEL_OK")
</pallas_src>

<mosaic_0001>
module attributes {stable_mosaic.version = 11 : i64} {
  func.func @_matmul_kernel(%arg0: i32, %arg1: i32, %arg2: i32, %arg3: memref<32x32xbf16, #tpu.memory_space<vmem>>, %arg4: memref<32x64xbf16, #tpu.memory_space<vmem>>, %arg5: memref<1x64xf32, #tpu.memory_space<vmem>>, %arg6: memref<32x64xbf16, #tpu.memory_space<vmem>>, %arg7: memref<32x64xf32, #tpu.memory_space<vmem>>) attributes {dimension_semantics = [#tpu.dimension_semantics<parallel>, #tpu.dimension_semantics<parallel>, #tpu.dimension_semantics<arbitrary>], iteration_bounds = array<i64: 1, 1, 1>, scalar_prefetch = 0 : i64, scratch_operands = 1 : i64, tpu.core_type = #tpu.core_type<tc>, window_params = [{transform_indices = @transform_0, window_bounds = array<i64: 32, 32>}, {transform_indices = @transform_1, window_bounds = array<i64: 32, 64>}, {transform_indices = @transform_2, window_bounds = array<i64: 1, 64>}, {transform_indices = @transform_3, window_bounds = array<i64: 32, 64>}]} {
    %c0_i32 = arith.constant 0 : i32
    %0 = arith.cmpi eq, %arg2, %c0_i32 : i32
    %1 = arith.extui %0 : i1 to i32
    %c0_i32_0 = arith.constant 0 : i32
    %2 = arith.cmpi ne, %1, %c0_i32_0 : i32
    scf.if %2 {
      %cst_10 = arith.constant 0.000000e+00 : f32
      %12 = vector.broadcast %cst_10 : f32 to vector<32x64xf32>
      %c0_11 = arith.constant 0 : index
      %c0_12 = arith.constant 0 : index
      %13 = vector.load %arg7[%c0_11, %c0_12] : memref<32x64xf32, #tpu.memory_space<vmem>>, vector<32x64xf32>
      tpu.vector_store %arg7[%c0_11, %c0_12], %12 {strides = array<i32>} : memref<32x64xf32, #tpu.memory_space<vmem>>, vector<32x64xf32>,
    } else {
    }
    %c0 = arith.constant 0 : index
    %c0_1 = arith.constant 0 : index
    %3 = vector.load %arg7[%c0, %c0_1] : memref<32x64xf32, #tpu.memory_space<vmem>>, vector<32x64xf32>
    %c0_2 = arith.constant 0 : index
    %c0_3 = arith.constant 0 : index
    %4 = vector.load %arg3[%c0_2, %c0_3] : memref<32x32xbf16, #tpu.memory_space<vmem>>, vector<32x32xbf16>
    %c0_4 = arith.constant 0 : index
    %c0_5 = arith.constant 0 : index
    %5 = vector.load %arg4[%c0_4, %c0_5] : memref<32x64xbf16, #tpu.memory_space<vmem>>, vector<32x64xbf16>
    %cst = arith.constant dense<0.000000e+00> : vector<32x64xf32>
    %6 = tpu.matmul %4, %5, %cst {dimension_numbers = #tpu.dot_dimension_numbers<[1], [0], [0], [1], [0, 0, 1, 1], [], []>} : vector<32x32xbf16>, vector<32x64xbf16>, vector<32x64xf32> -> vector<32x64xf32>
    %7 = arith.addf %3, %6 : vector<32x64xf32>
    %c0_6 = arith.constant 0 : index
    %c0_7 = arith.constant 0 : index
    %8 = vector.load %arg7[%c0_6, %c0_7] : memref<32x64xf32, #tpu.memory_space<vmem>>, vector<32x64xf32>
    tpu.vector_store %arg7[%c0_6, %c0_7], %7 {strides = array<i32>} : memref<32x64xf32, #tpu.memory_space<vmem>>, vector<32x64xf32>,
    %c0_i32_8 = arith.constant 0 : i32
    %9 = arith.cmpi eq, %arg2, %c0_i32_8 : i32
    %10 = arith.extui %9 : i1 to i32
    %c0_i32_9 = arith.constant 0 : i32
    %11 = arith.cmpi ne, %10, %c0_i32_9 : i32
    scf.if %11 {
      %c0_10 = arith.constant 0 : index
      %c0_11 = arith.constant 0 : index
      %12 = vector.load %arg7[%c0_10, %c0_11] : memref<32x64xf32, #tpu.memory_space<vmem>>, vector<32x64xf32>
      %c0_12 = arith.constant 0 : index
      %c0_13 = arith.constant 0 : index
      %13 = vector.load %arg5[%c0_12, %c0_13] : memref<1x64xf32, #tpu.memory_space<vmem>>, vector<1x64xf32>
      %14 = vector.broadcast %13 : vector<1x64xf32> to vector<32x64xf32>
      %15 = arith.addf %12, %14 : vector<32x64xf32>
      %16 = arith.truncf %15 : vector<32x64xf32> to vector<32x64xbf16>
      %c0_14 = arith.constant 0 : index
      %c0_15 = arith.constant 0 : index
      %17 = vector.load %arg6[%c0_14, %c0_15] : memref<32x64xbf16, #tpu.memory_space<vmem>>, vector<32x64xbf16>
      tpu.vector_store %arg6[%c0_14, %c0_15], %16 {strides = array<i32>} : memref<32x64xbf16, #tpu.memory_space<vmem>>, vector<32x64xbf16>,
    } else {
    }
    return
  }
  func.func @transform_0(%arg0: i32, %arg1: i32, %arg2: i32) -> (i32, i32) {
    %c0_i32 = arith.constant 0 : i32
    return %arg0, %arg2 : i32, i32
  }
  func.func @transform_1(%arg0: i32, %arg1: i32, %arg2: i32) -> (i32, i32) {
    %c0_i32 = arith.constant 0 : i32
    return %arg2, %arg1 : i32, i32
  }
  func.func @transform_2(%arg0: i32, %arg1: i32, %arg2: i32) -> (i32, i32) {
    %c0_i32 = arith.constant 0 : i32
    %c0_i32_0 = arith.constant 0 : i32
    return %c0_i32, %arg1 : i32, i32
  }
  func.func @transform_3(%arg0: i32, %arg1: i32, %arg2: i32) -> (i32, i32) {
    %c0_i32 = arith.constant 0 : i32
    return %arg0, %arg1 : i32, i32
  }
}

module attributes {stable_mosaic.version = 11 : i64} {
  func.func @_matmul_kernel(%arg0: i32, %arg1: i32, %arg2: i32, %arg3: memref<32x64xbf16, #tpu.memory_space<vmem>>, %arg4: memref<64x192xbf16, #tpu.memory_space<vmem>>, %arg5: memref<1x192xf32, #tpu.memory_space<vmem>>, %arg6: memref<32x192xbf16, #tpu.memory_space<vmem>>, %arg7: memref<32x192xf32, #tpu.memory_space<vmem>>) attributes {dimension_semantics = [#tpu.dimension_semantics<parallel>, #tpu.dimension_semantics<parallel>, #tpu.dimension_semantics<arbitrary>], iteration_bounds = array<i64: 1, 1, 1>, scalar_prefetch = 0 : i64, scratch_operands = 1 : i64, tpu.core_type = #tpu.core_type<tc>, window_params = [{transform_indices = @transform_0, window_bounds = array<i64: 32, 64>}, {transform_indices = @transform_1, window_bounds = array<i64: 64, 192>}, {transform_indices = @transform_2, window_bounds = array<i64: 1, 192>}, {transform_indices = @transform_3, window_bounds = array<i64: 32, 192>}]} {
    %c0_i32 = arith.constant 0 : i32
    %0 = arith.cmpi eq, %arg2, %c0_i32 : i32
    %1 = arith.extui %0 : i1 to i32
    %c0_i32_0 = arith.constant 0 : i32
    %2 = arith.cmpi ne, %1, %c0_i32_0 : i32
    scf.if %2 {
      %cst_10 = arith.constant 0.000000e+00 : f32
      %12 = vector.broadcast %cst_10 : f32 to vector<32x192xf32>
      %c0_11 = arith.constant 0 : index
      %c0_12 = arith.constant 0 : index
      %13 = vector.load %arg7[%c0_11, %c0_12] : memref<32x192xf32, #tpu.memory_space<vmem>>, vector<32x192xf32>
      tpu.vector_store %arg7[%c0_11, %c0_12], %12 {strides = array<i32>} : memref<32x192xf32, #tpu.memory_space<vmem>>, vector<32x192xf32>,
    } else {
    }
    %c0 = arith.constant 0 : index
    %c0_1 = arith.constant 0 : index
    %3 = vector.load %arg7[%c0, %c0_1] : memref<32x192xf32, #tpu.memory_space<vmem>>, vector<32x192xf32>
    %c0_2 = arith.constant 0 : index
    %c0_3 = arith.constant 0 : index
    %4 = vector.load %arg3[%c0_2, %c0_3] : memref<32x64xbf16, #tpu.memory_space<vmem>>, vector<32x64xbf16>
    %c0_4 = arith.constant 0 : index
    %c0_5 = arith.constant 0 : index
    %5 = vector.load %arg4[%c0_4, %c0_5] : memref<64x192xbf16, #tpu.memory_space<vmem>>, vector<64x192xbf16>
    %cst = arith.constant dense<0.000000e+00> : vector<32x192xf32>
    %6 = tpu.matmul %4, %5, %cst {dimension_numbers = #tpu.dot_dimension_numbers<[1], [0], [0], [1], [0, 0, 1, 1], [], []>} : vector<32x64xbf16>, vector<64x192xbf16>, vector<32x192xf32> -> vector<32x192xf32>
    %7 = arith.addf %3, %6 : vector<32x192xf32>
    %c0_6 = arith.constant 0 : index
    %c0_7 = arith.constant 0 : index
    %8 = vector.load %arg7[%c0_6, %c0_7] : memref<32x192xf32, #tpu.memory_space<vmem>>, vector<32x192xf32>
    tpu.vector_store %arg7[%c0_6, %c0_7], %7 {strides = array<i32>} : memref<32x192xf32, #tpu.memory_space<vmem>>, vector<32x192xf32>,
    %c0_i32_8 = arith.constant 0 : i32
    %9 = arith.cmpi eq, %arg2, %c0_i32_8 : i32
    %10 = arith.extui %9 : i1 to i32
    %c0_i32_9 = arith.constant 0 : i32
    %11 = arith.cmpi ne, %10, %c0_i32_9 : i32
    scf.if %11 {
      %c0_10 = arith.constant 0 : index
      %c0_11 = arith.constant 0 : index
      %12 = vector.load %arg7[%c0_10, %c0_11] : memref<32x192xf32, #tpu.memory_space<vmem>>, vector<32x192xf32>
      %c0_12 = arith.constant 0 : index
      %c0_13 = arith.constant 0 : index
      %13 = vector.load %arg5[%c0_12, %c0_13] : memref<1x192xf32, #tpu.memory_space<vmem>>, vector<1x192xf32>
      %14 = vector.broadcast %13 : vector<1x192xf32> to vector<32x192xf32>
      %15 = arith.addf %12, %14 : vector<32x192xf32>
      %16 = arith.truncf %15 : vector<32x192xf32> to vector<32x192xbf16>
      %c0_14 = arith.constant 0 : index
      %c0_15 = arith.constant 0 : index
      %17 = vector.load %arg6[%c0_14, %c0_15] : memref<32x192xbf16, #tpu.memory_space<vmem>>, vector<32x192xbf16>
      tpu.vector_store %arg6[%c0_14, %c0_15], %16 {strides = array<i32>} : memref<32x192xbf16, #tpu.memory_space<vmem>>, vector<32x192xbf16>,
    } else {
    }
    return
  }
  func.func @transform_0(%arg0: i32, %arg1: i32, %arg2: i32) -> (i32, i32) {
    %c0_i32 = arith.constant 0 : i32
    return %arg0, %arg2 : i32, i32
  }
  func.func @transform_1(%arg0: i32, %arg1: i32, %arg2: i32) -> (i32, i32) {
    %c0_i32 = arith.constant 0 : i32
    return %arg2, %arg1 : i32, i32
  }
  func.func @transform_2(%arg0: i32, %arg1: i32, %arg2: i32) -> (i32, i32) {
    %c0_i32 = arith.constant 0 : i32
    %c0_i32_0 = arith.constant 0 : i32
    return %c0_i32, %arg1 : i32, i32
  }
  func.func @transform_3(%arg0: i32, %arg1: i32, %arg2: i32) -> (i32, i32) {
    %c0_i32 = arith.constant 0 : i32
    return %arg0, %arg1 : i32, i32
  }
}

module attributes {stable_mosaic.version = 11 : i64} {
  func.func @_attention_kernel(%arg0: i32, %arg1: i32, %arg2: memref<1x1x16x16xbf16, #tpu.memory_space<vmem>>, %arg3: memref<1x1x16x16xbf16, #tpu.memory_space<vmem>>, %arg4: memref<1x1x16x16xbf16, #tpu.memory_space<vmem>>, %arg5: memref<1x1x16x16xbf16, #tpu.memory_space<vmem>>) attributes {dimension_semantics = [#tpu.dimension_semantics<parallel>, #tpu.dimension_semantics<parallel>], iteration_bounds = array<i64: 2, 4>, scalar_prefetch = 0 : i64, scratch_operands = 0 : i64, tpu.core_type = #tpu.core_type<tc>, window_params = [{transform_indices = @transform_0, window_bounds = array<i64: 1, 1, 16, 16>}, {transform_indices = @transform_1, window_bounds = array<i64: 1, 1, 16, 16>}, {transform_indices = @transform_2, window_bounds = array<i64: 1, 1, 16, 16>}, {transform_indices = @transform_3, window_bounds = array<i64: 1, 1, 16, 16>}]} {
    %c0 = arith.constant 0 : index
    %c0_0 = arith.constant 0 : index
    %c0_1 = arith.constant 0 : index
    %c0_2 = arith.constant 0 : index
    %0 = vector.load %arg2[%c0, %c0_0, %c0_1, %c0_2] : memref<1x1x16x16xbf16, #tpu.memory_space<vmem>>, vector<1x1x16x16xbf16>
    %1 = vector.shape_cast %0 : vector<1x1x16x16xbf16> to vector<16x16xbf16>
    %c0_3 = arith.constant 0 : index
    %c0_4 = arith.constant 0 : index
    %c0_5 = arith.constant 0 : index
    %c0_6 = arith.constant 0 : index
    %2 = vector.load %arg3[%c0_3, %c0_4, %c0_5, %c0_6] : memref<1x1x16x16xbf16, #tpu.memory_space<vmem>>, vector<1x1x16x16xbf16>
    %3 = vector.shape_cast %2 : vector<1x1x16x16xbf16> to vector<16x16xbf16>
    %c0_7 = arith.constant 0 : index
    %c0_8 = arith.constant 0 : index
    %c0_9 = arith.constant 0 : index
    %c0_10 = arith.constant 0 : index
    %4 = vector.load %arg4[%c0_7, %c0_8, %c0_9, %c0_10] : memref<1x1x16x16xbf16, #tpu.memory_space<vmem>>, vector<1x1x16x16xbf16>
    %5 = vector.shape_cast %4 : vector<1x1x16x16xbf16> to vector<16x16xbf16>
    %cst = arith.constant dense<0.000000e+00> : vector<16x16xf32>
    %6 = tpu.matmul %1, %3, %cst {dimension_numbers = #tpu.dot_dimension_numbers<[1], [1], [0], [0], [0, 0, 1, 0], [], []>} : vector<16x16xbf16>, vector<16x16xbf16>, vector<16x16xf32> -> vector<16x16xf32>
    %cst_11 = arith.constant dense<0xFF800000> : vector<16xf32>
    %7 = vector.multi_reduction <maximumf>, %6, %cst_11 [1] : vector<16x16xf32> to vector<16xf32>
    %8 = vector.shape_cast %7 : vector<16xf32> to vector<16x1xf32>
    %9 = vector.broadcast %8 : vector<16x1xf32> to vector<16x16xf32>
    %10 = arith.subf %6, %9 : vector<16x16xf32>
    %11 = math.exp %10 : vector<16x16xf32>
    %cst_12 = arith.constant dense<0.000000e+00> : vector<16xf32>
    %12 = vector.multi_reduction <add>, %11, %cst_12 [1] : vector<16x16xf32> to vector<16xf32>
    %13 = vector.shape_cast %12 : vector<16xf32> to vector<16x1xf32>
    %14 = tpu.reciprocal %13 {approx = true} : vector<16x1xf32> -> vector<16x1xf32>
    %15 = vector.broadcast %14 : vector<16x1xf32> to vector<16x16xf32>
    %16 = arith.mulf %11, %15 : vector<16x16xf32>
    %17 = arith.truncf %16 : vector<16x16xf32> to vector<16x16xbf16>
    %cst_13 = arith.constant dense<0.000000e+00> : vector<16x16xf32>
    %18 = tpu.matmul %17, %5, %cst_13 {dimension_numbers = #tpu.dot_dimension_numbers<[1], [0], [0], [1], [0, 0, 1, 1], [], []>} : vector<16x16xbf16>, vector<16x16xbf16>, vector<16x16xf32> -> vector<16x16xf32>
    %19 = arith.truncf %18 : vector<16x16xf32> to vector<16x16xbf16>
    %c0_14 = arith.constant 0 : index
    %c0_15 = arith.constant 0 : index
    %c0_16 = arith.constant 0 : index
    %c0_17 = arith.constant 0 : index
    %20 = vector.load %arg5[%c0_14, %c0_15, %c0_16, %c0_17] : memref<1x1x16x16xbf16, #tpu.memory_space<vmem>>, vector<1x1x16x16xbf16>
    %21 = vector.shape_cast %20 : vector<1x1x16x16xbf16> to vector<16x16xbf16>
    %22 = vector.shape_cast %19 : vector<16x16xbf16> to vector<1x1x16x16xbf16>
    tpu.vector_store %arg5[%c0_14, %c0_15, %c0_16, %c0_17], %22 {strides = array<i32>} : memref<1x1x16x16xbf16, #tpu.memory_space<vmem>>, vector<1x1x16x16xbf16>,
    return
  }
  func.func @transform_0(%arg0: i32, %arg1: i32) -> (i32, i32, i32, i32) {
    %c0_i32 = arith.constant 0 : i32
    %c0_i32_0 = arith.constant 0 : i32
    %c0_i32_1 = arith.constant 0 : i32
    return %arg0, %arg1, %c0_i32, %c0_i32_0 : i32, i32, i32, i32
  }
  func.func @transform_1(%arg0: i32, %arg1: i32) -> (i32, i32, i32, i32) {
    %c0_i32 = arith.constant 0 : i32
    %c0_i32_0 = arith.constant 0 : i32
    %c0_i32_1 = arith.constant 0 : i32
    return %arg0, %arg1, %c0_i32, %c0_i32_0 : i32, i32, i32, i32
  }
  func.func @transform_2(%arg0: i32, %arg1: i32) -> (i32, i32, i32, i32) {
    %c0_i32 = arith.constant 0 : i32
    %c0_i32_0 = arith.constant 0 : i32
    %c0_i32_1 = arith.constant 0 : i32
    return %arg0, %arg1, %c0_i32, %c0_i32_0 : i32, i32, i32, i32
  }
  func.func @transform_3(%arg0: i32, %arg1: i32) -> (i32, i32, i32, i32) {
    %c0_i32 = arith.constant 0 : i32
    %c0_i32_0 = arith.constant 0 : i32
    %c0_i32_1 = arith.constant 0 : i32
    return %arg0, %arg1, %c0_i32, %c0_i32_0 : i32, i32, i32, i32
  }
}

module attributes {stable_mosaic.version = 11 : i64} {
  func.func @_matmul_add_ln_kernel(%arg0: i32, %arg1: i32, %arg2: memref<32x64xbf16, #tpu.memory_space<vmem>>, %arg3: memref<64x64xbf16, #tpu.memory_space<vmem>>, %arg4: memref<1x64xf32, #tpu.memory_space<vmem>>, %arg5: memref<32x64xbf16, #tpu.memory_space<vmem>>, %arg6: memref<1x64xf32, #tpu.memory_space<vmem>>, %arg7: memref<1x64xf32, #tpu.memory_space<vmem>>, %arg8: memref<32x64xbf16, #tpu.memory_space<vmem>>, %arg9: memref<32x64xf32, #tpu.memory_space<vmem>>) attributes {dimension_semantics = [#tpu.dimension_semantics<parallel>, #tpu.dimension_semantics<arbitrary>], iteration_bounds = array<i64: 1, 1>, scalar_prefetch = 0 : i64, scratch_operands = 1 : i64, tpu.core_type = #tpu.core_type<tc>, window_params = [{transform_indices = @transform_0, window_bounds = array<i64: 32, 64>}, {transform_indices = @transform_1, window_bounds = array<i64: 64, 64>}, {pipeline_mode = #tpu.pipeline_mode<synchronous>, transform_indices = @transform_2, window_bounds = array<i64: 1, 64>}, {transform_indices = @transform_3, window_bounds = array<i64: 32, 64>}, {pipeline_mode = #tpu.pipeline_mode<synchronous>, transform_indices = @transform_4, window_bounds = array<i64: 1, 64>}, {pipeline_mode = #tpu.pipeline_mode<synchronous>, transform_indices = @transform_5, window_bounds = array<i64: 1, 64>}, {transform_indices = @transform_6, window_bounds = array<i64: 32, 64>}]} {
    %c0_i32 = arith.constant 0 : i32
    %0 = arith.cmpi eq, %arg1, %c0_i32 : i32
    %1 = arith.extui %0 : i1 to i32
    %c0_i32_0 = arith.constant 0 : i32
    %2 = arith.cmpi ne, %1, %c0_i32_0 : i32
    scf.if %2 {
      %cst_10 = arith.constant 0.000000e+00 : f32
      %12 = vector.broadcast %cst_10 : f32 to vector<32x64xf32>
      %c0_11 = arith.constant 0 : index
      %c0_12 = arith.constant 0 : index
      %13 = vector.load %arg9[%c0_11, %c0_12] : memref<32x64xf32, #tpu.memory_space<vmem>>, vector<32x64xf32>
      tpu.vector_store %arg9[%c0_11, %c0_12], %12 {strides = array<i32>} : memref<32x64xf32, #tpu.memory_space<vmem>>, vector<32x64xf32>,
    } else {
    }
    %c0 = arith.constant 0 : index
    %c0_1 = arith.constant 0 : index
    %3 = vector.load %arg9[%c0, %c0_1] : memref<32x64xf32, #tpu.memory_space<vmem>>, vector<32x64xf32>
    %c0_2 = arith.constant 0 : index
    %c0_3 = arith.constant 0 : index
    %4 = vector.load %arg2[%c0_2, %c0_3] : memref<32x64xbf16, #tpu.memory_space<vmem>>, vector<32x64xbf16>
    %c0_4 = arith.constant 0 : index
    %c0_5 = arith.constant 0 : index
    %5 = vector.load %arg3[%c0_4, %c0_5] : memref<64x64xbf16, #tpu.memory_space<vmem>>, vector<64x64xbf16>
    %cst = arith.constant dense<0.000000e+00> : vector<32x64xf32>
    %6 = tpu.matmul %4, %5, %cst {dimension_numbers = #tpu.dot_dimension_numbers<[1], [0], [0], [1], [0, 0, 1, 1], [], []>} : vector<32x64xbf16>, vector<64x64xbf16>, vector<32x64xf32> -> vector<32x64xf32>
    %7 = arith.addf %3, %6 : vector<32x64xf32>
    %c0_6 = arith.constant 0 : index
    %c0_7 = arith.constant 0 : index
    %8 = vector.load %arg9[%c0_6, %c0_7] : memref<32x64xf32, #tpu.memory_space<vmem>>, vector<32x64xf32>
    tpu.vector_store %arg9[%c0_6, %c0_7], %7 {strides = array<i32>} : memref<32x64xf32, #tpu.memory_space<vmem>>, vector<32x64xf32>,
    %c0_i32_8 = arith.constant 0 : i32
    %9 = arith.cmpi eq, %arg1, %c0_i32_8 : i32
    %10 = arith.extui %9 : i1 to i32
    %c0_i32_9 = arith.constant 0 : i32
    %11 = arith.cmpi ne, %10, %c0_i32_9 : i32
    scf.if %11 {
      %c0_10 = arith.constant 0 : index
      %c0_11 = arith.constant 0 : index
      %12 = vector.load %arg9[%c0_10, %c0_11] : memref<32x64xf32, #tpu.memory_space<vmem>>, vector<32x64xf32>
      %c0_12 = arith.constant 0 : index
      %c0_13 = arith.constant 0 : index
      %13 = vector.load %arg4[%c0_12, %c0_13] : memref<1x64xf32, #tpu.memory_space<vmem>>, vector<1x64xf32>
      %14 = vector.broadcast %13 : vector<1x64xf32> to vector<32x64xf32>
      %15 = arith.addf %12, %14 : vector<32x64xf32>
      %c0_14 = arith.constant 0 : index
      %c0_15 = arith.constant 0 : index
      %16 = vector.load %arg5[%c0_14, %c0_15] : memref<32x64xbf16, #tpu.memory_space<vmem>>, vector<32x64xbf16>
      %17 = arith.extf %16 : vector<32x64xbf16> to vector<32x64xf32>
      %18 = arith.addf %15, %17 : vector<32x64xf32>
      %cst_16 = arith.constant dense<0.000000e+00> : vector<32xf32>
      %19 = vector.multi_reduction <add>, %18, %cst_16 [1] : vector<32x64xf32> to vector<32xf32>
      %20 = vector.shape_cast %19 : vector<32xf32> to vector<32x1xf32>
      %cst_17 = arith.constant 6.400000e+01 : f32
      %21 = vector.broadcast %cst_17 : f32 to vector<32x1xf32>
      %22 = arith.divf %20, %21 : vector<32x1xf32>
      %23 = vector.broadcast %22 : vector<32x1xf32> to vector<32x64xf32>
      %24 = arith.subf %18, %23 : vector<32x64xf32>
      %25 = arith.mulf %24, %24 : vector<32x64xf32>
      %cst_18 = arith.constant dense<0.000000e+00> : vector<32xf32>
      %26 = vector.multi_reduction <add>, %25, %cst_18 [1] : vector<32x64xf32> to vector<32xf32>
      %27 = vector.shape_cast %26 : vector<32xf32> to vector<32x1xf32>
      %cst_19 = arith.constant 6.400000e+01 : f32
      %28 = vector.broadcast %cst_19 : f32 to vector<32x1xf32>
      %29 = arith.divf %27, %28 : vector<32x1xf32>
      %30 = vector.broadcast %22 : vector<32x1xf32> to vector<32x64xf32>
      %31 = arith.subf %18, %30 : vector<32x64xf32>
      %cst_20 = arith.constant 9.99999974E-6 : f32
      %32 = vector.broadcast %cst_20 : f32 to vector<32x1xf32>
      %33 = arith.addf %29, %32 : vector<32x1xf32>
      %34 = math.rsqrt %33 : vector<32x1xf32>
      %35 = vector.broadcast %34 : vector<32x1xf32> to vector<32x64xf32>
      %36 = arith.mulf %31, %35 : vector<32x64xf32>
      %c0_21 = arith.constant 0 : index
      %c0_22 = arith.constant 0 : index
      %37 = vector.load %arg6[%c0_21, %c0_22] : memref<1x64xf32, #tpu.memory_space<vmem>>, vector<1x64xf32>
      %38 = vector.broadcast %37 : vector<1x64xf32> to vector<32x64xf32>
      %39 = arith.mulf %36, %38 : vector<32x64xf32>
      %c0_23 = arith.constant 0 : index
      %c0_24 = arith.constant 0 : index
      %40 = vector.load %arg7[%c0_23, %c0_24] : memref<1x64xf32, #tpu.memory_space<vmem>>, vector<1x64xf32>
      %41 = vector.broadcast %40 : vector<1x64xf32> to vector<32x64xf32>
      %42 = arith.addf %39, %41 : vector<32x64xf32>
      %43 = arith.truncf %42 : vector<32x64xf32> to vector<32x64xbf16>
      %c0_25 = arith.constant 0 : index
      %c0_26 = arith.constant 0 : index
      %44 = vector.load %arg8[%c0_25, %c0_26] : memref<32x64xbf16, #tpu.memory_space<vmem>>, vector<32x64xbf16>
      tpu.vector_store %arg8[%c0_25, %c0_26], %43 {strides = array<i32>} : memref<32x64xbf16, #tpu.memory_space<vmem>>, vector<32x64xbf16>,
    } else {
    }
    return
  }
  func.func @transform_0(%arg0: i32, %arg1: i32) -> (i32, i32) {
    %c0_i32 = arith.constant 0 : i32
    return %arg0, %arg1 : i32, i32
  }
  func.func @transform_1(%arg0: i32, %arg1: i32) -> (i32, i32) {
    %c0_i32 = arith.constant 0 : i32
    %c0_i32_0 = arith.constant 0 : i32
    return %arg1, %c0_i32 : i32, i32
  }
  func.func @transform_2(%arg0: i32, %arg1: i32) -> (i32, i32) {
    %c0_i32 = arith.constant 0 : i32
    %c0_i32_0 = arith.constant 0 : i32
    %c0_i32_1 = arith.constant 0 : i32
    return %c0_i32, %c0_i32_0 : i32, i32
  }
  func.func @transform_3(%arg0: i32, %arg1: i32) -> (i32, i32) {
    %c0_i32 = arith.constant 0 : i32
    %c0_i32_0 = arith.constant 0 : i32
    return %arg0, %c0_i32 : i32, i32
  }
  func.func @transform_4(%arg0: i32, %arg1: i32) -> (i32, i32) {
    %c0_i32 = arith.constant 0 : i32
    %c0_i32_0 = arith.constant 0 : i32
    %c0_i32_1 = arith.constant 0 : i32
    return %c0_i32, %c0_i32_0 : i32, i32
  }
  func.func @transform_5(%arg0: i32, %arg1: i32) -> (i32, i32) {
    %c0_i32 = arith.constant 0 : i32
    %c0_i32_0 = arith.constant 0 : i32
    %c0_i32_1 = arith.constant 0 : i32
    return %c0_i32, %c0_i32_0 : i32, i32
  }
  func.func @transform_6(%arg0: i32, %arg1: i32) -> (i32, i32) {
    %c0_i32 = arith.constant 0 : i32
    %c0_i32_0 = arith.constant 0 : i32
    return %arg0, %c0_i32 : i32, i32
  }
}

module attributes {stable_mosaic.version = 11 : i64} {
  func.func @_ffn_add_ln_kernel(%arg0: i32, %arg1: memref<32x64xbf16, #tpu.memory_space<vmem>>, %arg2: memref<64x128xbf16, #tpu.memory_space<vmem>>, %arg3: memref<1x128xf32, #tpu.memory_space<vmem>>, %arg4: memref<128x64xbf16, #tpu.memory_space<vmem>>, %arg5: memref<1x64xf32, #tpu.memory_space<vmem>>, %arg6: memref<1x64xf32, #tpu.memory_space<vmem>>, %arg7: memref<1x64xf32, #tpu.memory_space<vmem>>, %arg8: memref<32x64xbf16, #tpu.memory_space<vmem>>) attributes {dimension_semantics = [#tpu.dimension_semantics<parallel>], iteration_bounds = array<i64: 1>, scalar_prefetch = 0 : i64, scratch_operands = 0 : i64, tpu.core_type = #tpu.core_type<tc>, window_params = [{transform_indices = @transform_0, window_bounds = array<i64: 32, 64>}, {pipeline_mode = #tpu.pipeline_mode<synchronous>, transform_indices = @transform_1, window_bounds = array<i64: 64, 128>}, {pipeline_mode = #tpu.pipeline_mode<synchronous>, transform_indices = @transform_2, window_bounds = array<i64: 1, 128>}, {pipeline_mode = #tpu.pipeline_mode<synchronous>, transform_indices = @transform_3, window_bounds = array<i64: 128, 64>}, {pipeline_mode = #tpu.pipeline_mode<synchronous>, transform_indices = @transform_4, window_bounds = array<i64: 1, 64>}, {pipeline_mode = #tpu.pipeline_mode<synchronous>, transform_indices = @transform_5, window_bounds = array<i64: 1, 64>}, {pipeline_mode = #tpu.pipeline_mode<synchronous>, transform_indices = @transform_6, window_bounds = array<i64: 1, 64>}, {transform_indices = @transform_7, window_bounds = array<i64: 32, 64>}]} {
    %c0 = arith.constant 0 : index
    %c0_0 = arith.constant 0 : index
    %0 = vector.load %arg1[%c0, %c0_0] : memref<32x64xbf16, #tpu.memory_space<vmem>>, vector<32x64xbf16>
    %c0_1 = arith.constant 0 : index
    %c0_2 = arith.constant 0 : index
    %1 = vector.load %arg2[%c0_1, %c0_2] : memref<64x128xbf16, #tpu.memory_space<vmem>>, vector<64x128xbf16>
    %cst = arith.constant dense<0.000000e+00> : vector<32x128xf32>
    %2 = tpu.matmul %0, %1, %cst {dimension_numbers = #tpu.dot_dimension_numbers<[1], [0], [0], [1], [0, 0, 1, 1], [], []>} : vector<32x64xbf16>, vector<64x128xbf16>, vector<32x128xf32> -> vector<32x128xf32>
    %c0_3 = arith.constant 0 : index
    %c0_4 = arith.constant 0 : index
    %3 = vector.load %arg3[%c0_3, %c0_4] : memref<1x128xf32, #tpu.memory_space<vmem>>, vector<1x128xf32>
    %4 = vector.broadcast %3 : vector<1x128xf32> to vector<32x128xf32>
    %5 = arith.addf %2, %4 : vector<32x128xf32>
    %cst_5 = arith.constant 0.000000e+00 : f32
    %6 = vector.broadcast %cst_5 : f32 to vector<32x128xf32>
    %7 = arith.maximumf %5, %6 : vector<32x128xf32>
    %8 = arith.truncf %7 : vector<32x128xf32> to vector<32x128xbf16>
    %c0_6 = arith.constant 0 : index
    %c0_7 = arith.constant 0 : index
    %9 = vector.load %arg4[%c0_6, %c0_7] : memref<128x64xbf16, #tpu.memory_space<vmem>>, vector<128x64xbf16>
    %cst_8 = arith.constant dense<0.000000e+00> : vector<32x64xf32>
    %10 = tpu.matmul %8, %9, %cst_8 {dimension_numbers = #tpu.dot_dimension_numbers<[1], [0], [0], [1], [0, 0, 1, 1], [], []>} : vector<32x128xbf16>, vector<128x64xbf16>, vector<32x64xf32> -> vector<32x64xf32>
    %c0_9 = arith.constant 0 : index
    %c0_10 = arith.constant 0 : index
    %11 = vector.load %arg5[%c0_9, %c0_10] : memref<1x64xf32, #tpu.memory_space<vmem>>, vector<1x64xf32>
    %12 = vector.broadcast %11 : vector<1x64xf32> to vector<32x64xf32>
    %13 = arith.addf %10, %12 : vector<32x64xf32>
    %14 = arith.extf %0 : vector<32x64xbf16> to vector<32x64xf32>
    %15 = arith.addf %13, %14 : vector<32x64xf32>
    %cst_11 = arith.constant dense<0.000000e+00> : vector<32xf32>
    %16 = vector.multi_reduction <add>, %15, %cst_11 [1] : vector<32x64xf32> to vector<32xf32>
    %17 = vector.shape_cast %16 : vector<32xf32> to vector<32x1xf32>
    %cst_12 = arith.constant 6.400000e+01 : f32
    %18 = vector.broadcast %cst_12 : f32 to vector<32x1xf32>
    %19 = arith.divf %17, %18 : vector<32x1xf32>
    %20 = vector.broadcast %19 : vector<32x1xf32> to vector<32x64xf32>
    %21 = arith.subf %15, %20 : vector<32x64xf32>
    %22 = arith.mulf %21, %21 : vector<32x64xf32>
    %cst_13 = arith.constant dense<0.000000e+00> : vector<32xf32>
    %23 = vector.multi_reduction <add>, %22, %cst_13 [1] : vector<32x64xf32> to vector<32xf32>
    %24 = vector.shape_cast %23 : vector<32xf32> to vector<32x1xf32>
    %cst_14 = arith.constant 6.400000e+01 : f32
    %25 = vector.broadcast %cst_14 : f32 to vector<32x1xf32>
    %26 = arith.divf %24, %25 : vector<32x1xf32>
    %27 = vector.broadcast %19 : vector<32x1xf32> to vector<32x64xf32>
    %28 = arith.subf %15, %27 : vector<32x64xf32>
    %cst_15 = arith.constant 9.99999974E-6 : f32
    %29 = vector.broadcast %cst_15 : f32 to vector<32x1xf32>
    %30 = arith.addf %26, %29 : vector<32x1xf32>
    %31 = math.rsqrt %30 : vector<32x1xf32>
    %32 = vector.broadcast %31 : vector<32x1xf32> to vector<32x64xf32>
    %33 = arith.mulf %28, %32 : vector<32x64xf32>
    %c0_16 = arith.constant 0 : index
    %c0_17 = arith.constant 0 : index
    %34 = vector.load %arg6[%c0_16, %c0_17] : memref<1x64xf32, #tpu.memory_space<vmem>>, vector<1x64xf32>
    %35 = vector.broadcast %34 : vector<1x64xf32> to vector<32x64xf32>
    %36 = arith.mulf %33, %35 : vector<32x64xf32>
    %c0_18 = arith.constant 0 : index
    %c0_19 = arith.constant 0 : index
    %37 = vector.load %arg7[%c0_18, %c0_19] : memref<1x64xf32, #tpu.memory_space<vmem>>, vector<1x64xf32>
    %38 = vector.broadcast %37 : vector<1x64xf32> to vector<32x64xf32>
    %39 = arith.addf %36, %38 : vector<32x64xf32>
    %40 = arith.truncf %39 : vector<32x64xf32> to vector<32x64xbf16>
    %c0_20 = arith.constant 0 : index
    %c0_21 = arith.constant 0 : index
    %41 = vector.load %arg8[%c0_20, %c0_21] : memref<32x64xbf16, #tpu.memory_space<vmem>>, vector<32x64xbf16>
    tpu.vector_store %arg8[%c0_20, %c0_21], %40 {strides = array<i32>} : memref<32x64xbf16, #tpu.memory_space<vmem>>, vector<32x64xbf16>,
    return
  }
  func.func @transform_0(%arg0: i32) -> (i32, i32) {
    %c0_i32 = arith.constant 0 : i32
    %c0_i32_0 = arith.constant 0 : i32
    return %arg0, %c0_i32 : i32, i32
  }
  func.func @transform_1(%arg0: i32) -> (i32, i32) {
    %c0_i32 = arith.constant 0 : i32
    %c0_i32_0 = arith.constant 0 : i32
    %c0_i32_1 = arith.constant 0 : i32
    return %c0_i32, %c0_i32_0 : i32, i32
  }
  func.func @transform_2(%arg0: i32) -> (i32, i32) {
    %c0_i32 = arith.constant 0 : i32
    %c0_i32_0 = arith.constant 0 : i32
    %c0_i32_1 = arith.constant 0 : i32
    return %c0_i32, %c0_i32_0 : i32, i32
  }
  func.func @transform_3(%arg0: i32) -> (i32, i32) {
    %c0_i32 = arith.constant 0 : i32
    %c0_i32_0 = arith.constant 0 : i32
    %c0_i32_1 = arith.constant 0 : i32
    return %c0_i32, %c0_i32_0 : i32, i32
  }
  func.func @transform_4(%arg0: i32) -> (i32, i32) {
    %c0_i32 = arith.constant 0 : i32
    %c0_i32_0 = arith.constant 0 : i32
    %c0_i32_1 = arith.constant 0 : i32
    return %c0_i32, %c0_i32_0 : i32, i32
  }
  func.func @transform_5(%arg0: i32) -> (i32, i32) {
    %c0_i32 = arith.constant 0 : i32
    %c0_i32_0 = arith.constant 0 : i32
    %c0_i32_1 = arith.constant 0 : i32
    return %c0_i32, %c0_i32_0 : i32, i32
  }
  func.func @transform_6(%arg0: i32) -> (i32, i32) {
    %c0_i32 = arith.constant 0 : i32
    %c0_i32_0 = arith.constant 0 : i32
    %c0_i32_1 = arith.constant 0 : i32
    return %c0_i32, %c0_i32_0 : i32, i32
  }
  func.func @transform_7(%arg0: i32) -> (i32, i32) {
    %c0_i32 = arith.constant 0 : i32
    %c0_i32_0 = arith.constant 0 : i32
    return %arg0, %c0_i32 : i32, i32
  }
}

module attributes {stable_mosaic.version = 11 : i64} {
  func.func @_matmul_kernel(%arg0: i32, %arg1: i32, %arg2: i32, %arg3: memref<32x64xbf16, #tpu.memory_space<vmem>>, %arg4: memref<64x128xbf16, #tpu.memory_space<vmem>>, %arg5: memref<1x128xf32, #tpu.memory_space<vmem>>, %arg6: memref<32x128xbf16, #tpu.memory_space<vmem>>, %arg7: memref<32x128xf32, #tpu.memory_space<vmem>>) attributes {dimension_semantics = [#tpu.dimension_semantics<parallel>, #tpu.dimension_semantics<parallel>, #tpu.dimension_semantics<arbitrary>], iteration_bounds = array<i64: 1, 1, 1>, scalar_prefetch = 0 : i64, scratch_operands = 1 : i64, tpu.core_type = #tpu.core_type<tc>, window_params = [{transform_indices = @transform_0, window_bounds = array<i64: 32, 64>}, {transform_indices = @transform_1, window_bounds = array<i64: 64, 128>}, {transform_indices = @transform_2, window_bounds = array<i64: 1, 128>}, {transform_indices = @transform_3, window_bounds = array<i64: 32, 128>}]} {
    %c0_i32 = arith.constant 0 : i32
    %0 = arith.cmpi eq, %arg2, %c0_i32 : i32
    %1 = arith.extui %0 : i1 to i32
    %c0_i32_0 = arith.constant 0 : i32
    %2 = arith.cmpi ne, %1, %c0_i32_0 : i32
    scf.if %2 {
      %cst_10 = arith.constant 0.000000e+00 : f32
      %12 = vector.broadcast %cst_10 : f32 to vector<32x128xf32>
      %c0_11 = arith.constant 0 : index
      %c0_12 = arith.constant 0 : index
      %13 = vector.load %arg7[%c0_11, %c0_12] : memref<32x128xf32, #tpu.memory_space<vmem>>, vector<32x128xf32>
      tpu.vector_store %arg7[%c0_11, %c0_12], %12 {strides = array<i32>} : memref<32x128xf32, #tpu.memory_space<vmem>>, vector<32x128xf32>,
    } else {
    }
    %c0 = arith.constant 0 : index
    %c0_1 = arith.constant 0 : index
    %3 = vector.load %arg7[%c0, %c0_1] : memref<32x128xf32, #tpu.memory_space<vmem>>, vector<32x128xf32>
    %c0_2 = arith.constant 0 : index
    %c0_3 = arith.constant 0 : index
    %4 = vector.load %arg3[%c0_2, %c0_3] : memref<32x64xbf16, #tpu.memory_space<vmem>>, vector<32x64xbf16>
    %c0_4 = arith.constant 0 : index
    %c0_5 = arith.constant 0 : index
    %5 = vector.load %arg4[%c0_4, %c0_5] : memref<64x128xbf16, #tpu.memory_space<vmem>>, vector<64x128xbf16>
    %cst = arith.constant dense<0.000000e+00> : vector<32x128xf32>
    %6 = tpu.matmul %4, %5, %cst {dimension_numbers = #tpu.dot_dimension_numbers<[1], [0], [0], [1], [0, 0, 1, 1], [], []>} : vector<32x64xbf16>, vector<64x128xbf16>, vector<32x128xf32> -> vector<32x128xf32>
    %7 = arith.addf %3, %6 : vector<32x128xf32>
    %c0_6 = arith.constant 0 : index
    %c0_7 = arith.constant 0 : index
    %8 = vector.load %arg7[%c0_6, %c0_7] : memref<32x128xf32, #tpu.memory_space<vmem>>, vector<32x128xf32>
    tpu.vector_store %arg7[%c0_6, %c0_7], %7 {strides = array<i32>} : memref<32x128xf32, #tpu.memory_space<vmem>>, vector<32x128xf32>,
    %c0_i32_8 = arith.constant 0 : i32
    %9 = arith.cmpi eq, %arg2, %c0_i32_8 : i32
    %10 = arith.extui %9 : i1 to i32
    %c0_i32_9 = arith.constant 0 : i32
    %11 = arith.cmpi ne, %10, %c0_i32_9 : i32
    scf.if %11 {
      %c0_10 = arith.constant 0 : index
      %c0_11 = arith.constant 0 : index
      %12 = vector.load %arg7[%c0_10, %c0_11] : memref<32x128xf32, #tpu.memory_space<vmem>>, vector<32x128xf32>
      %c0_12 = arith.constant 0 : index
      %c0_13 = arith.constant 0 : index
      %13 = vector.load %arg5[%c0_12, %c0_13] : memref<1x128xf32, #tpu.memory_space<vmem>>, vector<1x128xf32>
      %14 = vector.broadcast %13 : vector<1x128xf32> to vector<32x128xf32>
      %15 = arith.addf %12, %14 : vector<32x128xf32>
      %16 = arith.truncf %15 : vector<32x128xf32> to vector<32x128xbf16>
      %c0_14 = arith.constant 0 : index
      %c0_15 = arith.constant 0 : index
      %17 = vector.load %arg6[%c0_14, %c0_15] : memref<32x128xbf16, #tpu.memory_space<vmem>>, vector<32x128xbf16>
      tpu.vector_store %arg6[%c0_14, %c0_15], %16 {strides = array<i32>} : memref<32x128xbf16, #tpu.memory_space<vmem>>, vector<32x128xbf16>,
    } else {
    }
    return
  }
  func.func @transform_0(%arg0: i32, %arg1: i32, %arg2: i32) -> (i32, i32) {
    %c0_i32 = arith.constant 0 : i32
    return %arg0, %arg2 : i32, i32
  }
  func.func @transform_1(%arg0: i32, %arg1: i32, %arg2: i32) -> (i32, i32) {
    %c0_i32 = arith.constant 0 : i32
    return %arg2, %arg1 : i32, i32
  }
  func.func @transform_2(%arg0: i32, %arg1: i32, %arg2: i32) -> (i32, i32) {
    %c0_i32 = arith.constant 0 : i32
    %c0_i32_0 = arith.constant 0 : i32
    return %c0_i32, %arg1 : i32, i32
  }
  func.func @transform_3(%arg0: i32, %arg1: i32, %arg2: i32) -> (i32, i32) {
    %c0_i32 = arith.constant 0 : i32
    return %arg0, %arg1 : i32, i32
  }
}

module attributes {stable_mosaic.version = 11 : i64} {
  func.func @_matmul_kernel(%arg0: i32, %arg1: i32, %arg2: i32, %arg3: memref<16x16xbf16, #tpu.memory_space<vmem>>, %arg4: memref<16x64xbf16, #tpu.memory_space<vmem>>, %arg5: memref<1x64xf32, #tpu.memory_space<vmem>>, %arg6: memref<16x64xbf16, #tpu.memory_space<vmem>>, %arg7: memref<16x64xf32, #tpu.memory_space<vmem>>) attributes {dimension_semantics = [#tpu.dimension_semantics<parallel>, #tpu.dimension_semantics<parallel>, #tpu.dimension_semantics<arbitrary>], iteration_bounds = array<i64: 1, 1, 1>, scalar_prefetch = 0 : i64, scratch_operands = 1 : i64, tpu.core_type = #tpu.core_type<tc>, window_params = [{transform_indices = @transform_0, window_bounds = array<i64: 16, 16>}, {transform_indices = @transform_1, window_bounds = array<i64: 16, 64>}, {transform_indices = @transform_2, window_bounds = array<i64: 1, 64>}, {transform_indices = @transform_3, window_bounds = array<i64: 16, 64>}]} {
    %c0_i32 = arith.constant 0 : i32
    %0 = arith.cmpi eq, %arg2, %c0_i32 : i32
    %1 = arith.extui %0 : i1 to i32
    %c0_i32_0 = arith.constant 0 : i32
    %2 = arith.cmpi ne, %1, %c0_i32_0 : i32
    scf.if %2 {
      %cst_10 = arith.constant 0.000000e+00 : f32
      %12 = vector.broadcast %cst_10 : f32 to vector<16x64xf32>
      %c0_11 = arith.constant 0 : index
      %c0_12 = arith.constant 0 : index
      %13 = vector.load %arg7[%c0_11, %c0_12] : memref<16x64xf32, #tpu.memory_space<vmem>>, vector<16x64xf32>
      tpu.vector_store %arg7[%c0_11, %c0_12], %12 {strides = array<i32>} : memref<16x64xf32, #tpu.memory_space<vmem>>, vector<16x64xf32>,
    } else {
    }
    %c0 = arith.constant 0 : index
    %c0_1 = arith.constant 0 : index
    %3 = vector.load %arg7[%c0, %c0_1] : memref<16x64xf32, #tpu.memory_space<vmem>>, vector<16x64xf32>
    %c0_2 = arith.constant 0 : index
    %c0_3 = arith.constant 0 : index
    %4 = vector.load %arg3[%c0_2, %c0_3] : memref<16x16xbf16, #tpu.memory_space<vmem>>, vector<16x16xbf16>
    %c0_4 = arith.constant 0 : index
    %c0_5 = arith.constant 0 : index
    %5 = vector.load %arg4[%c0_4, %c0_5] : memref<16x64xbf16, #tpu.memory_space<vmem>>, vector<16x64xbf16>
    %cst = arith.constant dense<0.000000e+00> : vector<16x64xf32>
    %6 = tpu.matmul %4, %5, %cst {dimension_numbers = #tpu.dot_dimension_numbers<[1], [0], [0], [1], [0, 0, 1, 1], [], []>} : vector<16x16xbf16>, vector<16x64xbf16>, vector<16x64xf32> -> vector<16x64xf32>
    %7 = arith.addf %3, %6 : vector<16x64xf32>
    %c0_6 = arith.constant 0 : index
    %c0_7 = arith.constant 0 : index
    %8 = vector.load %arg7[%c0_6, %c0_7] : memref<16x64xf32, #tpu.memory_space<vmem>>, vector<16x64xf32>
    tpu.vector_store %arg7[%c0_6, %c0_7], %7 {strides = array<i32>} : memref<16x64xf32, #tpu.memory_space<vmem>>, vector<16x64xf32>,
    %c0_i32_8 = arith.constant 0 : i32
    %9 = arith.cmpi eq, %arg2, %c0_i32_8 : i32
    %10 = arith.extui %9 : i1 to i32
    %c0_i32_9 = arith.constant 0 : i32
    %11 = arith.cmpi ne, %10, %c0_i32_9 : i32
    scf.if %11 {
      %c0_10 = arith.constant 0 : index
      %c0_11 = arith.constant 0 : index
      %12 = vector.load %arg7[%c0_10, %c0_11] : memref<16x64xf32, #tpu.memory_space<vmem>>, vector<16x64xf32>
      %c0_12 = arith.constant 0 : index
      %c0_13 = arith.constant 0 : index
      %13 = vector.load %arg5[%c0_12, %c0_13] : memref<1x64xf32, #tpu.memory_space<vmem>>, vector<1x64xf32>
      %14 = vector.broadcast %13 : vector<1x64xf32> to vector<16x64xf32>
      %15 = arith.addf %12, %14 : vector<16x64xf32>
      %16 = arith.truncf %15 : vector<16x64xf32> to vector<16x64xbf16>
      %c0_14 = arith.constant 0 : index
      %c0_15 = arith.constant 0 : index
      %17 = vector.load %arg6[%c0_14, %c0_15] : memref<16x64xbf16, #tpu.memory_space<vmem>>, vector<16x64xbf16>
      tpu.vector_store %arg6[%c0_14, %c0_15], %16 {strides = array<i32>} : memref<16x64xbf16, #tpu.memory_space<vmem>>, vector<16x64xbf16>,
    } else {
    }
    return
  }
  func.func @transform_0(%arg0: i32, %arg1: i32, %arg2: i32) -> (i32, i32) {
    %c0_i32 = arith.constant 0 : i32
    return %arg0, %arg2 : i32, i32
  }
  func.func @transform_1(%arg0: i32, %arg1: i32, %arg2: i32) -> (i32, i32) {
    %c0_i32 = arith.constant 0 : i32
    return %arg2, %arg1 : i32, i32
  }
  func.func @transform_2(%arg0: i32, %arg1: i32, %arg2: i32) -> (i32, i32) {
    %c0_i32 = arith.constant 0 : i32
    %c0_i32_0 = arith.constant 0 : i32
    return %c0_i32, %arg1 : i32, i32
  }
  func.func @transform_3(%arg0: i32, %arg1: i32, %arg2: i32) -> (i32, i32) {
    %c0_i32 = arith.constant 0 : i32
    return %arg0, %arg1 : i32, i32
  }
}

module attributes {stable_mosaic.version = 11 : i64} {
  func.func @_matmul_kernel(%arg0: i32, %arg1: i32, %arg2: i32, %arg3: memref<16x64xbf16, #tpu.memory_space<vmem>>, %arg4: memref<64x192xbf16, #tpu.memory_space<vmem>>, %arg5: memref<1x192xf32, #tpu.memory_space<vmem>>, %arg6: memref<16x192xbf16, #tpu.memory_space<vmem>>, %arg7: memref<16x192xf32, #tpu.memory_space<vmem>>) attributes {dimension_semantics = [#tpu.dimension_semantics<parallel>, #tpu.dimension_semantics<parallel>, #tpu.dimension_semantics<arbitrary>], iteration_bounds = array<i64: 1, 1, 1>, scalar_prefetch = 0 : i64, scratch_operands = 1 : i64, tpu.core_type = #tpu.core_type<tc>, window_params = [{transform_indices = @transform_0, window_bounds = array<i64: 16, 64>}, {transform_indices = @transform_1, window_bounds = array<i64: 64, 192>}, {transform_indices = @transform_2, window_bounds = array<i64: 1, 192>}, {transform_indices = @transform_3, window_bounds = array<i64: 16, 192>}]} {
    %c0_i32 = arith.constant 0 : i32
    %0 = arith.cmpi eq, %arg2, %c0_i32 : i32
    %1 = arith.extui %0 : i1 to i32
    %c0_i32_0 = arith.constant 0 : i32
    %2 = arith.cmpi ne, %1, %c0_i32_0 : i32
    scf.if %2 {
      %cst_10 = arith.constant 0.000000e+00 : f32
      %12 = vector.broadcast %cst_10 : f32 to vector<16x192xf32>
      %c0_11 = arith.constant 0 : index
      %c0_12 = arith.constant 0 : index
      %13 = vector.load %arg7[%c0_11, %c0_12] : memref<16x192xf32, #tpu.memory_space<vmem>>, vector<16x192xf32>
      tpu.vector_store %arg7[%c0_11, %c0_12], %12 {strides = array<i32>} : memref<16x192xf32, #tpu.memory_space<vmem>>, vector<16x192xf32>,
    } else {
    }
    %c0 = arith.constant 0 : index
    %c0_1 = arith.constant 0 : index
    %3 = vector.load %arg7[%c0, %c0_1] : memref<16x192xf32, #tpu.memory_space<vmem>>, vector<16x192xf32>
    %c0_2 = arith.constant 0 : index
    %c0_3 = arith.constant 0 : index
    %4 = vector.load %arg3[%c0_2, %c0_3] : memref<16x64xbf16, #tpu.memory_space<vmem>>, vector<16x64xbf16>
    %c0_4 = arith.constant 0 : index
    %c0_5 = arith.constant 0 : index
    %5 = vector.load %arg4[%c0_4, %c0_5] : memref<64x192xbf16, #tpu.memory_space<vmem>>, vector<64x192xbf16>
    %cst = arith.constant dense<0.000000e+00> : vector<16x192xf32>
    %6 = tpu.matmul %4, %5, %cst {dimension_numbers = #tpu.dot_dimension_numbers<[1], [0], [0], [1], [0, 0, 1, 1], [], []>} : vector<16x64xbf16>, vector<64x192xbf16>, vector<16x192xf32> -> vector<16x192xf32>
    %7 = arith.addf %3, %6 : vector<16x192xf32>
    %c0_6 = arith.constant 0 : index
    %c0_7 = arith.constant 0 : index
    %8 = vector.load %arg7[%c0_6, %c0_7] : memref<16x192xf32, #tpu.memory_space<vmem>>, vector<16x192xf32>
    tpu.vector_store %arg7[%c0_6, %c0_7], %7 {strides = array<i32>} : memref<16x192xf32, #tpu.memory_space<vmem>>, vector<16x192xf32>,
    %c0_i32_8 = arith.constant 0 : i32
    %9 = arith.cmpi eq, %arg2, %c0_i32_8 : i32
    %10 = arith.extui %9 : i1 to i32
    %c0_i32_9 = arith.constant 0 : i32
    %11 = arith.cmpi ne, %10, %c0_i32_9 : i32
    scf.if %11 {
      %c0_10 = arith.constant 0 : index
      %c0_11 = arith.constant 0 : index
      %12 = vector.load %arg7[%c0_10, %c0_11] : memref<16x192xf32, #tpu.memory_space<vmem>>, vector<16x192xf32>
      %c0_12 = arith.constant 0 : index
      %c0_13 = arith.constant 0 : index
      %13 = vector.load %arg5[%c0_12, %c0_13] : memref<1x192xf32, #tpu.memory_space<vmem>>, vector<1x192xf32>
      %14 = vector.broadcast %13 : vector<1x192xf32> to vector<16x192xf32>
      %15 = arith.addf %12, %14 : vector<16x192xf32>
      %16 = arith.truncf %15 : vector<16x192xf32> to vector<16x192xbf16>
      %c0_14 = arith.constant 0 : index
      %c0_15 = arith.constant 0 : index
      %17 = vector.load %arg6[%c0_14, %c0_15] : memref<16x192xbf16, #tpu.memory_space<vmem>>, vector<16x192xbf16>
      tpu.vector_store %arg6[%c0_14, %c0_15], %16 {strides = array<i32>} : memref<16x192xbf16, #tpu.memory_space<vmem>>, vector<16x192xbf16>,
    } else {
    }
    return
  }
  func.func @transform_0(%arg0: i32, %arg1: i32, %arg2: i32) -> (i32, i32) {
    %c0_i32 = arith.constant 0 : i32
    return %arg0, %arg2 : i32, i32
  }
  func.func @transform_1(%arg0: i32, %arg1: i32, %arg2: i32) -> (i32, i32) {
    %c0_i32 = arith.constant 0 : i32
    return %arg2, %arg1 : i32, i32
  }
  func.func @transform_2(%arg0: i32, %arg1: i32, %arg2: i32) -> (i32, i32) {
    %c0_i32 = arith.constant 0 : i32
    %c0_i32_0 = arith.constant 0 : i32
    return %c0_i32, %arg1 : i32, i32
  }
  func.func @transform_3(%arg0: i32, %arg1: i32, %arg2: i32) -> (i32, i32) {
    %c0_i32 = arith.constant 0 : i32
    return %arg0, %arg1 : i32, i32
  }
}

module attributes {stable_mosaic.version = 11 : i64} {
  func.func @_attention_kernel(%arg0: i32, %arg1: i32, %arg2: memref<1x1x8x16xbf16, #tpu.memory_space<vmem>>, %arg3: memref<1x1x8x16xbf16, #tpu.memory_space<vmem>>, %arg4: memref<1x1x8x16xbf16, #tpu.memory_space<vmem>>, %arg5: memref<1x1x8x16xbf16, #tpu.memory_space<vmem>>) attributes {dimension_semantics = [#tpu.dimension_semantics<parallel>, #tpu.dimension_semantics<parallel>], iteration_bounds = array<i64: 2, 4>, scalar_prefetch = 0 : i64, scratch_operands = 0 : i64, tpu.core_type = #tpu.core_type<tc>, window_params = [{transform_indices = @transform_0, window_bounds = array<i64: 1, 1, 8, 16>}, {transform_indices = @transform_1, window_bounds = array<i64: 1, 1, 8, 16>}, {transform_indices = @transform_2, window_bounds = array<i64: 1, 1, 8, 16>}, {transform_indices = @transform_3, window_bounds = array<i64: 1, 1, 8, 16>}]} {
    %c0 = arith.constant 0 : index
    %c0_0 = arith.constant 0 : index
    %c0_1 = arith.constant 0 : index
    %c0_2 = arith.constant 0 : index
    %0 = vector.load %arg2[%c0, %c0_0, %c0_1, %c0_2] : memref<1x1x8x16xbf16, #tpu.memory_space<vmem>>, vector<1x1x8x16xbf16>
    %1 = vector.shape_cast %0 : vector<1x1x8x16xbf16> to vector<8x16xbf16>
    %c0_3 = arith.constant 0 : index
    %c0_4 = arith.constant 0 : index
    %c0_5 = arith.constant 0 : index
    %c0_6 = arith.constant 0 : index
    %2 = vector.load %arg3[%c0_3, %c0_4, %c0_5, %c0_6] : memref<1x1x8x16xbf16, #tpu.memory_space<vmem>>, vector<1x1x8x16xbf16>
    %3 = vector.shape_cast %2 : vector<1x1x8x16xbf16> to vector<8x16xbf16>
    %c0_7 = arith.constant 0 : index
    %c0_8 = arith.constant 0 : index
    %c0_9 = arith.constant 0 : index
    %c0_10 = arith.constant 0 : index
    %4 = vector.load %arg4[%c0_7, %c0_8, %c0_9, %c0_10] : memref<1x1x8x16xbf16, #tpu.memory_space<vmem>>, vector<1x1x8x16xbf16>
    %5 = vector.shape_cast %4 : vector<1x1x8x16xbf16> to vector<8x16xbf16>
    %cst = arith.constant dense<0.000000e+00> : vector<8x8xf32>
    %6 = tpu.matmul %1, %3, %cst {dimension_numbers = #tpu.dot_dimension_numbers<[1], [1], [0], [0], [0, 0, 1, 0], [], []>} : vector<8x16xbf16>, vector<8x16xbf16>, vector<8x8xf32> -> vector<8x8xf32>
    %cst_11 = arith.constant dense<0xFF800000> : vector<8xf32>
    %7 = vector.multi_reduction <maximumf>, %6, %cst_11 [1] : vector<8x8xf32> to vector<8xf32>
    %8 = vector.shape_cast %7 : vector<8xf32> to vector<8x1xf32>
    %9 = vector.broadcast %8 : vector<8x1xf32> to vector<8x8xf32>
    %10 = arith.subf %6, %9 : vector<8x8xf32>
    %11 = math.exp %10 : vector<8x8xf32>
    %cst_12 = arith.constant dense<0.000000e+00> : vector<8xf32>
    %12 = vector.multi_reduction <add>, %11, %cst_12 [1] : vector<8x8xf32> to vector<8xf32>
    %13 = vector.shape_cast %12 : vector<8xf32> to vector<8x1xf32>
    %14 = tpu.reciprocal %13 {approx = true} : vector<8x1xf32> -> vector<8x1xf32>
    %15 = vector.broadcast %14 : vector<8x1xf32> to vector<8x8xf32>
    %16 = arith.mulf %11, %15 : vector<8x8xf32>
    %17 = arith.truncf %16 : vector<8x8xf32> to vector<8x8xbf16>
    %cst_13 = arith.constant dense<0.000000e+00> : vector<8x16xf32>
    %18 = tpu.matmul %17, %5, %cst_13 {dimension_numbers = #tpu.dot_dimension_numbers<[1], [0], [0], [1], [0, 0, 1, 1], [], []>} : vector<8x8xbf16>, vector<8x16xbf16>, vector<8x16xf32> -> vector<8x16xf32>
    %19 = arith.truncf %18 : vector<8x16xf32> to vector<8x16xbf16>
    %c0_14 = arith.constant 0 : index
    %c0_15 = arith.constant 0 : index
    %c0_16 = arith.constant 0 : index
    %c0_17 = arith.constant 0 : index
    %20 = vector.load %arg5[%c0_14, %c0_15, %c0_16, %c0_17] : memref<1x1x8x16xbf16, #tpu.memory_space<vmem>>, vector<1x1x8x16xbf16>
    %21 = vector.shape_cast %20 : vector<1x1x8x16xbf16> to vector<8x16xbf16>
    %22 = vector.shape_cast %19 : vector<8x16xbf16> to vector<1x1x8x16xbf16>
    tpu.vector_store %arg5[%c0_14, %c0_15, %c0_16, %c0_17], %22 {strides = array<i32>} : memref<1x1x8x16xbf16, #tpu.memory_space<vmem>>, vector<1x1x8x16xbf16>,
    return
  }
  func.func @transform_0(%arg0: i32, %arg1: i32) -> (i32, i32, i32, i32) {
    %c0_i32 = arith.constant 0 : i32
    %c0_i32_0 = arith.constant 0 : i32
    %c0_i32_1 = arith.constant 0 : i32
    return %arg0, %arg1, %c0_i32, %c0_i32_0 : i32, i32, i32, i32
  }
  func.func @transform_1(%arg0: i32, %arg1: i32) -> (i32, i32, i32, i32) {
    %c0_i32 = arith.constant 0 : i32
    %c0_i32_0 = arith.constant 0 : i32
    %c0_i32_1 = arith.constant 0 : i32
    return %arg0, %arg1, %c0_i32, %c0_i32_0 : i32, i32, i32, i32
  }
  func.func @transform_2(%arg0: i32, %arg1: i32) -> (i32, i32, i32, i32) {
    %c0_i32 = arith.constant 0 : i32
    %c0_i32_0 = arith.constant 0 : i32
    %c0_i32_1 = arith.constant 0 : i32
    return %arg0, %arg1, %c0_i32, %c0_i32_0 : i32, i32, i32, i32
  }
  func.func @transform_3(%arg0: i32, %arg1: i32) -> (i32, i32, i32, i32) {
    %c0_i32 = arith.constant 0 : i32
    %c0_i32_0 = arith.constant 0 : i32
    %c0_i32_1 = arith.constant 0 : i32
    return %arg0, %arg1, %c0_i32, %c0_i32_0 : i32, i32, i32, i32
  }
}

module attributes {stable_mosaic.version = 11 : i64} {
  func.func @_matmul_add_ln_kernel(%arg0: i32, %arg1: i32, %arg2: memref<16x64xbf16, #tpu.memory_space<vmem>>, %arg3: memref<64x64xbf16, #tpu.memory_space<vmem>>, %arg4: memref<1x64xf32, #tpu.memory_space<vmem>>, %arg5: memref<16x64xbf16, #tpu.memory_space<vmem>>, %arg6: memref<1x64xf32, #tpu.memory_space<vmem>>, %arg7: memref<1x64xf32, #tpu.memory_space<vmem>>, %arg8: memref<16x64xbf16, #tpu.memory_space<vmem>>, %arg9: memref<16x64xf32, #tpu.memory_space<vmem>>) attributes {dimension_semantics = [#tpu.dimension_semantics<parallel>, #tpu.dimension_semantics<arbitrary>], iteration_bounds = array<i64: 1, 1>, scalar_prefetch = 0 : i64, scratch_operands = 1 : i64, tpu.core_type = #tpu.core_type<tc>, window_params = [{transform_indices = @transform_0, window_bounds = array<i64: 16, 64>}, {transform_indices = @transform_1, window_bounds = array<i64: 64, 64>}, {pipeline_mode = #tpu.pipeline_mode<synchronous>, transform_indices = @transform_2, window_bounds = array<i64: 1, 64>}, {transform_indices = @transform_3, window_bounds = array<i64: 16, 64>}, {pipeline_mode = #tpu.pipeline_mode<synchronous>, transform_indices = @transform_4, window_bounds = array<i64: 1, 64>}, {pipeline_mode = #tpu.pipeline_mode<synchronous>, transform_indices = @transform_5, window_bounds = array<i64: 1, 64>}, {transform_indices = @transform_6, window_bounds = array<i64: 16, 64>}]} {
    %c0_i32 = arith.constant 0 : i32
    %0 = arith.cmpi eq, %arg1, %c0_i32 : i32
    %1 = arith.extui %0 : i1 to i32
    %c0_i32_0 = arith.constant 0 : i32
    %2 = arith.cmpi ne, %1, %c0_i32_0 : i32
    scf.if %2 {
      %cst_10 = arith.constant 0.000000e+00 : f32
      %12 = vector.broadcast %cst_10 : f32 to vector<16x64xf32>
      %c0_11 = arith.constant 0 : index
      %c0_12 = arith.constant 0 : index
      %13 = vector.load %arg9[%c0_11, %c0_12] : memref<16x64xf32, #tpu.memory_space<vmem>>, vector<16x64xf32>
      tpu.vector_store %arg9[%c0_11, %c0_12], %12 {strides = array<i32>} : memref<16x64xf32, #tpu.memory_space<vmem>>, vector<16x64xf32>,
    } else {
    }
    %c0 = arith.constant 0 : index
    %c0_1 = arith.constant 0 : index
    %3 = vector.load %arg9[%c0, %c0_1] : memref<16x64xf32, #tpu.memory_space<vmem>>, vector<16x64xf32>
    %c0_2 = arith.constant 0 : index
    %c0_3 = arith.constant 0 : index
    %4 = vector.load %arg2[%c0_2, %c0_3] : memref<16x64xbf16, #tpu.memory_space<vmem>>, vector<16x64xbf16>
    %c0_4 = arith.constant 0 : index
    %c0_5 = arith.constant 0 : index
    %5 = vector.load %arg3[%c0_4, %c0_5] : memref<64x64xbf16, #tpu.memory_space<vmem>>, vector<64x64xbf16>
    %cst = arith.constant dense<0.000000e+00> : vector<16x64xf32>
    %6 = tpu.matmul %4, %5, %cst {dimension_numbers = #tpu.dot_dimension_numbers<[1], [0], [0], [1], [0, 0, 1, 1], [], []>} : vector<16x64xbf16>, vector<64x64xbf16>, vector<16x64xf32> -> vector<16x64xf32>
    %7 = arith.addf %3, %6 : vector<16x64xf32>
    %c0_6 = arith.constant 0 : index
    %c0_7 = arith.constant 0 : index
    %8 = vector.load %arg9[%c0_6, %c0_7] : memref<16x64xf32, #tpu.memory_space<vmem>>, vector<16x64xf32>
    tpu.vector_store %arg9[%c0_6, %c0_7], %7 {strides = array<i32>} : memref<16x64xf32, #tpu.memory_space<vmem>>, vector<16x64xf32>,
    %c0_i32_8 = arith.constant 0 : i32
    %9 = arith.cmpi eq, %arg1, %c0_i32_8 : i32
    %10 = arith.extui %9 : i1 to i32
    %c0_i32_9 = arith.constant 0 : i32
    %11 = arith.cmpi ne, %10, %c0_i32_9 : i32
    scf.if %11 {
      %c0_10 = arith.constant 0 : index
      %c0_11 = arith.constant 0 : index
      %12 = vector.load %arg9[%c0_10, %c0_11] : memref<16x64xf32, #tpu.memory_space<vmem>>, vector<16x64xf32>
      %c0_12 = arith.constant 0 : index
      %c0_13 = arith.constant 0 : index
      %13 = vector.load %arg4[%c0_12, %c0_13] : memref<1x64xf32, #tpu.memory_space<vmem>>, vector<1x64xf32>
      %14 = vector.broadcast %13 : vector<1x64xf32> to vector<16x64xf32>
      %15 = arith.addf %12, %14 : vector<16x64xf32>
      %c0_14 = arith.constant 0 : index
      %c0_15 = arith.constant 0 : index
      %16 = vector.load %arg5[%c0_14, %c0_15] : memref<16x64xbf16, #tpu.memory_space<vmem>>, vector<16x64xbf16>
      %17 = arith.extf %16 : vector<16x64xbf16> to vector<16x64xf32>
      %18 = arith.addf %15, %17 : vector<16x64xf32>
      %cst_16 = arith.constant dense<0.000000e+00> : vector<16xf32>
      %19 = vector.multi_reduction <add>, %18, %cst_16 [1] : vector<16x64xf32> to vector<16xf32>
      %20 = vector.shape_cast %19 : vector<16xf32> to vector<16x1xf32>
      %cst_17 = arith.constant 6.400000e+01 : f32
      %21 = vector.broadcast %cst_17 : f32 to vector<16x1xf32>
      %22 = arith.divf %20, %21 : vector<16x1xf32>
      %23 = vector.broadcast %22 : vector<16x1xf32> to vector<16x64xf32>
      %24 = arith.subf %18, %23 : vector<16x64xf32>
      %25 = arith.mulf %24, %24 : vector<16x64xf32>
      %cst_18 = arith.constant dense<0.000000e+00> : vector<16xf32>
      %26 = vector.multi_reduction <add>, %25, %cst_18 [1] : vector<16x64xf32> to vector<16xf32>
      %27 = vector.shape_cast %26 : vector<16xf32> to vector<16x1xf32>
      %cst_19 = arith.constant 6.400000e+01 : f32
      %28 = vector.broadcast %cst_19 : f32 to vector<16x1xf32>
      %29 = arith.divf %27, %28 : vector<16x1xf32>
      %30 = vector.broadcast %22 : vector<16x1xf32> to vector<16x64xf32>
      %31 = arith.subf %18, %30 : vector<16x64xf32>
      %cst_20 = arith.constant 9.99999974E-6 : f32
      %32 = vector.broadcast %cst_20 : f32 to vector<16x1xf32>
      %33 = arith.addf %29, %32 : vector<16x1xf32>
      %34 = math.rsqrt %33 : vector<16x1xf32>
      %35 = vector.broadcast %34 : vector<16x1xf32> to vector<16x64xf32>
      %36 = arith.mulf %31, %35 : vector<16x64xf32>
      %c0_21 = arith.constant 0 : index
      %c0_22 = arith.constant 0 : index
      %37 = vector.load %arg6[%c0_21, %c0_22] : memref<1x64xf32, #tpu.memory_space<vmem>>, vector<1x64xf32>
      %38 = vector.broadcast %37 : vector<1x64xf32> to vector<16x64xf32>
      %39 = arith.mulf %36, %38 : vector<16x64xf32>
      %c0_23 = arith.constant 0 : index
      %c0_24 = arith.constant 0 : index
      %40 = vector.load %arg7[%c0_23, %c0_24] : memref<1x64xf32, #tpu.memory_space<vmem>>, vector<1x64xf32>
      %41 = vector.broadcast %40 : vector<1x64xf32> to vector<16x64xf32>
      %42 = arith.addf %39, %41 : vector<16x64xf32>
      %43 = arith.truncf %42 : vector<16x64xf32> to vector<16x64xbf16>
      %c0_25 = arith.constant 0 : index
      %c0_26 = arith.constant 0 : index
      %44 = vector.load %arg8[%c0_25, %c0_26] : memref<16x64xbf16, #tpu.memory_space<vmem>>, vector<16x64xbf16>
      tpu.vector_store %arg8[%c0_25, %c0_26], %43 {strides = array<i32>} : memref<16x64xbf16, #tpu.memory_space<vmem>>, vector<16x64xbf16>,
    } else {
    }
    return
  }
  func.func @transform_0(%arg0: i32, %arg1: i32) -> (i32, i32) {
    %c0_i32 = arith.constant 0 : i32
    return %arg0, %arg1 : i32, i32
  }
  func.func @transform_1(%arg0: i32, %arg1: i32) -> (i32, i32) {
    %c0_i32 = arith.constant 0 : i32
    %c0_i32_0 = arith.constant 0 : i32
    return %arg1, %c0_i32 : i32, i32
  }
  func.func @transform_2(%arg0: i32, %arg1: i32) -> (i32, i32) {
    %c0_i32 = arith.constant 0 : i32
    %c0_i32_0 = arith.constant 0 : i32
    %c0_i32_1 = arith.constant 0 : i32
    return %c0_i32, %c0_i32_0 : i32, i32
  }
  func.func @transform_3(%arg0: i32, %arg1: i32) -> (i32, i32) {
    %c0_i32 = arith.constant 0 : i32
    %c0_i32_0 = arith.constant 0 : i32
    return %arg0, %c0_i32 : i32, i32
  }
  func.func @transform_4(%arg0: i32, %arg1: i32) -> (i32, i32) {
    %c0_i32 = arith.constant 0 : i32
    %c0_i32_0 = arith.constant 0 : i32
    %c0_i32_1 = arith.constant 0 : i32
    return %c0_i32, %c0_i32_0 : i32, i32
  }
  func.func @transform_5(%arg0: i32, %arg1: i32) -> (i32, i32) {
    %c0_i32 = arith.constant 0 : i32
    %c0_i32_0 = arith.constant 0 : i32
    %c0_i32_1 = arith.constant 0 : i32
    return %c0_i32, %c0_i32_0 : i32, i32
  }
  func.func @transform_6(%arg0: i32, %arg1: i32) -> (i32, i32) {
    %c0_i32 = arith.constant 0 : i32
    %c0_i32_0 = arith.constant 0 : i32
    return %arg0, %c0_i32 : i32, i32
  }
}

module attributes {stable_mosaic.version = 11 : i64} {
  func.func @_matmul_kernel(%arg0: i32, %arg1: i32, %arg2: i32, %arg3: memref<16x64xbf16, #tpu.memory_space<vmem>>, %arg4: memref<64x64xbf16, #tpu.memory_space<vmem>>, %arg5: memref<1x64xf32, #tpu.memory_space<vmem>>, %arg6: memref<16x64xbf16, #tpu.memory_space<vmem>>, %arg7: memref<16x64xf32, #tpu.memory_space<vmem>>) attributes {dimension_semantics = [#tpu.dimension_semantics<parallel>, #tpu.dimension_semantics<parallel>, #tpu.dimension_semantics<arbitrary>], iteration_bounds = array<i64: 1, 1, 1>, scalar_prefetch = 0 : i64, scratch_operands = 1 : i64, tpu.core_type = #tpu.core_type<tc>, window_params = [{transform_indices = @transform_0, window_bounds = array<i64: 16, 64>}, {transform_indices = @transform_1, window_bounds = array<i64: 64, 64>}, {transform_indices = @transform_2, window_bounds = array<i64: 1, 64>}, {transform_indices = @transform_3, window_bounds = array<i64: 16, 64>}]} {
    %c0_i32 = arith.constant 0 : i32
    %0 = arith.cmpi eq, %arg2, %c0_i32 : i32
    %1 = arith.extui %0 : i1 to i32
    %c0_i32_0 = arith.constant 0 : i32
    %2 = arith.cmpi ne, %1, %c0_i32_0 : i32
    scf.if %2 {
      %cst_10 = arith.constant 0.000000e+00 : f32
      %12 = vector.broadcast %cst_10 : f32 to vector<16x64xf32>
      %c0_11 = arith.constant 0 : index
      %c0_12 = arith.constant 0 : index
      %13 = vector.load %arg7[%c0_11, %c0_12] : memref<16x64xf32, #tpu.memory_space<vmem>>, vector<16x64xf32>
      tpu.vector_store %arg7[%c0_11, %c0_12], %12 {strides = array<i32>} : memref<16x64xf32, #tpu.memory_space<vmem>>, vector<16x64xf32>,
    } else {
    }
    %c0 = arith.constant 0 : index
    %c0_1 = arith.constant 0 : index
    %3 = vector.load %arg7[%c0, %c0_1] : memref<16x64xf32, #tpu.memory_space<vmem>>, vector<16x64xf32>
    %c0_2 = arith.constant 0 : index
    %c0_3 = arith.constant 0 : index
    %4 = vector.load %arg3[%c0_2, %c0_3] : memref<16x64xbf16, #tpu.memory_space<vmem>>, vector<16x64xbf16>
    %c0_4 = arith.constant 0 : index
    %c0_5 = arith.constant 0 : index
    %5 = vector.load %arg4[%c0_4, %c0_5] : memref<64x64xbf16, #tpu.memory_space<vmem>>, vector<64x64xbf16>
    %cst = arith.constant dense<0.000000e+00> : vector<16x64xf32>
    %6 = tpu.matmul %4, %5, %cst {dimension_numbers = #tpu.dot_dimension_numbers<[1], [0], [0], [1], [0, 0, 1, 1], [], []>} : vector<16x64xbf16>, vector<64x64xbf16>, vector<16x64xf32> -> vector<16x64xf32>
    %7 = arith.addf %3, %6 : vector<16x64xf32>
    %c0_6 = arith.constant 0 : index
    %c0_7 = arith.constant 0 : index
    %8 = vector.load %arg7[%c0_6, %c0_7] : memref<16x64xf32, #tpu.memory_space<vmem>>, vector<16x64xf32>
    tpu.vector_store %arg7[%c0_6, %c0_7], %7 {strides = array<i32>} : memref<16x64xf32, #tpu.memory_space<vmem>>, vector<16x64xf32>,
    %c0_i32_8 = arith.constant 0 : i32
    %9 = arith.cmpi eq, %arg2, %c0_i32_8 : i32
    %10 = arith.extui %9 : i1 to i32
    %c0_i32_9 = arith.constant 0 : i32
    %11 = arith.cmpi ne, %10, %c0_i32_9 : i32
    scf.if %11 {
      %c0_10 = arith.constant 0 : index
      %c0_11 = arith.constant 0 : index
      %12 = vector.load %arg7[%c0_10, %c0_11] : memref<16x64xf32, #tpu.memory_space<vmem>>, vector<16x64xf32>
      %c0_12 = arith.constant 0 : index
      %c0_13 = arith.constant 0 : index
      %13 = vector.load %arg5[%c0_12, %c0_13] : memref<1x64xf32, #tpu.memory_space<vmem>>, vector<1x64xf32>
      %14 = vector.broadcast %13 : vector<1x64xf32> to vector<16x64xf32>
      %15 = arith.addf %12, %14 : vector<16x64xf32>
      %16 = arith.truncf %15 : vector<16x64xf32> to vector<16x64xbf16>
      %c0_14 = arith.constant 0 : index
      %c0_15 = arith.constant 0 : index
      %17 = vector.load %arg6[%c0_14, %c0_15] : memref<16x64xbf16, #tpu.memory_space<vmem>>, vector<16x64xbf16>
      tpu.vector_store %arg6[%c0_14, %c0_15], %16 {strides = array<i32>} : memref<16x64xbf16, #tpu.memory_space<vmem>>, vector<16x64xbf16>,
    } else {
    }
    return
  }
  func.func @transform_0(%arg0: i32, %arg1: i32, %arg2: i32) -> (i32, i32) {
    %c0_i32 = arith.constant 0 : i32
    return %arg0, %arg2 : i32, i32
  }
  func.func @transform_1(%arg0: i32, %arg1: i32, %arg2: i32) -> (i32, i32) {
    %c0_i32 = arith.constant 0 : i32
    return %arg2, %arg1 : i32, i32
  }
  func.func @transform_2(%arg0: i32, %arg1: i32, %arg2: i32) -> (i32, i32) {
    %c0_i32 = arith.constant 0 : i32
    %c0_i32_0 = arith.constant 0 : i32
    return %c0_i32, %arg1 : i32, i32
  }
  func.func @transform_3(%arg0: i32, %arg1: i32, %arg2: i32) -> (i32, i32) {
    %c0_i32 = arith.constant 0 : i32
    return %arg0, %arg1 : i32, i32
  }
}

module attributes {stable_mosaic.version = 11 : i64} {
  func.func @_attention_kernel(%arg0: i32, %arg1: i32, %arg2: memref<1x1x8x16xbf16, #tpu.memory_space<vmem>>, %arg3: memref<1x1x16x16xbf16, #tpu.memory_space<vmem>>, %arg4: memref<1x1x16x16xbf16, #tpu.memory_space<vmem>>, %arg5: memref<1x1x8x16xbf16, #tpu.memory_space<vmem>>) attributes {dimension_semantics = [#tpu.dimension_semantics<parallel>, #tpu.dimension_semantics<parallel>], iteration_bounds = array<i64: 2, 4>, scalar_prefetch = 0 : i64, scratch_operands = 0 : i64, tpu.core_type = #tpu.core_type<tc>, window_params = [{transform_indices = @transform_0, window_bounds = array<i64: 1, 1, 8, 16>}, {transform_indices = @transform_1, window_bounds = array<i64: 1, 1, 16, 16>}, {transform_indices = @transform_2, window_bounds = array<i64: 1, 1, 16, 16>}, {transform_indices = @transform_3, window_bounds = array<i64: 1, 1, 8, 16>}]} {
    %c0 = arith.constant 0 : index
    %c0_0 = arith.constant 0 : index
    %c0_1 = arith.constant 0 : index
    %c0_2 = arith.constant 0 : index
    %0 = vector.load %arg2[%c0, %c0_0, %c0_1, %c0_2] : memref<1x1x8x16xbf16, #tpu.memory_space<vmem>>, vector<1x1x8x16xbf16>
    %1 = vector.shape_cast %0 : vector<1x1x8x16xbf16> to vector<8x16xbf16>
    %c0_3 = arith.constant 0 : index
    %c0_4 = arith.constant 0 : index
    %c0_5 = arith.constant 0 : index
    %c0_6 = arith.constant 0 : index
    %2 = vector.load %arg3[%c0_3, %c0_4, %c0_5, %c0_6] : memref<1x1x16x16xbf16, #tpu.memory_space<vmem>>, vector<1x1x16x16xbf16>
    %3 = vector.shape_cast %2 : vector<1x1x16x16xbf16> to vector<16x16xbf16>
    %c0_7 = arith.constant 0 : index
    %c0_8 = arith.constant 0 : index
    %c0_9 = arith.constant 0 : index
    %c0_10 = arith.constant 0 : index
    %4 = vector.load %arg4[%c0_7, %c0_8, %c0_9, %c0_10] : memref<1x1x16x16xbf16, #tpu.memory_space<vmem>>, vector<1x1x16x16xbf16>
    %5 = vector.shape_cast %4 : vector<1x1x16x16xbf16> to vector<16x16xbf16>
    %cst = arith.constant dense<0.000000e+00> : vector<8x16xf32>
    %6 = tpu.matmul %1, %3, %cst {dimension_numbers = #tpu.dot_dimension_numbers<[1], [1], [0], [0], [0, 0, 1, 0], [], []>} : vector<8x16xbf16>, vector<16x16xbf16>, vector<8x16xf32> -> vector<8x16xf32>
    %cst_11 = arith.constant dense<0xFF800000> : vector<8xf32>
    %7 = vector.multi_reduction <maximumf>, %6, %cst_11 [1] : vector<8x16xf32> to vector<8xf32>
    %8 = vector.shape_cast %7 : vector<8xf32> to vector<8x1xf32>
    %9 = vector.broadcast %8 : vector<8x1xf32> to vector<8x16xf32>
    %10 = arith.subf %6, %9 : vector<8x16xf32>
    %11 = math.exp %10 : vector<8x16xf32>
    %cst_12 = arith.constant dense<0.000000e+00> : vector<8xf32>
    %12 = vector.multi_reduction <add>, %11, %cst_12 [1] : vector<8x16xf32> to vector<8xf32>
    %13 = vector.shape_cast %12 : vector<8xf32> to vector<8x1xf32>
    %14 = tpu.reciprocal %13 {approx = true} : vector<8x1xf32> -> vector<8x1xf32>
    %15 = vector.broadcast %14 : vector<8x1xf32> to vector<8x16xf32>
    %16 = arith.mulf %11, %15 : vector<8x16xf32>
    %17 = arith.truncf %16 : vector<8x16xf32> to vector<8x16xbf16>
    %cst_13 = arith.constant dense<0.000000e+00> : vector<8x16xf32>
    %18 = tpu.matmul %17, %5, %cst_13 {dimension_numbers = #tpu.dot_dimension_numbers<[1], [0], [0], [1], [0, 0, 1, 1], [], []>} : vector<8x16xbf16>, vector<16x16xbf16>, vector<8x16xf32> -> vector<8x16xf32>
    %19 = arith.truncf %18 : vector<8x16xf32> to vector<8x16xbf16>
    %c0_14 = arith.constant 0 : index
    %c0_15 = arith.constant 0 : index
    %c0_16 = arith.constant 0 : index
    %c0_17 = arith.constant 0 : index
    %20 = vector.load %arg5[%c0_14, %c0_15, %c0_16, %c0_17] : memref<1x1x8x16xbf16, #tpu.memory_space<vmem>>, vector<1x1x8x16xbf16>
    %21 = vector.shape_cast %20 : vector<1x1x8x16xbf16> to vector<8x16xbf16>
    %22 = vector.shape_cast %19 : vector<8x16xbf16> to vector<1x1x8x16xbf16>
    tpu.vector_store %arg5[%c0_14, %c0_15, %c0_16, %c0_17], %22 {strides = array<i32>} : memref<1x1x8x16xbf16, #tpu.memory_space<vmem>>, vector<1x1x8x16xbf16>,
    return
  }
  func.func @transform_0(%arg0: i32, %arg1: i32) -> (i32, i32, i32, i32) {
    %c0_i32 = arith.constant 0 : i32
    %c0_i32_0 = arith.constant 0 : i32
    %c0_i32_1 = arith.constant 0 : i32
    return %arg0, %arg1, %c0_i32, %c0_i32_0 : i32, i32, i32, i32
  }
  func.func @transform_1(%arg0: i32, %arg1: i32) -> (i32, i32, i32, i32) {
    %c0_i32 = arith.constant 0 : i32
    %c0_i32_0 = arith.constant 0 : i32
    %c0_i32_1 = arith.constant 0 : i32
    return %arg0, %arg1, %c0_i32, %c0_i32_0 : i32, i32, i32, i32
  }
  func.func @transform_2(%arg0: i32, %arg1: i32) -> (i32, i32, i32, i32) {
    %c0_i32 = arith.constant 0 : i32
    %c0_i32_0 = arith.constant 0 : i32
    %c0_i32_1 = arith.constant 0 : i32
    return %arg0, %arg1, %c0_i32, %c0_i32_0 : i32, i32, i32, i32
  }
  func.func @transform_3(%arg0: i32, %arg1: i32) -> (i32, i32, i32, i32) {
    %c0_i32 = arith.constant 0 : i32
    %c0_i32_0 = arith.constant 0 : i32
    %c0_i32_1 = arith.constant 0 : i32
    return %arg0, %arg1, %c0_i32, %c0_i32_0 : i32, i32, i32, i32
  }
}

module attributes {stable_mosaic.version = 11 : i64} {
  func.func @_ffn_add_ln_kernel(%arg0: i32, %arg1: memref<16x64xbf16, #tpu.memory_space<vmem>>, %arg2: memref<64x128xbf16, #tpu.memory_space<vmem>>, %arg3: memref<1x128xf32, #tpu.memory_space<vmem>>, %arg4: memref<128x64xbf16, #tpu.memory_space<vmem>>, %arg5: memref<1x64xf32, #tpu.memory_space<vmem>>, %arg6: memref<1x64xf32, #tpu.memory_space<vmem>>, %arg7: memref<1x64xf32, #tpu.memory_space<vmem>>, %arg8: memref<16x64xbf16, #tpu.memory_space<vmem>>) attributes {dimension_semantics = [#tpu.dimension_semantics<parallel>], iteration_bounds = array<i64: 1>, scalar_prefetch = 0 : i64, scratch_operands = 0 : i64, tpu.core_type = #tpu.core_type<tc>, window_params = [{transform_indices = @transform_0, window_bounds = array<i64: 16, 64>}, {pipeline_mode = #tpu.pipeline_mode<synchronous>, transform_indices = @transform_1, window_bounds = array<i64: 64, 128>}, {pipeline_mode = #tpu.pipeline_mode<synchronous>, transform_indices = @transform_2, window_bounds = array<i64: 1, 128>}, {pipeline_mode = #tpu.pipeline_mode<synchronous>, transform_indices = @transform_3, window_bounds = array<i64: 128, 64>}, {pipeline_mode = #tpu.pipeline_mode<synchronous>, transform_indices = @transform_4, window_bounds = array<i64: 1, 64>}, {pipeline_mode = #tpu.pipeline_mode<synchronous>, transform_indices = @transform_5, window_bounds = array<i64: 1, 64>}, {pipeline_mode = #tpu.pipeline_mode<synchronous>, transform_indices = @transform_6, window_bounds = array<i64: 1, 64>}, {transform_indices = @transform_7, window_bounds = array<i64: 16, 64>}]} {
    %c0 = arith.constant 0 : index
    %c0_0 = arith.constant 0 : index
    %0 = vector.load %arg1[%c0, %c0_0] : memref<16x64xbf16, #tpu.memory_space<vmem>>, vector<16x64xbf16>
    %c0_1 = arith.constant 0 : index
    %c0_2 = arith.constant 0 : index
    %1 = vector.load %arg2[%c0_1, %c0_2] : memref<64x128xbf16, #tpu.memory_space<vmem>>, vector<64x128xbf16>
    %cst = arith.constant dense<0.000000e+00> : vector<16x128xf32>
    %2 = tpu.matmul %0, %1, %cst {dimension_numbers = #tpu.dot_dimension_numbers<[1], [0], [0], [1], [0, 0, 1, 1], [], []>} : vector<16x64xbf16>, vector<64x128xbf16>, vector<16x128xf32> -> vector<16x128xf32>
    %c0_3 = arith.constant 0 : index
    %c0_4 = arith.constant 0 : index
    %3 = vector.load %arg3[%c0_3, %c0_4] : memref<1x128xf32, #tpu.memory_space<vmem>>, vector<1x128xf32>
    %4 = vector.broadcast %3 : vector<1x128xf32> to vector<16x128xf32>
    %5 = arith.addf %2, %4 : vector<16x128xf32>
    %cst_5 = arith.constant 0.000000e+00 : f32
    %6 = vector.broadcast %cst_5 : f32 to vector<16x128xf32>
    %7 = arith.maximumf %5, %6 : vector<16x128xf32>
    %8 = arith.truncf %7 : vector<16x128xf32> to vector<16x128xbf16>
    %c0_6 = arith.constant 0 : index
    %c0_7 = arith.constant 0 : index
    %9 = vector.load %arg4[%c0_6, %c0_7] : memref<128x64xbf16, #tpu.memory_space<vmem>>, vector<128x64xbf16>
    %cst_8 = arith.constant dense<0.000000e+00> : vector<16x64xf32>
    %10 = tpu.matmul %8, %9, %cst_8 {dimension_numbers = #tpu.dot_dimension_numbers<[1], [0], [0], [1], [0, 0, 1, 1], [], []>} : vector<16x128xbf16>, vector<128x64xbf16>, vector<16x64xf32> -> vector<16x64xf32>
    %c0_9 = arith.constant 0 : index
    %c0_10 = arith.constant 0 : index
    %11 = vector.load %arg5[%c0_9, %c0_10] : memref<1x64xf32, #tpu.memory_space<vmem>>, vector<1x64xf32>
    %12 = vector.broadcast %11 : vector<1x64xf32> to vector<16x64xf32>
    %13 = arith.addf %10, %12 : vector<16x64xf32>
    %14 = arith.extf %0 : vector<16x64xbf16> to vector<16x64xf32>
    %15 = arith.addf %13, %14 : vector<16x64xf32>
    %cst_11 = arith.constant dense<0.000000e+00> : vector<16xf32>
    %16 = vector.multi_reduction <add>, %15, %cst_11 [1] : vector<16x64xf32> to vector<16xf32>
    %17 = vector.shape_cast %16 : vector<16xf32> to vector<16x1xf32>
    %cst_12 = arith.constant 6.400000e+01 : f32
    %18 = vector.broadcast %cst_12 : f32 to vector<16x1xf32>
    %19 = arith.divf %17, %18 : vector<16x1xf32>
    %20 = vector.broadcast %19 : vector<16x1xf32> to vector<16x64xf32>
    %21 = arith.subf %15, %20 : vector<16x64xf32>
    %22 = arith.mulf %21, %21 : vector<16x64xf32>
    %cst_13 = arith.constant dense<0.000000e+00> : vector<16xf32>
    %23 = vector.multi_reduction <add>, %22, %cst_13 [1] : vector<16x64xf32> to vector<16xf32>
    %24 = vector.shape_cast %23 : vector<16xf32> to vector<16x1xf32>
    %cst_14 = arith.constant 6.400000e+01 : f32
    %25 = vector.broadcast %cst_14 : f32 to vector<16x1xf32>
    %26 = arith.divf %24, %25 : vector<16x1xf32>
    %27 = vector.broadcast %19 : vector<16x1xf32> to vector<16x64xf32>
    %28 = arith.subf %15, %27 : vector<16x64xf32>
    %cst_15 = arith.constant 9.99999974E-6 : f32
    %29 = vector.broadcast %cst_15 : f32 to vector<16x1xf32>
    %30 = arith.addf %26, %29 : vector<16x1xf32>
    %31 = math.rsqrt %30 : vector<16x1xf32>
    %32 = vector.broadcast %31 : vector<16x1xf32> to vector<16x64xf32>
    %33 = arith.mulf %28, %32 : vector<16x64xf32>
    %c0_16 = arith.constant 0 : index
    %c0_17 = arith.constant 0 : index
    %34 = vector.load %arg6[%c0_16, %c0_17] : memref<1x64xf32, #tpu.memory_space<vmem>>, vector<1x64xf32>
    %35 = vector.broadcast %34 : vector<1x64xf32> to vector<16x64xf32>
    %36 = arith.mulf %33, %35 : vector<16x64xf32>
    %c0_18 = arith.constant 0 : index
    %c0_19 = arith.constant 0 : index
    %37 = vector.load %arg7[%c0_18, %c0_19] : memref<1x64xf32, #tpu.memory_space<vmem>>, vector<1x64xf32>
    %38 = vector.broadcast %37 : vector<1x64xf32> to vector<16x64xf32>
    %39 = arith.addf %36, %38 : vector<16x64xf32>
    %40 = arith.truncf %39 : vector<16x64xf32> to vector<16x64xbf16>
    %c0_20 = arith.constant 0 : index
    %c0_21 = arith.constant 0 : index
    %41 = vector.load %arg8[%c0_20, %c0_21] : memref<16x64xbf16, #tpu.memory_space<vmem>>, vector<16x64xbf16>
    tpu.vector_store %arg8[%c0_20, %c0_21], %40 {strides = array<i32>} : memref<16x64xbf16, #tpu.memory_space<vmem>>, vector<16x64xbf16>,
    return
  }
  func.func @transform_0(%arg0: i32) -> (i32, i32) {
    %c0_i32 = arith.constant 0 : i32
    %c0_i32_0 = arith.constant 0 : i32
    return %arg0, %c0_i32 : i32, i32
  }
  func.func @transform_1(%arg0: i32) -> (i32, i32) {
    %c0_i32 = arith.constant 0 : i32
    %c0_i32_0 = arith.constant 0 : i32
    %c0_i32_1 = arith.constant 0 : i32
    return %c0_i32, %c0_i32_0 : i32, i32
  }
  func.func @transform_2(%arg0: i32) -> (i32, i32) {
    %c0_i32 = arith.constant 0 : i32
    %c0_i32_0 = arith.constant 0 : i32
    %c0_i32_1 = arith.constant 0 : i32
    return %c0_i32, %c0_i32_0 : i32, i32
  }
  func.func @transform_3(%arg0: i32) -> (i32, i32) {
    %c0_i32 = arith.constant 0 : i32
    %c0_i32_0 = arith.constant 0 : i32
    %c0_i32_1 = arith.constant 0 : i32
    return %c0_i32, %c0_i32_0 : i32, i32
  }
  func.func @transform_4(%arg0: i32) -> (i32, i32) {
    %c0_i32 = arith.constant 0 : i32
    %c0_i32_0 = arith.constant 0 : i32
    %c0_i32_1 = arith.constant 0 : i32
    return %c0_i32, %c0_i32_0 : i32, i32
  }
  func.func @transform_5(%arg0: i32) -> (i32, i32) {
    %c0_i32 = arith.constant 0 : i32
    %c0_i32_0 = arith.constant 0 : i32
    %c0_i32_1 = arith.constant 0 : i32
    return %c0_i32, %c0_i32_0 : i32, i32
  }
  func.func @transform_6(%arg0: i32) -> (i32, i32) {
    %c0_i32 = arith.constant 0 : i32
    %c0_i32_0 = arith.constant 0 : i32
    %c0_i32_1 = arith.constant 0 : i32
    return %c0_i32, %c0_i32_0 : i32, i32
  }
  func.func @transform_7(%arg0: i32) -> (i32, i32) {
    %c0_i32 = arith.constant 0 : i32
    %c0_i32_0 = arith.constant 0 : i32
    return %arg0, %c0_i32 : i32, i32
  }
}

module attributes {stable_mosaic.version = 11 : i64} {
  func.func @_matmul_kernel(%arg0: i32, %arg1: i32, %arg2: i32, %arg3: memref<16x64xbf16, #tpu.memory_space<vmem>>, %arg4: memref<64x128xbf16, #tpu.memory_space<vmem>>, %arg5: memref<1x128xf32, #tpu.memory_space<vmem>>, %arg6: memref<16x128xbf16, #tpu.memory_space<vmem>>, %arg7: memref<16x128xf32, #tpu.memory_space<vmem>>) attributes {dimension_semantics = [#tpu.dimension_semantics<parallel>, #tpu.dimension_semantics<parallel>, #tpu.dimension_semantics<arbitrary>], iteration_bounds = array<i64: 1, 1, 1>, scalar_prefetch = 0 : i64, scratch_operands = 1 : i64, tpu.core_type = #tpu.core_type<tc>, window_params = [{transform_indices = @transform_0, window_bounds = array<i64: 16, 64>}, {transform_indices = @transform_1, window_bounds = array<i64: 64, 128>}, {transform_indices = @transform_2, window_bounds = array<i64: 1, 128>}, {transform_indices = @transform_3, window_bounds = array<i64: 16, 128>}]} {
    %c0_i32 = arith.constant 0 : i32
    %0 = arith.cmpi eq, %arg2, %c0_i32 : i32
    %1 = arith.extui %0 : i1 to i32
    %c0_i32_0 = arith.constant 0 : i32
    %2 = arith.cmpi ne, %1, %c0_i32_0 : i32
    scf.if %2 {
      %cst_10 = arith.constant 0.000000e+00 : f32
      %12 = vector.broadcast %cst_10 : f32 to vector<16x128xf32>
      %c0_11 = arith.constant 0 : index
      %c0_12 = arith.constant 0 : index
      %13 = vector.load %arg7[%c0_11, %c0_12] : memref<16x128xf32, #tpu.memory_space<vmem>>, vector<16x128xf32>
      tpu.vector_store %arg7[%c0_11, %c0_12], %12 {strides = array<i32>} : memref<16x128xf32, #tpu.memory_space<vmem>>, vector<16x128xf32>,
    } else {
    }
    %c0 = arith.constant 0 : index
    %c0_1 = arith.constant 0 : index
    %3 = vector.load %arg7[%c0, %c0_1] : memref<16x128xf32, #tpu.memory_space<vmem>>, vector<16x128xf32>
    %c0_2 = arith.constant 0 : index
    %c0_3 = arith.constant 0 : index
    %4 = vector.load %arg3[%c0_2, %c0_3] : memref<16x64xbf16, #tpu.memory_space<vmem>>, vector<16x64xbf16>
    %c0_4 = arith.constant 0 : index
    %c0_5 = arith.constant 0 : index
    %5 = vector.load %arg4[%c0_4, %c0_5] : memref<64x128xbf16, #tpu.memory_space<vmem>>, vector<64x128xbf16>
    %cst = arith.constant dense<0.000000e+00> : vector<16x128xf32>
    %6 = tpu.matmul %4, %5, %cst {dimension_numbers = #tpu.dot_dimension_numbers<[1], [0], [0], [1], [0, 0, 1, 1], [], []>} : vector<16x64xbf16>, vector<64x128xbf16>, vector<16x128xf32> -> vector<16x128xf32>
    %7 = arith.addf %3, %6 : vector<16x128xf32>
    %c0_6 = arith.constant 0 : index
    %c0_7 = arith.constant 0 : index
    %8 = vector.load %arg7[%c0_6, %c0_7] : memref<16x128xf32, #tpu.memory_space<vmem>>, vector<16x128xf32>
    tpu.vector_store %arg7[%c0_6, %c0_7], %7 {strides = array<i32>} : memref<16x128xf32, #tpu.memory_space<vmem>>, vector<16x128xf32>,
    %c0_i32_8 = arith.constant 0 : i32
    %9 = arith.cmpi eq, %arg2, %c0_i32_8 : i32
    %10 = arith.extui %9 : i1 to i32
    %c0_i32_9 = arith.constant 0 : i32
    %11 = arith.cmpi ne, %10, %c0_i32_9 : i32
    scf.if %11 {
      %c0_10 = arith.constant 0 : index
      %c0_11 = arith.constant 0 : index
      %12 = vector.load %arg7[%c0_10, %c0_11] : memref<16x128xf32, #tpu.memory_space<vmem>>, vector<16x128xf32>
      %c0_12 = arith.constant 0 : index
      %c0_13 = arith.constant 0 : index
      %13 = vector.load %arg5[%c0_12, %c0_13] : memref<1x128xf32, #tpu.memory_space<vmem>>, vector<1x128xf32>
      %14 = vector.broadcast %13 : vector<1x128xf32> to vector<16x128xf32>
      %15 = arith.addf %12, %14 : vector<16x128xf32>
      %16 = arith.truncf %15 : vector<16x128xf32> to vector<16x128xbf16>
      %c0_14 = arith.constant 0 : index
      %c0_15 = arith.constant 0 : index
      %17 = vector.load %arg6[%c0_14, %c0_15] : memref<16x128xbf16, #tpu.memory_space<vmem>>, vector<16x128xbf16>
      tpu.vector_store %arg6[%c0_14, %c0_15], %16 {strides = array<i32>} : memref<16x128xbf16, #tpu.memory_space<vmem>>, vector<16x128xbf16>,
    } else {
    }
    return
  }
  func.func @transform_0(%arg0: i32, %arg1: i32, %arg2: i32) -> (i32, i32) {
    %c0_i32 = arith.constant 0 : i32
    return %arg0, %arg2 : i32, i32
  }
  func.func @transform_1(%arg0: i32, %arg1: i32, %arg2: i32) -> (i32, i32) {
    %c0_i32 = arith.constant 0 : i32
    return %arg2, %arg1 : i32, i32
  }
  func.func @transform_2(%arg0: i32, %arg1: i32, %arg2: i32) -> (i32, i32) {
    %c0_i32 = arith.constant 0 : i32
    %c0_i32_0 = arith.constant 0 : i32
    return %c0_i32, %arg1 : i32, i32
  }
  func.func @transform_3(%arg0: i32, %arg1: i32, %arg2: i32) -> (i32, i32) {
    %c0_i32 = arith.constant 0 : i32
    return %arg0, %arg1 : i32, i32
  }
}

</mosaic_0001>

<bundles_post_ra>
// kernel: transformer_forward.27
= control target key start
LH: loop header
LB: loop body
LE: loop exit
PB: predicated region body
PF: predicated region fallthrough
CT: control target
= control target key end

     0   :  { %vm19_vm0 = vcmask 523264   ;;  %v198_v1 = vmov 0.0   ;;  %vm58_vm1 = vcmask 261120   ;;  %vm157_vm2 = vcmask 519168   ;;  %s254_s1 = inlined_call_operand.vmem [shape: bf16[32,64], index: 1, kind: input, shape index: {}]   ;;  %s255_s0 = inlined_call_operand.vmem [shape: bf16[32,32], index: 0, kind: input, shape index: {}]   ;;  %s256_s2 = inlined_call_operand.vmem [shape: f32[1,64], index: 2, kind: input, shape index: {}]   ;;  %s257_s3 = inlined_call_operand.vmem [shape: bf16[32,64], index: 3, kind: output, shape index: {}]  }
   0x1   :  { %v194_v0 = vld [vmem:[%s254_s1] sm:$0xff]   ;;  %22 = vst.msk [vmem:[#allocation2 + $0x10] sm:$0xff] %vm19_vm0, %v198_v1  ;;  %20 = vst.msk [vmem:[#allocation2] sm:$0xff] %vm19_vm0, %v198_v1  ;;  %v195_v2 = vld [vmem:[%s254_s1 + $0x8] sm:$0xff]  }
   0x2   :  { %21 = vst.msk [vmem:[#allocation2 + $0x8] sm:$0xff] %vm19_vm0, %v198_v1  ;;  %23 = vst.msk [vmem:[#allocation2 + $0x18] sm:$0xff] %vm19_vm0, %v198_v1  ;;  %185 = vmatprep.subr.bf16.mxu0 %v194_v0  ;;  %v196_v3 = vld [vmem:[%s255_s0] sm:$0xff]   ;;  %v197_v4 = vld [vmem:[%s255_s0 + $0x8] sm:$0xff]  }
   0x3   :  { %186 = vmatpush3.bf16.msra.mxu0 %v194_v0  ;;  %189 = vmatprep.mubr.msk.bf16.mxu0 %vm58_vm1, %v196_v3  ;;  %v172_v17 = vld [vmem:[%s256_s2] ss:$0 sm:$0xff] }
   0x4   :  { %187 = vmatprep.subr.bf16.mxu0 %v195_v2 }
   0x7   :  { %188 = vmatpush3.bf16.msra.mxu0 %v195_v2 }
   0x8   :  { %v26_v5 = vld [vmem:[#allocation2 + $0x10] sm:$0xff]  ;;  %v24_v6 = vld [vmem:[#allocation2] sm:$0xff] }
   0x9   :  { %v27_v8 = vld [vmem:[#allocation2 + $0x18] sm:$0xff]  ;;  %v25_v11 = vld [vmem:[#allocation2 + $0x8] sm:$0xff] }
   0xa   :  { %190 = vmatmul.mubr.msk.bf16.vlgmr.msra.gmra.mrb[0].mxu0 %vm58_vm1, %v197_v4 }
  0xdd   :  { %v191_v7 = vpop.f32.mrb[0].mxu0 }
  0xde   :  { %v116_v9 = vadd.f32 %v191_v7, %v26_v5  ;;  %v99_v10 = vpop.f32.mrb[1].mxu0 }
  0xdf   :  { %v114_v12 = vadd.f32 %v99_v10, %v24_v6  ;;  %v192_v13 = vpop.f32.mrb[2].mxu0 }
  0xe0   :  { %121 = vst.msk [vmem:[#allocation2 + $0x10] sm:$0xff] %vm19_vm0, %v116_v9  ;;  %v117_v14 = vadd.f32 %v192_v13, %v27_v8  ;;  %v102_v15 = vpop.f32.mrb[3].mxu0 }
  0xe1   :  { %119 = vst.msk [vmem:[#allocation2] sm:$0xff] %vm19_vm0, %v114_v12  ;;  %v115_v16 = vadd.f32 %v102_v15, %v25_v11 }
  0xe2   :  { %122 = vst.msk [vmem:[#allocation2 + $0x18] sm:$0xff] %vm19_vm0, %v117_v14 }
  0xe3   :  { %120 = vst.msk [vmem:[#allocation2 + $0x8] sm:$0xff] %vm19_vm0, %v115_v16 }
  0xe7   :  { %v128_v18 = vld [vmem:[#allocation2 + $0x10] sm:$0xff] }
  0xe8   :  { %v139_v19 = vadd.f32 %v172_v17, %v128_v18  ;;  %v126_v20 = vld [vmem:[#allocation2] sm:$0xff] }
  0xe9   :  { %v137_v21 = vadd.f32 %v172_v17, %v126_v20  ;;  %v129_v22 = vld [vmem:[#allocation2 + $0x18] sm:$0xff] }
  0xea   :  { %v179_v23 = vpack.c.bf16 %v139_v19, %v139_v19  ;;  %v140_v24 = vadd.f32 %v172_v17, %v129_v22  ;;  %v127_v25 = vld [vmem:[#allocation2 + $0x8] sm:$0xff] }
  0xeb   :  { %v177_v26 = vpack.c.bf16 %v137_v21, %v137_v21  ;;  %v138_v27 = vadd.f32 %v172_v17, %v127_v25 }
  0xec   :  { %160 = vst.msk [vmem:[%s257_s3 + $0x8] sm:$0xf] %vm157_vm2, %v179_v23  ;;  %v180_v28 = vpack.c.bf16 %v140_v24, %v140_v24 }
  0xed   :  { %158 = vst.msk [vmem:[%s257_s3] sm:$0xf] %vm157_vm2, %v177_v26  ;;  %v178_v29 = vpack.c.bf16 %v138_v27, %v138_v27 }
  0xee   :  { %161 = vst.msk [vmem:[%s257_s3 + $0xc] sm:$0xf] %vm157_vm2, %v180_v28 }
  0xef   :  { %159 = vst.msk [vmem:[%s257_s3 + $0x4] sm:$0xf] %vm157_vm2, %v178_v29 }

// kernel: transformer_forward.28
= control target key start
LH: loop header
LB: loop body
LE: loop exit
PB: predicated region body
PF: predicated region fallthrough
CT: control target
= control target key end

     0   :  { %vm20_vm0 = vcmask 523264   ;;  %v284_v1 = vmov 0   ;;  %v285_v2 = vmov 0.0   ;;  %v187_v12 = vlaneseq  ;;  %s361_s1 = inlined_call_operand.vmem [shape: bf16[64,192], index: 1, kind: input, shape index: {}]   ;;  %s362_s0 = inlined_call_operand.vmem [shape: bf16[32,64], index: 0, kind: input, shape index: {}]   ;;  %s363_s2 = inlined_call_operand.vmem [shape: f32[1,192], index: 2, kind: input, shape index: {}]   ;;  %s364_s3 = inlined_call_operand.vmem [shape: bf16[32,192], index: 3, kind: output, shape index: {}]  }
   0x1   :  { %v270_v0 = vld [vmem:[%s361_s1 + $0x4] ss:$8 sps:$4 sm:$0xff]   ;;  %137 = vmatprep.mubr.bf16.mxu0 %v284_v1  ;;  %147 = vmatprep.mubr.bf16.mxu1 %v284_v1  ;;  %21 = vst.msk [vmem:[#allocation2 + $0x8] sm:$0xff] %vm20_vm0, %v285_v2  ;;  %23 = vst.msk [vmem:[#allocation2 + $0x18] sm:$0xff] %vm20_vm0, %v285_v2  ;;  %v272_v3 = vld [vmem:[%s361_s1] ss:$8 sps:$4 sm:$0xff]  }
   0x2   :  { %25 = vst.msk [vmem:[#allocation2 + $0x28] sm:$0xff] %vm20_vm0, %v285_v2  ;;  %27 = vst.msk [vmem:[#allocation2 + $0x38] sm:$0xff] %vm20_vm0, %v285_v2  ;;  %105 = vmatprep.subr.bf16.mxu0 %v270_v0  ;;  %260 = vmatprep.subr.bf16.mxu1 %v270_v0  ;;  %v273_v4 = vld [vmem:[%s361_s1 + $0x14] ss:$8 sps:$4 sm:$0xff]   ;;  %v275_v5 = vld [vmem:[%s361_s1 + $0x10] ss:$8 sps:$4 sm:$0xff]  }
   0x3   :  { %106 = vmatpush1.bf16.msra.mxu0 %v272_v3  ;;  %264 = vmatpush1.bf16.msra.mxu1 %v272_v3  ;;  %v276_v6 = vld [vmem:[%s361_s1 + $0x24] ss:$8 sps:$4 sm:$0xff]   ;;  %v278_v7 = vld [vmem:[%s361_s1 + $0x20] ss:$8 sps:$4 sm:$0xff]   ;;  %v279_v8 = vld [vmem:[%s361_s1 + $0x34] ss:$8 sps:$4 sm:$0xff]  }
   0x4   :  { %107 = vmatprep.subr.bf16.mxu0 %v273_v4  ;;  %261 = vmatprep.subr.bf16.mxu1 %v273_v4  ;;  %v281_v9 = vld [vmem:[%s361_s1 + $0x30] ss:$8 sps:$4 sm:$0xff]   ;;  %v282_v10 = vld [vmem:[%s362_s0] sm:$0xff]   ;;  %v283_v11 = vld [vmem:[%s362_s0 + $0x8] sm:$0xff]   ;;  %v188_v16 = vshrl.u32 %v187_v12, 7  ;;  %vm229_vm1 = vcmask 1043456  }
   0x5   :  { %v185_v32 = vld [vmem:[%s363_s2] sm:$0x3]  ;;  %vm230_vm2 = vcmask 523268  }
   0x6   :  { %v189_v28 = vsub.s32 0, %v188_v16  ;;  %v193_v29 = vsub.s32 1, %v188_v16  ;;  %vm231_vm3 = vmor %vm230_vm2, %vm229_vm1 }
   0x7   :  { %108 = vmatpush1.bf16.msra.mxu0 %v275_v5  ;;  %265 = vmatpush1.bf16.msra.mxu1 %v275_v5 }
   0x8   :  { %109 = vmatprep.subr.bf16.mxu0 %v276_v6  ;;  %262 = vmatprep.subr.bf16.mxu1 %v276_v6  ;;  %v29_v13 = vld [vmem:[#allocation2 + $0x8] sm:$0xff]  ;;  %v31_v20 = vld [vmem:[#allocation2 + $0x18] sm:$0xff]  ;;  %v190_v33 = vrot.slane %v185_v32, %v189_v28  ;;  %v194_v34 = vrot.slane %v185_v32, %v193_v29 }
   0x9   :  { %v33_v14 = vld [vmem:[#allocation2 + $0x28] sm:$0xff]  ;;  %v35_v21 = vld [vmem:[#allocation2 + $0x38] sm:$0xff] }
   0xb   :  { %110 = vmatpush1.bf16.msra.mxu0 %v278_v7  ;;  %266 = vmatpush1.bf16.msra.mxu1 %v278_v7 }
   0xc   :  { %111 = vmatprep.subr.bf16.mxu0 %v279_v8  ;;  %263 = vmatprep.subr.bf16.mxu1 %v279_v8 }
   0xf   :  { %112 = vmatpush1.bf16.msra.mxu0 %v281_v9  ;;  %267 = vmatpush1.bf16.msra.mxu1 %v281_v9 }
  0x12   :  { %250 = vmatmul.mubr.msk.bf16.vlgmr.msra.gmra.mrb[0].mxu0 %vm20_vm0, %v282_v10  ;;  %251 = vmatmul.mubr.msk.bf16.vlgmr.msra.gmra.mrb[0].mxu1 %vm20_vm0, %v283_v11 }
  0xe5   :  { %v139_v15 = vpop.f32.mrb[0].mxu0  ;;  %v149_v17 = vpop.f32.mrb[0].mxu1 }
  0xe6   :  { %v141_v18 = vpop.f32.mrb[1].mxu0  ;;  %v151_v19 = vpop.f32.mrb[1].mxu1  ;;  %v197_v37 = vadd.f32 %v190_v33, %v139_v15  ;;  %v201_v38 = vadd.f32 %v190_v33, %v149_v17 }
  0xe7   :  { %v159_v22 = vadd.f32 %v141_v18, %v29_v13  ;;  %v163_v23 = vadd.f32 %v151_v19, %v33_v14  ;;  %v143_v24 = vpop.f32.mrb[2].mxu0  ;;  %v153_v25 = vpop.f32.mrb[2].mxu1 }
  0xe8   :  { %v145_v26 = vpop.f32.mrb[3].mxu0  ;;  %v155_v27 = vpop.f32.mrb[3].mxu1  ;;  %v199_v41 = vadd.f32 %v190_v33, %v143_v24  ;;  %v203_v42 = vadd.f32 %v190_v33, %v153_v25 }
  0xe9   :  { %167 = vst.msk [vmem:[#allocation2 + $0x8] sm:$0xff] %vm20_vm0, %v159_v22  ;;  %171 = vst.msk [vmem:[#allocation2 + $0x28] sm:$0xff] %vm20_vm0, %v163_v23  ;;  %v161_v30 = vadd.f32 %v145_v26, %v31_v20  ;;  %v165_v31 = vadd.f32 %v155_v27, %v35_v21 }
  0xeb   :  { %169 = vst.msk [vmem:[#allocation2 + $0x18] sm:$0xff] %vm20_vm0, %v161_v30  ;;  %173 = vst.msk [vmem:[#allocation2 + $0x38] sm:$0xff] %vm20_vm0, %v165_v31 }
  0xf0   :  { %v178_v35 = vld [vmem:[#allocation2 + $0x8] sm:$0xff] }
  0xf1   :  { %v182_v36 = vld [vmem:[#allocation2 + $0x28] sm:$0xff]  ;;  %v198_v39 = vadd.f32 %v194_v34, %v178_v35 }
  0xf2   :  { %v202_v40 = vadd.f32 %v194_v34, %v182_v36  ;;  %v180_v43 = vld [vmem:[#allocation2 + $0x18] sm:$0xff] }
  0xf3   :  { %v184_v44 = vld [vmem:[#allocation2 + $0x38] sm:$0xff]  ;;  %v256_v45 = vpack.c.bf16 %v198_v39, %v197_v37  ;;  %v200_v47 = vadd.f32 %v194_v34, %v180_v43 }
  0xf4   :  { %v258_v46 = vpack.c.bf16 %v202_v40, %v201_v38  ;;  %v204_v48 = vadd.f32 %v194_v34, %v184_v44 }
  0xf5   :  { %232 = vst.msk [vmem:[%s364_s3] sm:$0xff] %vm231_vm3, %v256_v45  ;;  %v257_v49 = vpack.c.bf16 %v200_v47, %v199_v41 }
  0xf6   :  { %234 = vst.msk [vmem:[%s364_s3 + $0x10] sm:$0xff] %vm231_vm3, %v258_v46  ;;  %v259_v50 = vpack.c.bf16 %v204_v48, %v203_v42 }
  0xf7   :  { %233 = vst.msk [vmem:[%s364_s3 + $0x8] sm:$0xff] %vm231_vm3, %v257_v49 }
  0xf8   :  { %235 = vst.msk [vmem:[%s364_s3 + $0x18] sm:$0xff] %vm231_vm3, %v259_v50 }

// kernel: transformer_forward.29
= control target key start
LH: loop header
LB: loop body
LE: loop exit
PB: predicated region body
PF: predicated region fallthrough
CT: control target
= control target key end

     0   :  { %s720_s12 = smov 0   ;;  %s722_s13 = smov 0   ;;  %s790_s0 = inlined_call_operand.vmem [shape: bf16[2,4,16,16], index: 0, kind: input, shape index: {}]   ;;  %s791_s1 = inlined_call_operand.vmem [shape: bf16[2,4,16,16], index: 1, kind: input, shape index: {}]   ;;  %s792_s2 = inlined_call_operand.vmem [shape: bf16[2,4,16,16], index: 2, kind: input, shape index: {}]   ;;  %s793_s3 = inlined_call_operand.vmem [shape: bf16[2,4,16,16], index: 3, kind: output, shape index: {}]  }
   0x1   :  { %s724_s14 = smov 0   ;;  %s726_s15 = smov 0  }
   0x2   :  { %s728_s16 = smov 0  }
   0x3 LB: > { %s22_s17 = sadd.s32 1, %s688_s14  ;;  %s25_s18 = sadd.s32 1, %s692_s15  ;;  %s696_s16 = sphi %s728_s16, %s13_s16   ;;  %s692_s15 = sphi %s726_s15, %s797_s15   ;;  %s688_s14 = sphi %s724_s14, %s796_s14   ;;  %s684_s13 = sphi %s722_s13, %s795_s13   ;;  %s680_s12 = sphi %s720_s12, %s794_s12  }
   0x4   : > { %p23_p0 = scmp.ge.s32.totalorder %s22_s17, 4  ;;  %p565_p1 = scmp.ge.s32.totalorder %s696_s16, 1 }
   0x5   : > { %p189_p2 = scmp.lt.s32.totalorder %s696_s16, 9 }
   0x6   : > { %s799_s17 = smov (%p23_p0, %s22_s17), 0  ;;  %s801_s18 = smov (!%p23_p0, %s25_s18), %s692_s15 }
   0x7   : > { %p190_p3 = pnand %p565_p1, %p189_p2  ;;  %p27_p4 = scmp.ge.s32.totalorder %s801_s18, 2 }
   0x8   : > { %p239_p5 = scmp.lt.s32.totalorder (!%p190_p3), %s684_s13, 1  ;;  %p241_p6 = scmp.lt.s32.totalorder (!%p190_p3), %s680_s12, 3  ;;  %v698_v0 = vmov (!%p190_p3), 0.0   ;;  %vm699_vm0 = vmmov (!%p190_p3), 0   ;;  %vm292_vm1 = vcmask (!%p190_p3), 130048   ;;  %vm421_vm2 = vcmask (!%p190_p3), 125952  }
   0x9   : > { %s803_s18 = smov (%p27_p4, %s801_s18), 0  ;;  %193 = sbr.rel (%p190_p3) target bundleno = 779 (0x30b), region = 32 }
   0xa   : > { %593 = vmatprep.subr.bf16.mxu0 (!%p190_p3), %v698_v0  ;;  %595 = vmatprep.mubr.msk.bf16.mxu0 (!%p190_p3), %vm699_vm0, %v698_v0 }
   0xb   : > { %599 = vmatprep.subr.bf16.mxu1 (!%p190_p3), %v698_v0  ;;  %601 = vmatprep.mubr.msk.bf16.mxu1 (!%p190_p3), %vm699_vm0, %v698_v0 }
  0x10   : > { %s805_s13 = smov (!%p239_p5, %s684_s13), 1  ;;  %s807_s12 = smov (!%p241_p6, %s680_s12), 3 }
  0x11   : > { %s567_s19 = sshll.u32 %s805_s13, 3  ;;  %s566_s20 = sshll.u32 %s807_s12, 1 }
  0x12   : > { %s245_s21 = sadd.s32 %s567_s19, %s566_s20 }
  0x13   : > { %s750_s22 = sshll.u32 %s245_s21, 2 }
  0x14   : > { %s256_s25 = scalar_lea.vmem %s791_s1, %s750_s22  ;;  %s247_s28 = scalar_lea.vmem %s790_s0, %s750_s22 }
  0x15   : > { %v647_v1 = vld [vmem:[%s256_s25] sm:$0xff]   ;;  %s265_s4 = scalar_lea.vmem %s792_s2, %s750_s22  ;;  %s274_s7 = scalar_lea.vmem %s793_s3, %s750_s22 }
  0x16   : > { %v297_v2 = vsel %vm292_vm1, %v647_v1, 0  ;;  %v648_v3 = vld [vmem:[%s247_s28] sm:$0xff]  }
  0x17   : > { %594 = vmatpush3.bf16.xpose.msra.mxu0 %v297_v2  ;;  %v649_v20 = vld [vmem:[%s265_s4] sm:$0xff]  }
  0x18   : > { %600 = vmatpush3.bf16.msra.mxu1 %v649_v20 }
  0x1e   : > { %596 = vmatmul.mubr.msk.bf16.vlgmr.msra.gmra.mrb[0].mxu0 %vm292_vm1, %v648_v3 }
  0xf1   : > { %v333_v4 = vpop.f32.mrb[0].mxu0 }
  0xf2   : > { %v597_v5 = vpop.f32.mrb[1].mxu0  ;;  %v340_v6 = vsel %vm292_vm1, %v333_v4, -inf }
  0xf3   : > { %341 = vmax.xlane.f32.xlu0 %v340_v6  ;;  %v336_v7 = vpop.f32.mrb[2].mxu0 }
  0xf4   : > { %v598_v8 = vpop.f32.mrb[3].mxu0  ;;  %v343_v9 = vsel %vm292_vm1, %v336_v7, -inf }
  0xf7   : > { %344 = vmax.xlane.f32.xlu0 %v343_v9 }
 0x180   : > { %v342_v10 = vpop.xlane.xlu0 %341 }
 0x181   : > { %v346_v11 = vsub.f32 %v333_v4, %v342_v10 }
 0x183   : > { %v348_v12 = vmul.f32 1.442695, %v346_v11 }
 0x184   : > { %v345_v13 = vpop.xlane.xlu0 %344 }
 0x185   : > { %650 = vpow2.f32 %v348_v12  ;;  %v347_v14 = vsub.f32 %v336_v7, %v345_v13 }
 0x187   : > { %v350_v15 = vmul.f32 1.442695, %v347_v14 }
 0x189   : > { %652 = vpow2.f32 %v350_v15 }
 0x18f   : > { %v651_v16 = vpop.eup %650 }
 0x190   : > { %v352_v17 = vsel %vm292_vm1, %v651_v16, 0.0 }
 0x191   : > { %353 = vadd.xlane.f32.xlu1 %v352_v17 }
 0x193   : > { %v653_v18 = vpop.eup %652 }
 0x194   : > { %v355_v19 = vsel %vm292_vm1, %v653_v18, 0.0 }
 0x195   : > { %356 = vadd.xlane.f32.xlu1 %v355_v19 }
 0x21e   : > { %v354_v21 = vpop.xlane.xlu1 %353 }
 0x21f   : > { %654 = vrcp.f32 %v354_v21 }
 0x222   : > { %v357_v22 = vpop.xlane.xlu1 %356 }
 0x223   : > { %656 = vrcp.f32 %v357_v22 }
 0x229   : > { %v655_v23 = vpop.eup %654 }
 0x22a   : > { %v360_v25 = vmul.f32 %v655_v23, %v651_v16 }
 0x22d   : > { %v657_v24 = vpop.eup %656 }
 0x22e   : > { %v361_v26 = vmul.f32 %v657_v24, %v653_v18 }
 0x230   : > { %v362_v27 = vpack.c.bf16 %v361_v26, %v360_v25 }
 0x232   : > { %602 = vmatmul.mubr.msk.bf16.vlgmr.msra.gmra.mrb[0].mxu1 %vm292_vm1, %v362_v27 }
 0x305   : > { %v406_v28 = vpop.f32.mrb[0].mxu1 }
 0x306   : > { %v587_v29 = vpack.c.bf16 %v406_v28, %v406_v28  ;;  %v603_v30 = vpop.f32.mrb[1].mxu1 }
 0x307   : > { %v409_v31 = vpop.f32.mrb[2].mxu1 }
 0x308   : > { %422 = vst.msk [vmem:[%s274_s7] sm:$0xf] %vm421_vm2, %v587_v29  ;;  %v588_v32 = vpack.c.bf16 %v409_v31, %v409_v31  ;;  %v604_v33 = vpop.f32.mrb[3].mxu1 }
 0x30a   : > { %423 = vst.msk [vmem:[%s274_s7 + $0x4] sm:$0xf] %vm421_vm2, %v588_v32 }
 0x30b PF: > { %s13_s16 = sadd.s32 1, %s696_s16   ;;  %s794_s12 = smov %s688_s14 }
 0x30c   : > { %p10_p7 = scmp.ge.s32.totalorder %s13_s16, 10   ;;  %s795_s13 = smov %s692_s15 }
 0x30d   : > { %s796_s14 = smov %s799_s17  ;;  %s797_s15 = smov %s803_s18 }
 0x30e   :  { %12 = sbr.rel (!%p10_p7) target bundleno = 3 (0x3), region = 68 }

// kernel: transformer_forward.30
= control target key start
LH: loop header
LB: loop body
LE: loop exit
PB: predicated region body
PF: predicated region fallthrough
CT: control target
= control target key end

     0   :  { %vm28_vm0 = vcmask 523264   ;;  %v338_v1 = vmov 0.0   ;;  %vm268_vm1 = vcmask 519168   ;;  %s441_s1 = inlined_call_operand.vmem [shape: bf16[64,64], index: 1, kind: input, shape index: {}]   ;;  %s442_s0 = inlined_call_operand.vmem [shape: bf16[32,64], index: 0, kind: input, shape index: {}]   ;;  %s443_s3 = inlined_call_operand.vmem [shape: bf16[32,64], index: 3, kind: input, shape index: {}]   ;;  %s444_s2 = inlined_call_operand.vmem [shape: f32[1,64], index: 2, kind: input, shape index: {}]   ;;  %s445_s4 = inlined_call_operand.vmem [shape: f32[1,64], index: 4, kind: input, shape index: {}]   ;;  %s446_s5 = inlined_call_operand.vmem [shape: f32[1,64], index: 5, kind: input, shape index: {}]   ;;  %s447_s6 = inlined_call_operand.vmem [shape: bf16[32,64], index: 6, kind: output, shape index: {}]  }
   0x1   :  { %v324_v0 = vld [vmem:[%s441_s1] sm:$0xff]   ;;  %31 = vst.msk [vmem:[#allocation2 + $0x10] sm:$0xff] %vm28_vm0, %v338_v1  ;;  %29 = vst.msk [vmem:[#allocation2] sm:$0xff] %vm28_vm0, %v338_v1  ;;  %v325_v2 = vld [vmem:[%s441_s1 + $0x8] sm:$0xff]  }
   0x2   :  { %30 = vst.msk [vmem:[#allocation2 + $0x8] sm:$0xff] %vm28_vm0, %v338_v1  ;;  %32 = vst.msk [vmem:[#allocation2 + $0x18] sm:$0xff] %vm28_vm0, %v338_v1  ;;  %311 = vmatprep.subr.bf16.mxu0 %v324_v0  ;;  %v326_v3 = vld [vmem:[%s441_s1 + $0x10] sm:$0xff]   ;;  %v328_v4 = vld [vmem:[%s442_s0] sm:$0xff]  }
   0x3   :  { %312 = vmatpush3.bf16.msra.mxu0 %v324_v0  ;;  %319 = vmatprep.mubr.msk.bf16.mxu0 %vm28_vm0, %v328_v4  ;;  %v327_v5 = vld [vmem:[%s441_s1 + $0x18] sm:$0xff]   ;;  %v329_v6 = vld [vmem:[%s442_s0 + $0x8] sm:$0xff]   ;;  %v297_v20 = vld [vmem:[%s443_s3] sm:$0xff]  }
   0x4   :  { %313 = vmatprep.subr.bf16.mxu0 %v325_v2  ;;  %v304_v19 = vld [vmem:[%s443_s3 + $0x8] sm:$0xff]   ;;  %v285_v21 = vld [vmem:[%s444_s2] ss:$0 sm:$0xff]  ;;  %v298_v24 = vunpack.c.l.bf16 %v297_v20  ;;  %v299_v30 = vunpack.c.h.bf16 %v297_v20 }
   0x5   :  { %v302_v22 = vunpack.c.l.bf16 %v304_v19  ;;  %v303_v27 = vunpack.c.h.bf16 %v304_v19 }
   0x7   :  { %314 = vmatpush3.bf16.msra.mxu0 %v325_v2 }
   0x8   :  { %315 = vmatprep.subr.bf16.mxu0 %v326_v3  ;;  %v35_v7 = vld [vmem:[#allocation2 + $0x10] sm:$0xff]  ;;  %v33_v8 = vld [vmem:[#allocation2] sm:$0xff] }
   0x9   :  { %v36_v10 = vld [vmem:[#allocation2 + $0x18] sm:$0xff]  ;;  %v34_v13 = vld [vmem:[#allocation2 + $0x8] sm:$0xff] }
   0xb   :  { %316 = vmatpush3.bf16.msra.mxu0 %v326_v3 }
   0xc   :  { %317 = vmatprep.subr.bf16.mxu0 %v327_v5 }
   0xf   :  { %318 = vmatpush3.bf16.msra.mxu0 %v327_v5 }
  0x12   :  { %320 = vmatmul.mubr.msk.bf16.vlgmr.msra.gmra.mrb[0].mxu0 %vm28_vm0, %v329_v6 }
  0xe5   :  { %v321_v9 = vpop.f32.mrb[0].mxu0 }
  0xe6   :  { %v141_v11 = vadd.f32 %v321_v9, %v35_v7  ;;  %v124_v12 = vpop.f32.mrb[1].mxu0 }
  0xe7   :  { %v139_v14 = vadd.f32 %v124_v12, %v33_v8  ;;  %v322_v15 = vpop.f32.mrb[2].mxu0 }
  0xe8   :  { %145 = vst.msk [vmem:[#allocation2 + $0x10] sm:$0xff] %vm28_vm0, %v141_v11  ;;  %v142_v16 = vadd.f32 %v322_v15, %v36_v10  ;;  %v127_v17 = vpop.f32.mrb[3].mxu0  ;;  %v286_v11 = vld [vmem:[%s445_s4] ss:$0 sm:$0xff] }
  0xe9   :  { %143 = vst.msk [vmem:[#allocation2] sm:$0xff] %vm28_vm0, %v139_v14  ;;  %v140_v18 = vadd.f32 %v127_v17, %v34_v13  ;;  %v287_v13 = vld [vmem:[%s446_s5] ss:$0 sm:$0xff] }
  0xea   :  { %146 = vst.msk [vmem:[#allocation2 + $0x18] sm:$0xff] %vm28_vm0, %v142_v16 }
  0xeb   :  { %144 = vst.msk [vmem:[#allocation2 + $0x8] sm:$0xff] %vm28_vm0, %v140_v18 }
  0xef   :  { %v152_v23 = vld [vmem:[#allocation2 + $0x10] sm:$0xff] }
  0xf0   :  { %v163_v25 = vadd.f32 %v285_v21, %v152_v23  ;;  %v150_v26 = vld [vmem:[#allocation2] sm:$0xff] }
  0xf1   :  { %v161_v28 = vadd.f32 %v285_v21, %v150_v26  ;;  %v153_v29 = vld [vmem:[#allocation2 + $0x18] sm:$0xff] }
  0xf2   :  { %v175_v31 = vadd.f32 %v302_v22, %v163_v25  ;;  %v164_v32 = vadd.f32 %v285_v21, %v153_v29  ;;  %v151_v33 = vld [vmem:[#allocation2 + $0x8] sm:$0xff] }
  0xf3   :  { %v173_v34 = vadd.f32 %v298_v24, %v161_v28  ;;  %v162_v35 = vadd.f32 %v285_v21, %v151_v33 }
  0xf4   :  { %v183_v36 = vsel %vm28_vm0, %v175_v31, 0.0  ;;  %v176_v37 = vadd.f32 %v303_v27, %v164_v32 }
  0xf5   :  { %184 = vadd.xlane.f32.xlu1 %v183_v36  ;;  %v177_v38 = vsel %vm28_vm0, %v173_v34, 0.0  ;;  %v174_v39 = vadd.f32 %v299_v30, %v162_v35 }
  0xf6   :  { %178 = vadd.xlane.f32.xlu0 %v177_v38  ;;  %v186_v40 = vsel %vm28_vm0, %v176_v37, 0.0 }
  0xf7   :  { %v180_v41 = vsel %vm28_vm0, %v174_v39, 0.0 }
  0xf9   :  { %187 = vadd.xlane.f32.xlu1 %v186_v40 }
  0xfa   :  { %181 = vadd.xlane.f32.xlu0 %v180_v41 }
 0x182   :  { %v185_v42 = vpop.xlane.xlu1 %184 }
 0x183   :  { %v192_v43 = vmul.f32 0.015625, %v185_v42  ;;  %v179_v44 = vpop.xlane.xlu0 %178 }
 0x184   :  { %v190_v45 = vmul.f32 0.015625, %v179_v44 }
 0x185   :  { %v196_v46 = vsub.f32 %v175_v31, %v192_v43 }
 0x186   :  { %v194_v47 = vsub.f32 %v173_v34, %v190_v45  ;;  %v188_v48 = vpop.xlane.xlu1 %187 }
 0x187   :  { %v193_v49 = vmul.f32 0.015625, %v188_v48  ;;  %v182_v50 = vpop.xlane.xlu0 %181  ;;  %v200_v56 = vmul.f32 %v196_v46, %v196_v46 }
 0x188   :  { %v191_v51 = vmul.f32 0.015625, %v182_v50  ;;  %v198_v52 = vmul.f32 %v194_v47, %v194_v47 }
 0x189   :  { %v197_v53 = vsub.f32 %v176_v37, %v193_v49  ;;  %v208_v58 = vsel %vm28_vm0, %v200_v56, 0.0 }
 0x18a   :  { %v195_v54 = vsub.f32 %v174_v39, %v191_v51  ;;  %v202_v55 = vsel %vm28_vm0, %v198_v52, 0.0 }
 0x18b   :  { %203 = vadd.xlane.f32.xlu0 %v202_v55  ;;  %v201_v60 = vmul.f32 %v197_v53, %v197_v53 }
 0x18c   :  { %v199_v57 = vmul.f32 %v195_v54, %v195_v54 }
 0x18d   :  { %v211_v61 = vsel %vm28_vm0, %v201_v60, 0.0 }
 0x18e   :  { %v205_v59 = vsel %vm28_vm0, %v199_v57, 0.0 }
 0x18f   :  { %209 = vadd.xlane.f32.xlu0 %v208_v58  ;;  %206 = vadd.xlane.f32.xlu1 %v205_v59 }
 0x193   :  { %212 = vadd.xlane.f32.xlu1 %v211_v61 }
 0x218   :  { %v204_v62 = vpop.xlane.xlu0 %203 }
 0x219   :  { %v214_v63 = vmul.f32 0.015625, %v204_v62 }
 0x21b   :  { %v218_v0 = vadd.f32 1e-05, %v214_v63 }
 0x21c   :  { %v207_v1 = vpop.xlane.xlu1 %206  ;;  %v210_v2 = vpop.xlane.xlu0 %209 }
 0x21d   :  { %330 = vrsqrt.f32 %v218_v0  ;;  %v215_v3 = vmul.f32 0.015625, %v207_v1  ;;  %v216_v4 = vmul.f32 0.015625, %v210_v2 }
 0x21f   :  { %v219_v5 = vadd.f32 1e-05, %v215_v3  ;;  %v220_v6 = vadd.f32 1e-05, %v216_v4 }
 0x220   :  { %v213_v7 = vpop.xlane.xlu1 %212 }
 0x221   :  { %332 = vrsqrt.f32 %v219_v5  ;;  %v217_v8 = vmul.f32 0.015625, %v213_v7 }
 0x222   :  { %334 = vrsqrt.f32 %v220_v6 }
 0x223   :  { %v221_v9 = vadd.f32 1e-05, %v217_v8 }
 0x225   :  { %336 = vrsqrt.f32 %v221_v9 }
 0x227   :  { %v331_v10 = vpop.eup %330 }
 0x228   :  { %v226_v12 = vmul.f32 %v331_v10, %v194_v47 }
 0x22a   :  { %v237_v14 = vmul.f32 %v286_v11, %v226_v12 }
 0x22b   :  { %v333_v15 = vpop.eup %332 }
 0x22c   :  { %v335_v16 = vpop.eup %334  ;;  %v248_v17 = vadd.f32 %v287_v13, %v237_v14  ;;  %v227_v18 = vmul.f32 %v333_v15, %v195_v54 }
 0x22d   :  { %v228_v19 = vmul.f32 %v335_v16, %v196_v46 }
 0x22e   :  { %v292_v20 = vpack.c.bf16 %v248_v17, %v248_v17  ;;  %v238_v21 = vmul.f32 %v286_v11, %v227_v18 }
 0x22f   :  { %v337_v22 = vpop.eup %336  ;;  %v239_v23 = vmul.f32 %v286_v11, %v228_v19 }
 0x230   :  { %269 = vst.msk [vmem:[%s447_s6] sm:$0xf] %vm268_vm1, %v292_v20  ;;  %v249_v24 = vadd.f32 %v287_v13, %v238_v21  ;;  %v229_v25 = vmul.f32 %v337_v22, %v197_v53 }
 0x231   :  { %v250_v26 = vadd.f32 %v287_v13, %v239_v23 }
 0x232   :  { %v293_v27 = vpack.c.bf16 %v249_v24, %v249_v24  ;;  %v240_v28 = vmul.f32 %v286_v11, %v229_v25 }
 0x233   :  { %v294_v29 = vpack.c.bf16 %v250_v26, %v250_v26 }
 0x234   :  { %270 = vst.msk [vmem:[%s447_s6 + $0x4] sm:$0xf] %vm268_vm1, %v293_v27  ;;  %v251_v30 = vadd.f32 %v287_v13, %v240_v28 }
 0x235   :  { %271 = vst.msk [vmem:[%s447_s6 + $0x8] sm:$0xf] %vm268_vm1, %v294_v29 }
 0x236   :  { %v295_v31 = vpack.c.bf16 %v251_v30, %v251_v30 }
 0x238   :  { %272 = vst.msk [vmem:[%s447_s6 + $0xc] sm:$0xf] %vm268_vm1, %v295_v31 }

// kernel: transformer_forward.41
= control target key start
LH: loop header
LB: loop body
LE: loop exit
PB: predicated region body
PF: predicated region fallthrough
CT: control target
= control target key end

     0   :  { %vm73_vm0 = vcmask 523264   ;;  %s278_s1 = inlined_call_operand.vmem [shape: bf16[64,128], index: 1, kind: input, shape index: {}]   ;;  %s279_s0 = inlined_call_operand.vmem [shape: bf16[32,64], index: 0, kind: input, shape index: {}]   ;;  %s280_s2 = inlined_call_operand.vmem [shape: f32[1,128], index: 2, kind: input, shape index: {}]   ;;  %s281_s3 = inlined_call_operand.vmem [shape: bf16[32,128], index: 3, kind: output, shape index: {}]  }
   0x1   :  { %v225_v0 = vld [vmem:[%s278_s1] sm:$0xff]   ;;  %v226_v1 = vld [vmem:[%s278_s1 + $0x8] sm:$0xff]   ;;  %v227_v2 = vld [vmem:[%s278_s1 + $0x10] sm:$0xff]  }
   0x2   :  { %213 = vmatprep.subr.bf16.mxu0 %v225_v0  ;;  %v229_v3 = vld [vmem:[%s279_s0] sm:$0xff]   ;;  %v228_v4 = vld [vmem:[%s278_s1 + $0x18] sm:$0xff]   ;;  %v230_v5 = vld [vmem:[%s279_s0 + $0x8] sm:$0xff]  }
   0x3   :  { %214 = vmatpush3.bf16.msra.mxu0 %v225_v0  ;;  %221 = vmatprep.mubr.msk.bf16.mxu0 %vm73_vm0, %v229_v3  ;;  %v187_v7 = vld [vmem:[%s280_s2] ss:$0 sm:$0xff] }
   0x4   :  { %215 = vmatprep.subr.bf16.mxu0 %v226_v1 }
   0x7   :  { %216 = vmatpush3.bf16.msra.mxu0 %v226_v1 }
   0x8   :  { %217 = vmatprep.subr.bf16.mxu0 %v227_v2 }
   0xb   :  { %218 = vmatpush3.bf16.msra.mxu0 %v227_v2 }
   0xc   :  { %219 = vmatprep.subr.bf16.mxu0 %v228_v4 }
   0xf   :  { %220 = vmatpush3.bf16.msra.mxu0 %v228_v4 }
  0x12   :  { %222 = vmatmul.mubr.msk.bf16.vlgmr.msra.gmra.mrb[0].mxu0 %vm73_vm0, %v230_v5 }
  0xe5   :  { %v223_v6 = vpop.f32.mrb[0].mxu0 }
  0xe6   :  { %v114_v8 = vpop.f32.mrb[1].mxu0  ;;  %v153_v10 = vadd.f32 %v223_v6, %v187_v7 }
  0xe7   :  { %v224_v9 = vpop.f32.mrb[2].mxu0  ;;  %v151_v13 = vadd.f32 %v187_v7, %v114_v8 }
  0xe8   :  { %v154_v11 = vadd.f32 %v224_v9, %v187_v7  ;;  %v117_v12 = vpop.f32.mrb[3].mxu0 }
  0xe9   :  { %v152_v14 = vadd.f32 %v187_v7, %v117_v12 }
  0xea   :  { %v204_v15 = vpack.c.bf16 %v154_v11, %v153_v10 }
  0xeb   :  { %v199_v16 = vpack.c.bf16 %v152_v14, %v151_v13 }
  0xec   :  { %206 = vst [vmem:[%s281_s3 + $0x8] sm:$0xff] %v204_v15  }
  0xed   :  { %200 = vst [vmem:[%s281_s3] sm:$0xff] %v199_v16  }

// kernel: transformer_forward.31
= control target key start
LH: loop header
LB: loop body
LE: loop exit
PB: predicated region body
PF: predicated region fallthrough
CT: control target
= control target key end

     0   :  { %vm80_vm0 = vcmask 523264   ;;  %vm361_vm1 = vcmask 519168   ;;  %s595_s1 = inlined_call_operand.vmem [shape: bf16[64,128], index: 1, kind: input, shape index: {}]   ;;  %s596_s0 = inlined_call_operand.vmem [shape: bf16[32,64], index: 0, kind: input, shape index: {}]   ;;  %s597_s3 = inlined_call_operand.vmem [shape: bf16[128,64], index: 3, kind: input, shape index: {}]   ;;  %s598_s2 = inlined_call_operand.vmem [shape: f32[1,128], index: 2, kind: input, shape index: {}]   ;;  %s599_s4 = inlined_call_operand.vmem [shape: f32[1,64], index: 4, kind: input, shape index: {}]   ;;  %s600_s5 = inlined_call_operand.vmem [shape: f32[1,64], index: 5, kind: input, shape index: {}]   ;;  %s601_s6 = inlined_call_operand.vmem [shape: f32[1,64], index: 6, kind: input, shape index: {}]   ;;  %s602_s7 = inlined_call_operand.vmem [shape: bf16[32,64], index: 7, kind: output, shape index: {}]  }
   0x1   :  { %v446_v0 = vld [vmem:[%s595_s1] sm:$0xff]   ;;  %v447_v1 = vld [vmem:[%s595_s1 + $0x8] sm:$0xff]   ;;  %v448_v2 = vld [vmem:[%s595_s1 + $0x10] sm:$0xff]  }
   0x2   :  { %414 = vmatprep.subr.bf16.mxu0 %v446_v0  ;;  %v522_v3 = vld [vmem:[%s596_s0] sm:$0xff]   ;;  %v453_v5 = vld [vmem:[%s597_s3 + $0x8] sm:$0xff]   ;;  %v449_v6 = vld [vmem:[%s595_s1 + $0x18] sm:$0xff]  }
   0x3   :  { %415 = vmatpush3.bf16.msra.mxu0 %v446_v0  ;;  %v452_v4 = vld [vmem:[%s597_s3] sm:$0xff]   ;;  %422 = vmatprep.mubr.msk.bf16.mxu0 %vm80_vm0, %v522_v3  ;;  %v29_v7 = vld [vmem:[%s596_s0 + $0x8] sm:$0xff]   ;;  %v454_v8 = vld [vmem:[%s597_s3 + $0x10] sm:$0xff]   ;;  %v262_v31 = vunpack.c.l.bf16 %v522_v3  ;;  %v263_v36 = vunpack.c.h.bf16 %v522_v3 }
   0x4   :  { %416 = vmatprep.subr.bf16.mxu0 %v447_v1  ;;  %426 = vmatprep.subr.bf16.mxu1 %v452_v4  ;;  %v455_v9 = vld [vmem:[%s597_s3 + $0x18] sm:$0xff]   ;;  %v456_v10 = vld [vmem:[%s597_s3 + $0x20] sm:$0xff]   ;;  %v457_v11 = vld [vmem:[%s597_s3 + $0x28] sm:$0xff]   ;;  %v264_v30 = vunpack.c.l.bf16 %v29_v7  ;;  %v265_v35 = vunpack.c.h.bf16 %v29_v7 }
   0x5   :  { %427 = vmatpush3.bf16.msra.mxu1 %v452_v4  ;;  %v458_v12 = vld [vmem:[%s597_s3 + $0x30] sm:$0xff]   ;;  %v459_v13 = vld [vmem:[%s597_s3 + $0x38] sm:$0xff]   ;;  %v370_v14 = vld [vmem:[%s598_s2] ss:$0 sm:$0xff] }
   0x6   :  { %428 = vmatprep.subr.bf16.mxu1 %v453_v5  ;;  %v379_v29 = vld [vmem:[%s599_s4] ss:$0 sm:$0xff] }
   0x7   :  { %417 = vmatpush3.bf16.msra.mxu0 %v447_v1 }
   0x8   :  { %418 = vmatprep.subr.bf16.mxu0 %v448_v2 }
   0x9   :  { %429 = vmatpush3.bf16.msra.mxu1 %v453_v5 }
   0xa   :  { %430 = vmatprep.subr.bf16.mxu1 %v454_v8 }
   0xb   :  { %419 = vmatpush3.bf16.msra.mxu0 %v448_v2 }
   0xc   :  { %420 = vmatprep.subr.bf16.mxu0 %v449_v6 }
   0xd   :  { %431 = vmatpush3.bf16.msra.mxu1 %v454_v8 }
   0xe   :  { %432 = vmatprep.subr.bf16.mxu1 %v455_v9 }
   0xf   :  { %421 = vmatpush3.bf16.msra.mxu0 %v449_v6 }
  0x11   :  { %433 = vmatpush3.bf16.msra.mxu1 %v455_v9 }
  0x12   :  { %423 = vmatmul.mubr.msk.bf16.vlgmr.msra.gmra.mrb[0].mxu0 %vm80_vm0, %v29_v7  ;;  %434 = vmatprep.subr.bf16.mxu1 %v456_v10 }
  0x15   :  { %435 = vmatpush3.bf16.msra.mxu1 %v456_v10 }
  0x16   :  { %436 = vmatprep.subr.bf16.mxu1 %v457_v11 }
  0x19   :  { %437 = vmatpush3.bf16.msra.mxu1 %v457_v11 }
  0x1a   :  { %438 = vmatprep.subr.bf16.mxu1 %v458_v12 }
  0x1d   :  { %439 = vmatpush3.bf16.msra.mxu1 %v458_v12 }
  0x1e   :  { %440 = vmatprep.subr.bf16.mxu1 %v459_v13 }
  0x21   :  { %441 = vmatpush3.bf16.msra.mxu1 %v459_v13 }
  0xe5   :  { %v424_v15 = vpop.f32.mrb[0].mxu0 }
  0xe6   :  { %v130_v16 = vadd.f32 %v424_v15, %v370_v14  ;;  %v121_v17 = vpop.f32.mrb[1].mxu0 }
  0xe7   :  { %v122_v18 = vadd.f32 %v370_v14, %v121_v17  ;;  %v425_v19 = vpop.f32.mrb[2].mxu0 }
  0xe8   :  { %v133_v20 = vadd.f32 %v425_v19, %v370_v14  ;;  %v124_v21 = vpop.f32.mrb[3].mxu0  ;;  %v138_v23 = vmax.f32 %v130_v16, 0.0  ;;  %v388_v19 = vld [vmem:[%s600_s5] ss:$0 sm:$0xff] }
  0xe9   :  { %v125_v22 = vadd.f32 %v370_v14, %v124_v21  ;;  %v136_v25 = vmax.f32 %v122_v18, 0.0  ;;  %v389_v21 = vld [vmem:[%s601_s6] ss:$0 sm:$0xff] }
  0xea   :  { %v139_v24 = vmax.f32 %v133_v20, 0.0 }
  0xeb   :  { %v137_v26 = vmax.f32 %v125_v22, 0.0 }
  0xec   :  { %v141_v27 = vpack.c.bf16 %v139_v24, %v138_v23 }
  0xed   :  { %v140_v28 = vpack.c.bf16 %v137_v26, %v136_v25 }
  0xef   :  { %442 = vmatprep.mubr.bf16.mxu1 %v140_v28 }
  0xf0   :  { %443 = vmatmul.mubr.bf16.vlgmr.msra.gmra.mrb[0].mxu1 %v141_v27 }
 0x1c3   :  { %v444_v32 = vpop.f32.mrb[0].mxu1 }
 0x1c4   :  { %v256_v33 = vadd.f32 %v444_v32, %v379_v29  ;;  %v247_v34 = vpop.f32.mrb[1].mxu1 }
 0x1c5   :  { %v248_v37 = vadd.f32 %v379_v29, %v247_v34  ;;  %v445_v38 = vpop.f32.mrb[2].mxu1 }
 0x1c6   :  { %v259_v39 = vadd.f32 %v445_v38, %v379_v29  ;;  %v250_v40 = vpop.f32.mrb[3].mxu1  ;;  %v268_v41 = vadd.f32 %v264_v30, %v256_v33 }
 0x1c7   :  { %v251_v42 = vadd.f32 %v379_v29, %v250_v40  ;;  %v266_v43 = vadd.f32 %v262_v31, %v248_v37 }
 0x1c8   :  { %v276_v44 = vsel %vm80_vm0, %v268_v41, 0.0  ;;  %v269_v45 = vadd.f32 %v265_v35, %v259_v39 }
 0x1c9   :  { %277 = vadd.xlane.f32.xlu1 %v276_v44  ;;  %v270_v46 = vsel %vm80_vm0, %v266_v43, 0.0  ;;  %v267_v47 = vadd.f32 %v263_v36, %v251_v42 }
 0x1ca   :  { %271 = vadd.xlane.f32.xlu0 %v270_v46  ;;  %v279_v48 = vsel %vm80_vm0, %v269_v45, 0.0 }
 0x1cb   :  { %v273_v49 = vsel %vm80_vm0, %v267_v47, 0.0 }
 0x1cd   :  { %280 = vadd.xlane.f32.xlu1 %v279_v48 }
 0x1ce   :  { %274 = vadd.xlane.f32.xlu0 %v273_v49 }
 0x256   :  { %v278_v50 = vpop.xlane.xlu1 %277 }
 0x257   :  { %v285_v51 = vmul.f32 0.015625, %v278_v50  ;;  %v272_v52 = vpop.xlane.xlu0 %271 }
 0x258   :  { %v283_v53 = vmul.f32 0.015625, %v272_v52 }
 0x259   :  { %v289_v54 = vsub.f32 %v268_v41, %v285_v51 }
 0x25a   :  { %v287_v55 = vsub.f32 %v266_v43, %v283_v53  ;;  %v281_v56 = vpop.xlane.xlu1 %280 }
 0x25b   :  { %v286_v57 = vmul.f32 0.015625, %v281_v56  ;;  %v275_v58 = vpop.xlane.xlu0 %274  ;;  %v293_v0 = vmul.f32 %v289_v54, %v289_v54 }
 0x25c   :  { %v284_v59 = vmul.f32 0.015625, %v275_v58  ;;  %v291_v60 = vmul.f32 %v287_v55, %v287_v55 }
 0x25d   :  { %v290_v61 = vsub.f32 %v269_v45, %v286_v57  ;;  %v301_v2 = vsel %vm80_vm0, %v293_v0, 0.0 }
 0x25e   :  { %v288_v62 = vsub.f32 %v267_v47, %v284_v59  ;;  %v295_v63 = vsel %vm80_vm0, %v291_v60, 0.0 }
 0x25f   :  { %296 = vadd.xlane.f32.xlu0 %v295_v63  ;;  %v294_v4 = vmul.f32 %v290_v61, %v290_v61 }
 0x260   :  { %v292_v1 = vmul.f32 %v288_v62, %v288_v62 }
 0x261   :  { %v304_v5 = vsel %vm80_vm0, %v294_v4, 0.0 }
 0x262   :  { %v298_v3 = vsel %vm80_vm0, %v292_v1, 0.0 }
 0x263   :  { %302 = vadd.xlane.f32.xlu0 %v301_v2  ;;  %299 = vadd.xlane.f32.xlu1 %v298_v3 }
 0x267   :  { %305 = vadd.xlane.f32.xlu1 %v304_v5 }
 0x2ec   :  { %v297_v6 = vpop.xlane.xlu0 %296 }
 0x2ed   :  { %v307_v7 = vmul.f32 0.015625, %v297_v6 }
 0x2ef   :  { %v311_v8 = vadd.f32 1e-05, %v307_v7 }
 0x2f0   :  { %v300_v9 = vpop.xlane.xlu1 %299  ;;  %v303_v10 = vpop.xlane.xlu0 %302 }
 0x2f1   :  { %462 = vrsqrt.f32 %v311_v8  ;;  %v308_v11 = vmul.f32 0.015625, %v300_v9  ;;  %v309_v12 = vmul.f32 0.015625, %v303_v10 }
 0x2f3   :  { %v312_v13 = vadd.f32 1e-05, %v308_v11  ;;  %v313_v14 = vadd.f32 1e-05, %v309_v12 }
 0x2f4   :  { %v306_v15 = vpop.xlane.xlu1 %305 }
 0x2f5   :  { %464 = vrsqrt.f32 %v312_v13  ;;  %v310_v16 = vmul.f32 0.015625, %v306_v15 }
 0x2f6   :  { %466 = vrsqrt.f32 %v313_v14 }
 0x2f7   :  { %v314_v17 = vadd.f32 1e-05, %v310_v16 }
 0x2f9   :  { %468 = vrsqrt.f32 %v314_v17 }
 0x2fb   :  { %v463_v18 = vpop.eup %462 }
 0x2fc   :  { %v319_v20 = vmul.f32 %v463_v18, %v287_v55 }
 0x2fe   :  { %v330_v22 = vmul.f32 %v388_v19, %v319_v20 }
 0x2ff   :  { %v465_v23 = vpop.eup %464 }
 0x300   :  { %v467_v24 = vpop.eup %466  ;;  %v341_v25 = vadd.f32 %v389_v21, %v330_v22  ;;  %v320_v26 = vmul.f32 %v465_v23, %v288_v62 }
 0x301   :  { %v321_v27 = vmul.f32 %v467_v24, %v289_v54 }
 0x302   :  { %v394_v28 = vpack.c.bf16 %v341_v25, %v341_v25  ;;  %v331_v29 = vmul.f32 %v388_v19, %v320_v26 }
 0x303   :  { %v469_v30 = vpop.eup %468  ;;  %v332_v31 = vmul.f32 %v388_v19, %v321_v27 }
 0x304   :  { %362 = vst.msk [vmem:[%s602_s7] sm:$0xf] %vm361_vm1, %v394_v28  ;;  %v342_v32 = vadd.f32 %v389_v21, %v331_v29  ;;  %v322_v33 = vmul.f32 %v469_v30, %v290_v61 }
 0x305   :  { %v343_v34 = vadd.f32 %v389_v21, %v332_v31 }
 0x306   :  { %v395_v35 = vpack.c.bf16 %v342_v32, %v342_v32  ;;  %v333_v36 = vmul.f32 %v388_v19, %v322_v33 }
 0x307   :  { %v396_v37 = vpack.c.bf16 %v343_v34, %v343_v34 }
 0x308   :  { %363 = vst.msk [vmem:[%s602_s7 + $0x4] sm:$0xf] %vm361_vm1, %v395_v35  ;;  %v344_v38 = vadd.f32 %v389_v21, %v333_v36 }
 0x309   :  { %364 = vst.msk [vmem:[%s602_s7 + $0x8] sm:$0xf] %vm361_vm1, %v396_v37 }
 0x30a   :  { %v397_v39 = vpack.c.bf16 %v344_v38, %v344_v38 }
 0x30c   :  { %365 = vst.msk [vmem:[%s602_s7 + $0xc] sm:$0xf] %vm361_vm1, %v397_v39 }

// kernel: transformer_forward.36
= control target key start
LH: loop header
LB: loop body
LE: loop exit
PB: predicated region body
PF: predicated region fallthrough
CT: control target
= control target key end

     0   :  { %vm19_vm0 = vcmask 523264   ;;  %v138_v0 = vmov 0.0   ;;  %vm139_vm1 = vmmov 0   ;;  %vm39_vm2 = vcmask 130048   ;;  %s179_s1 = inlined_call_operand.vmem [shape: bf16[16,64], index: 1, kind: input, shape index: {}]   ;;  %s180_s0 = inlined_call_operand.vmem [shape: bf16[16,16], index: 0, kind: input, shape index: {}]   ;;  %s181_s2 = inlined_call_operand.vmem [shape: f32[1,64], index: 2, kind: input, shape index: {}]   ;;  %s182_s3 = inlined_call_operand.vmem [shape: bf16[16,64], index: 3, kind: output, shape index: {}]  }
   0x1   :  { %20 = vst.msk [vmem:[#allocation2] sm:$0xff] %vm19_vm0, %v138_v0  ;;  %21 = vst.msk [vmem:[#allocation2 + $0x8] sm:$0xff] %vm19_vm0, %v138_v0  ;;  %128 = vmatprep.subr.bf16.mxu0 %v138_v0  ;;  %v136_v1 = vld [vmem:[%s179_s1] sm:$0xff]   ;;  %130 = vmatprep.mubr.msk.bf16.mxu0 %vm139_vm1, %v138_v0  ;;  %vm111_vm3 = vcmask 519168  }
   0x2   :  { %v137_v2 = vld [vmem:[%s180_s0] sm:$0xff]   ;;  %129 = vmatpush3.bf16.msra.mxu0 %v136_v1 }
   0x3   :  { %v121_v11 = vld [vmem:[%s181_s2] ss:$0 sm:$0xff] }
   0x5   :  { %131 = vmatmul.mubr.msk.bf16.vlgmr.msra.gmra.mrb[0].mxu0 %vm39_vm2, %v137_v2 }
   0x8   :  { %v22_v3 = vld [vmem:[#allocation2] sm:$0xff]  ;;  %v23_v5 = vld [vmem:[#allocation2 + $0x8] sm:$0xff] }
  0xd8   :  { %v77_v4 = vpop.f32.mrb[0].mxu0 }
  0xd9   :  { %v84_v6 = vadd.f32 %v77_v4, %v22_v3  ;;  %v132_v7 = vpop.f32.mrb[1].mxu0 }
  0xda   :  { %v80_v8 = vpop.f32.mrb[2].mxu0 }
  0xdb   :  { %87 = vst.msk [vmem:[#allocation2] sm:$0xff] %vm19_vm0, %v84_v6  ;;  %v85_v9 = vadd.f32 %v80_v8, %v23_v5  ;;  %v133_v10 = vpop.f32.mrb[3].mxu0 }
  0xdd   :  { %88 = vst.msk [vmem:[#allocation2 + $0x8] sm:$0xff] %vm19_vm0, %v85_v9 }
  0xe2   :  { %v92_v12 = vld [vmem:[#allocation2] sm:$0xff] }
  0xe3   :  { %v101_v13 = vadd.f32 %v121_v11, %v92_v12 }
  0xe4   :  { %v93_v14 = vld [vmem:[#allocation2 + $0x8] sm:$0xff] }
  0xe5   :  { %v124_v15 = vpack.c.bf16 %v101_v13, %v101_v13  ;;  %v102_v16 = vadd.f32 %v121_v11, %v93_v14 }
  0xe7   :  { %112 = vst.msk [vmem:[%s182_s3] sm:$0xf] %vm111_vm3, %v124_v15  ;;  %v125_v17 = vpack.c.bf16 %v102_v16, %v102_v16 }
  0xe9   :  { %113 = vst.msk [vmem:[%s182_s3 + $0x4] sm:$0xf] %vm111_vm3, %v125_v17 }

// kernel: transformer_forward.37
= control target key start
LH: loop header
LB: loop body
LE: loop exit
PB: predicated region body
PF: predicated region fallthrough
CT: control target
= control target key end

     0   :  { %vm20_vm0 = vcmask 523264   ;;  %v211_v1 = vmov 0   ;;  %v212_v2 = vmov 0.0   ;;  %v147_v11 = vlaneseq  ;;  %s274_s1 = inlined_call_operand.vmem [shape: bf16[64,192], index: 1, kind: input, shape index: {}]   ;;  %s275_s0 = inlined_call_operand.vmem [shape: bf16[16,64], index: 0, kind: input, shape index: {}]   ;;  %s276_s2 = inlined_call_operand.vmem [shape: f32[1,192], index: 2, kind: input, shape index: {}]   ;;  %s277_s3 = inlined_call_operand.vmem [shape: bf16[16,192], index: 3, kind: output, shape index: {}]  }
   0x1   :  { %v198_v0 = vld [vmem:[%s274_s1 + $0x4] ss:$8 sps:$4 sm:$0xff]   ;;  %119 = vmatprep.mubr.bf16.mxu0 %v211_v1  ;;  %21 = vst.msk [vmem:[#allocation2 + $0x8] sm:$0xff] %vm20_vm0, %v212_v2  ;;  %23 = vst.msk [vmem:[#allocation2 + $0x18] sm:$0xff] %vm20_vm0, %v212_v2  ;;  %v200_v3 = vld [vmem:[%s274_s1] ss:$8 sps:$4 sm:$0xff]  }
   0x2   :  { %87 = vmatprep.subr.bf16.mxu0 %v198_v0  ;;  %v201_v4 = vld [vmem:[%s274_s1 + $0x14] ss:$8 sps:$4 sm:$0xff]   ;;  %v203_v5 = vld [vmem:[%s274_s1 + $0x10] ss:$8 sps:$4 sm:$0xff]   ;;  %v204_v6 = vld [vmem:[%s274_s1 + $0x24] ss:$8 sps:$4 sm:$0xff]  }
   0x3   :  { %88 = vmatpush1.bf16.msra.mxu0 %v200_v3  ;;  %v206_v7 = vld [vmem:[%s274_s1 + $0x20] ss:$8 sps:$4 sm:$0xff]   ;;  %v207_v8 = vld [vmem:[%s274_s1 + $0x34] ss:$8 sps:$4 sm:$0xff]   ;;  %v209_v9 = vld [vmem:[%s274_s1 + $0x30] ss:$8 sps:$4 sm:$0xff]  }
   0x4   :  { %89 = vmatprep.subr.bf16.mxu0 %v201_v4  ;;  %v210_v10 = vld [vmem:[%s275_s0] sm:$0xff]   ;;  %v148_v14 = vshrl.u32 %v147_v11, 7  ;;  %vm173_vm1 = vcmask 1043456   ;;  %vm174_vm2 = vcmask 523268  }
   0x5   :  { %v145_v23 = vld [vmem:[%s276_s2] sm:$0x3]  ;;  %vm175_vm3 = vmor %vm174_vm2, %vm173_vm1 }
   0x6   :  { %v149_v20 = vsub.s32 0, %v148_v14  ;;  %v153_v21 = vsub.s32 1, %v148_v14 }
   0x7   :  { %90 = vmatpush1.bf16.msra.mxu0 %v203_v5 }
   0x8   :  { %91 = vmatprep.subr.bf16.mxu0 %v204_v6  ;;  %v25_v12 = vld [vmem:[#allocation2 + $0x8] sm:$0xff]  ;;  %v27_v16 = vld [vmem:[#allocation2 + $0x18] sm:$0xff]  ;;  %v150_v24 = vrot.slane %v145_v23, %v149_v20  ;;  %v154_v25 = vrot.slane %v145_v23, %v153_v21 }
   0xb   :  { %92 = vmatpush1.bf16.msra.mxu0 %v206_v7 }
   0xc   :  { %93 = vmatprep.subr.bf16.mxu0 %v207_v8 }
   0xf   :  { %94 = vmatpush1.bf16.msra.mxu0 %v209_v9 }
  0x12   :  { %191 = vmatmul.mubr.msk.bf16.vlgmr.msra.gmra.mrb[0].mxu0 %vm20_vm0, %v210_v10 }
  0xe5   :  { %v121_v13 = vpop.f32.mrb[0].mxu0 }
  0xe6   :  { %v123_v15 = vpop.f32.mrb[1].mxu0  ;;  %v157_v27 = vadd.f32 %v150_v24, %v121_v13 }
  0xe7   :  { %v131_v17 = vadd.f32 %v123_v15, %v25_v12  ;;  %v125_v18 = vpop.f32.mrb[2].mxu0 }
  0xe8   :  { %v127_v19 = vpop.f32.mrb[3].mxu0  ;;  %v159_v31 = vadd.f32 %v150_v24, %v125_v18 }
  0xe9   :  { %135 = vst.msk [vmem:[#allocation2 + $0x8] sm:$0xff] %vm20_vm0, %v131_v17  ;;  %v133_v22 = vadd.f32 %v127_v19, %v27_v16 }
  0xeb   :  { %137 = vst.msk [vmem:[#allocation2 + $0x18] sm:$0xff] %vm20_vm0, %v133_v22 }
  0xf0   :  { %v142_v26 = vld [vmem:[#allocation2 + $0x8] sm:$0xff] }
  0xf1   :  { %v158_v28 = vadd.f32 %v154_v25, %v142_v26 }
  0xf2   :  { %v144_v29 = vld [vmem:[#allocation2 + $0x18] sm:$0xff] }
  0xf3   :  { %v194_v30 = vpack.c.bf16 %v158_v28, %v157_v27  ;;  %v160_v32 = vadd.f32 %v154_v25, %v144_v29 }
  0xf5   :  { %176 = vst.msk [vmem:[%s277_s3] sm:$0xff] %vm175_vm3, %v194_v30  ;;  %v195_v33 = vpack.c.bf16 %v160_v32, %v159_v31 }
  0xf7   :  { %177 = vst.msk [vmem:[%s277_s3 + $0x8] sm:$0xff] %vm175_vm3, %v195_v33 }

// kernel: transformer_forward.38
= control target key start
LH: loop header
LB: loop body
LE: loop exit
PB: predicated region body
PF: predicated region fallthrough
CT: control target
= control target key end

     0   :  { %s641_s12 = smov 0   ;;  %s643_s13 = smov 0   ;;  %s707_s0 = inlined_call_operand.vmem [shape: bf16[2,4,8,16], index: 0, kind: input, shape index: {}]   ;;  %s708_s1 = inlined_call_operand.vmem [shape: bf16[2,4,8,16], index: 1, kind: input, shape index: {}]   ;;  %s709_s2 = inlined_call_operand.vmem [shape: bf16[2,4,8,16], index: 2, kind: input, shape index: {}]   ;;  %s710_s3 = inlined_call_operand.vmem [shape: bf16[2,4,8,16], index: 3, kind: output, shape index: {}]  }
   0x1   :  { %s645_s14 = smov 0   ;;  %s647_s15 = smov 0  }
   0x2   :  { %s649_s16 = smov 0  }
   0x3 LB: > { %s22_s17 = sadd.s32 1, %s609_s14  ;;  %s25_s18 = sadd.s32 1, %s613_s15  ;;  %s617_s16 = sphi %s649_s16, %s13_s16   ;;  %s613_s15 = sphi %s647_s15, %s714_s15   ;;  %s609_s14 = sphi %s645_s14, %s713_s14   ;;  %s605_s13 = sphi %s643_s13, %s712_s13   ;;  %s601_s12 = sphi %s641_s12, %s711_s12  }
   0x4   : > { %p23_p0 = scmp.ge.s32.totalorder %s22_s17, 4  ;;  %p504_p1 = scmp.ge.s32.totalorder %s617_s16, 1 }
   0x5   : > { %p186_p2 = scmp.lt.s32.totalorder %s617_s16, 9 }
   0x6   : > { %s716_s17 = smov (%p23_p0, %s22_s17), 0  ;;  %s718_s18 = smov (!%p23_p0, %s25_s18), %s613_s15 }
   0x7   : > { %p187_p3 = pnand %p504_p1, %p186_p2  ;;  %p27_p4 = scmp.ge.s32.totalorder %s718_s18, 2 }
   0x8   : > { %p232_p5 = scmp.lt.s32.totalorder (!%p187_p3), %s605_s13, 1  ;;  %p234_p6 = scmp.lt.s32.totalorder (!%p187_p3), %s601_s12, 3  ;;  %v619_v0 = vmov (!%p187_p3), 0.0   ;;  %vm620_vm0 = vmmov (!%p187_p3), 0   ;;  %vm268_vm1 = vcmask (!%p187_p3), 130048   ;;  %vm315_vm2 = vcmask (!%p187_p3), 64512  }
   0x9   : > { %s720_s18 = smov (%p27_p4, %s718_s18), 0  ;;  %190 = sbr.rel (%p187_p3) target bundleno = 773 (0x305), region = 32 }
   0xa   : > { %521 = vmatprep.subr.bf16.mxu0 (!%p187_p3), %v619_v0  ;;  %523 = vmatprep.mubr.msk.bf16.mxu0 (!%p187_p3), %vm620_vm0, %v619_v0  ;;  %vm331_vm3 = vcmask (!%p187_p3), 1043456   ;;  %vm376_vm4 = vcmask (!%p187_p3), 125952  }
   0xb   : > { %527 = vmatprep.subr.bf16.mxu1 (!%p187_p3), %v619_v0  ;;  %529 = vmatprep.mubr.msk.bf16.mxu1 (!%p187_p3), %vm620_vm0, %v619_v0 }
  0x10   : > { %s722_s13 = smov (!%p232_p5, %s605_s13), 1  ;;  %s724_s12 = smov (!%p234_p6, %s601_s12), 3 }
  0x11   : > { %s505_s19 = sshll.u32 %s722_s13, 2 }
  0x12   : > { %s237_s20 = sadd.s32 %s505_s19, %s724_s12 }
  0x13   : > { %s671_s21 = sshll.u32 %s237_s20, 2 }
  0x14   : > { %s247_s24 = scalar_lea.vmem %s708_s1, %s671_s21  ;;  %s239_s27 = scalar_lea.vmem %s707_s0, %s671_s21 }
  0x15   : > { %v266_v1 = vld [vmem:[%s247_s24] sm:$0xf]  ;;  %s255_s30 = scalar_lea.vmem %s709_s2, %s671_s21  ;;  %s263_s6 = scalar_lea.vmem %s710_s3, %s671_s21 }
  0x16   : > { %v273_v2 = vsel %vm268_vm1, %v266_v1, 0  ;;  %v265_v3 = vld [vmem:[%s239_s27] sm:$0xf] }
  0x17   : > { %522 = vmatpush3.bf16.xpose.msra.mxu0 %v273_v2  ;;  %v267_v14 = vld [vmem:[%s255_s30] sm:$0xf] }
  0x18   : > { %v333_v15 = vsel %vm331_vm3, %v267_v14, 0 }
  0x19   : > { %528 = vmatpush3.bf16.msra.mxu1 %v333_v15 }
  0x1e   : > { %524 = vmatmul.mubr.msk.bf16.vlgmr.msra.gmra.mrb[0].mxu0 %vm268_vm1, %v265_v3 }
  0xf1   : > { %v309_v4 = vpop.f32.mrb[0].mxu0 }
  0xf2   : > { %v525_v5 = vpop.f32.mrb[1].mxu0  ;;  %v316_v6 = vsel %vm315_vm2, %v309_v4, -inf }
  0xf3   : > { %317 = vmax.xlane.f32.xlu0 %v316_v6  ;;  %v312_v7 = vpop.f32.mrb[2].mxu0 }
  0xf4   : > { %v526_v8 = vpop.f32.mrb[3].mxu0 }
 0x180   : > { %v318_v9 = vpop.xlane.xlu0 %317 }
 0x181   : > { %v319_v10 = vsub.f32 %v309_v4, %v318_v9 }
 0x183   : > { %v320_v11 = vmul.f32 1.442695, %v319_v10 }
 0x185   : > { %575 = vpow2.f32 %v320_v11 }
 0x18f   : > { %v576_v12 = vpop.eup %575 }
 0x190   : > { %v322_v13 = vsel %vm315_vm2, %v576_v12, 0.0 }
 0x191   : > { %323 = vadd.xlane.f32.xlu0 %v322_v13 }
 0x21e   : > { %v324_v16 = vpop.xlane.xlu0 %323 }
 0x21f   : > { %577 = vrcp.f32 %v324_v16 }
 0x229   : > { %v578_v17 = vpop.eup %577 }
 0x22a   : > { %v326_v18 = vmul.f32 %v578_v17, %v576_v12 }
 0x22c   : > { %v327_v19 = vpack.c.bf16 %v326_v18, %v326_v18 }
 0x22e   : > { %530 = vmatmul.mubr.msk.bf16.vlgmr.msra.gmra.mrb[0].mxu1 %vm315_vm2, %v327_v19 }
 0x301   : > { %v369_v20 = vpop.f32.mrb[0].mxu1 }
 0x302   : > { %v375_v21 = vpack.c.bf16 %v369_v20, %v369_v20  ;;  %v531_v22 = vpop.f32.mrb[1].mxu1 }
 0x303   : > { %v372_v23 = vpop.f32.mrb[2].mxu1 }
 0x304   : > { %377 = vst.msk [vmem:[%s263_s6] sm:$0xf] %vm376_vm4, %v375_v21  ;;  %v532_v24 = vpop.f32.mrb[3].mxu1 }
 0x305 PF: > { %s13_s16 = sadd.s32 1, %s617_s16   ;;  %s711_s12 = smov %s609_s14 }
 0x306   : > { %p10_p7 = scmp.ge.s32.totalorder %s13_s16, 10   ;;  %s712_s13 = smov %s613_s15 }
 0x307   : > { %s713_s14 = smov %s716_s17  ;;  %s714_s15 = smov %s720_s18 }
 0x308   :  { %12 = sbr.rel (!%p10_p7) target bundleno = 3 (0x3), region = 68 }

// kernel: transformer_forward.40
= control target key start
LH: loop header
LB: loop body
LE: loop exit
PB: predicated region body
PF: predicated region fallthrough
CT: control target
= control target key end

     0   :  { %vm19_vm0 = vcmask 523264   ;;  %v176_v0 = vmov 0.0   ;;  %vm177_vm1 = vmmov 0   ;;  %vm134_vm2 = vcmask 519168   ;;  %s227_s1 = inlined_call_operand.vmem [shape: bf16[64,64], index: 1, kind: input, shape index: {}]   ;;  %s228_s0 = inlined_call_operand.vmem [shape: bf16[16,64], index: 0, kind: input, shape index: {}]   ;;  %s229_s2 = inlined_call_operand.vmem [shape: f32[1,64], index: 2, kind: input, shape index: {}]   ;;  %s230_s3 = inlined_call_operand.vmem [shape: bf16[16,64], index: 3, kind: output, shape index: {}]  }
   0x1   :  { %157 = vmatprep.subr.bf16.mxu0 %v176_v0  ;;  %v171_v1 = vld [vmem:[%s227_s1] sm:$0xff]   ;;  %165 = vmatprep.mubr.msk.bf16.mxu0 %vm177_vm1, %v176_v0  ;;  %20 = vst.msk [vmem:[#allocation2] sm:$0xff] %vm19_vm0, %v176_v0  ;;  %21 = vst.msk [vmem:[#allocation2 + $0x8] sm:$0xff] %vm19_vm0, %v176_v0  ;;  %v172_v2 = vld [vmem:[%s227_s1 + $0x8] sm:$0xff]  }
   0x2   :  { %158 = vmatpush3.bf16.msra.mxu0 %v171_v1  ;;  %v173_v3 = vld [vmem:[%s227_s1 + $0x10] sm:$0xff]   ;;  %v174_v4 = vld [vmem:[%s227_s1 + $0x18] sm:$0xff]   ;;  %v175_v5 = vld [vmem:[%s228_s0] sm:$0xff]  }
   0x3   :  { %159 = vmatprep.subr.bf16.mxu0 %v176_v0  ;;  %v147_v14 = vld [vmem:[%s229_s2] ss:$0 sm:$0xff] }
   0x6   :  { %160 = vmatpush3.bf16.msra.mxu0 %v172_v2 }
   0x7   :  { %161 = vmatprep.subr.bf16.mxu0 %v176_v0 }
   0x8   :  { %v22_v6 = vld [vmem:[#allocation2] sm:$0xff]  ;;  %v23_v8 = vld [vmem:[#allocation2 + $0x8] sm:$0xff] }
   0xa   :  { %162 = vmatpush3.bf16.msra.mxu0 %v173_v3 }
   0xb   :  { %163 = vmatprep.subr.bf16.mxu0 %v176_v0 }
   0xe   :  { %164 = vmatpush3.bf16.msra.mxu0 %v174_v4 }
  0x11   :  { %166 = vmatmul.mubr.msk.bf16.vlgmr.msra.gmra.mrb[0].mxu0 %vm19_vm0, %v175_v5 }
  0xe4   :  { %v101_v7 = vpop.f32.mrb[0].mxu0 }
  0xe5   :  { %v108_v9 = vadd.f32 %v101_v7, %v22_v6  ;;  %v167_v10 = vpop.f32.mrb[1].mxu0 }
  0xe6   :  { %v104_v11 = vpop.f32.mrb[2].mxu0 }
  0xe7   :  { %110 = vst.msk [vmem:[#allocation2] sm:$0xff] %vm19_vm0, %v108_v9  ;;  %v109_v12 = vadd.f32 %v104_v11, %v23_v8  ;;  %v168_v13 = vpop.f32.mrb[3].mxu0 }
  0xe9   :  { %111 = vst.msk [vmem:[#allocation2 + $0x8] sm:$0xff] %vm19_vm0, %v109_v12 }
  0xee   :  { %v115_v15 = vld [vmem:[#allocation2] sm:$0xff] }
  0xef   :  { %v124_v16 = vadd.f32 %v147_v14, %v115_v15 }
  0xf0   :  { %v116_v17 = vld [vmem:[#allocation2 + $0x8] sm:$0xff] }
  0xf1   :  { %v150_v18 = vpack.c.bf16 %v124_v16, %v124_v16  ;;  %v125_v19 = vadd.f32 %v147_v14, %v116_v17 }
  0xf3   :  { %135 = vst.msk [vmem:[%s230_s3] sm:$0xf] %vm134_vm2, %v150_v18  ;;  %v151_v20 = vpack.c.bf16 %v125_v19, %v125_v19 }
  0xf5   :  { %136 = vst.msk [vmem:[%s230_s3 + $0x4] sm:$0xf] %vm134_vm2, %v151_v20 }

// kernel: transformer_forward.39
= control target key start
LH: loop header
LB: loop body
LE: loop exit
PB: predicated region body
PF: predicated region fallthrough
CT: control target
= control target key end

     0   :  { %vm28_vm0 = vcmask 523264   ;;  %v246_v0 = vmov 0.0   ;;  %vm247_vm1 = vmmov 0   ;;  %vm194_vm2 = vcmask 519168   ;;  %s325_s1 = inlined_call_operand.vmem [shape: bf16[64,64], index: 1, kind: input, shape index: {}]   ;;  %s326_s0 = inlined_call_operand.vmem [shape: bf16[16,64], index: 0, kind: input, shape index: {}]   ;;  %s327_s3 = inlined_call_operand.vmem [shape: bf16[16,64], index: 3, kind: input, shape index: {}]   ;;  %s328_s2 = inlined_call_operand.vmem [shape: f32[1,64], index: 2, kind: input, shape index: {}]   ;;  %s329_s4 = inlined_call_operand.vmem [shape: f32[1,64], index: 4, kind: input, shape index: {}]   ;;  %s330_s5 = inlined_call_operand.vmem [shape: f32[1,64], index: 5, kind: input, shape index: {}]   ;;  %s331_s6 = inlined_call_operand.vmem [shape: bf16[16,64], index: 6, kind: output, shape index: {}]  }
   0x1   :  { %223 = vmatprep.subr.bf16.mxu0 %v246_v0  ;;  %v237_v1 = vld [vmem:[%s325_s1] sm:$0xff]   ;;  %231 = vmatprep.mubr.msk.bf16.mxu0 %vm247_vm1, %v246_v0  ;;  %29 = vst.msk [vmem:[#allocation2] sm:$0xff] %vm28_vm0, %v246_v0  ;;  %30 = vst.msk [vmem:[#allocation2 + $0x8] sm:$0xff] %vm28_vm0, %v246_v0  ;;  %v238_v2 = vld [vmem:[%s325_s1 + $0x8] sm:$0xff]  }
   0x2   :  { %224 = vmatpush3.bf16.msra.mxu0 %v237_v1  ;;  %v239_v3 = vld [vmem:[%s325_s1 + $0x10] sm:$0xff]   ;;  %v240_v4 = vld [vmem:[%s325_s1 + $0x18] sm:$0xff]   ;;  %v241_v5 = vld [vmem:[%s326_s0] sm:$0xff]  }
   0x3   :  { %225 = vmatprep.subr.bf16.mxu0 %v246_v0  ;;  %v215_v14 = vld [vmem:[%s327_s3] sm:$0xff]  }
   0x4   :  { %v207_v15 = vld [vmem:[%s328_s2] ss:$0 sm:$0xff]  ;;  %v216_v16 = vunpack.c.l.bf16 %v215_v14  ;;  %v217_v19 = vunpack.c.h.bf16 %v215_v14 }
   0x5   :  { %v208_v43 = vld [vmem:[%s329_s4] ss:$0 sm:$0xff] }
   0x6   :  { %226 = vmatpush3.bf16.msra.mxu0 %v238_v2  ;;  %v209_v45 = vld [vmem:[%s330_s5] ss:$0 sm:$0xff] }
   0x7   :  { %227 = vmatprep.subr.bf16.mxu0 %v246_v0 }
   0x8   :  { %v31_v6 = vld [vmem:[#allocation2] sm:$0xff]  ;;  %v32_v8 = vld [vmem:[#allocation2 + $0x8] sm:$0xff] }
   0xa   :  { %228 = vmatpush3.bf16.msra.mxu0 %v239_v3 }
   0xb   :  { %229 = vmatprep.subr.bf16.mxu0 %v246_v0 }
   0xe   :  { %230 = vmatpush3.bf16.msra.mxu0 %v240_v4 }
  0x11   :  { %232 = vmatmul.mubr.msk.bf16.vlgmr.msra.gmra.mrb[0].mxu0 %vm28_vm0, %v241_v5 }
  0xe4   :  { %v110_v7 = vpop.f32.mrb[0].mxu0 }
  0xe5   :  { %v117_v9 = vadd.f32 %v110_v7, %v31_v6  ;;  %v233_v10 = vpop.f32.mrb[1].mxu0 }
  0xe6   :  { %v113_v11 = vpop.f32.mrb[2].mxu0 }
  0xe7   :  { %119 = vst.msk [vmem:[#allocation2] sm:$0xff] %vm28_vm0, %v117_v9  ;;  %v118_v12 = vadd.f32 %v113_v11, %v32_v8  ;;  %v234_v13 = vpop.f32.mrb[3].mxu0 }
  0xe9   :  { %120 = vst.msk [vmem:[#allocation2 + $0x8] sm:$0xff] %vm28_vm0, %v118_v12 }
  0xee   :  { %v124_v17 = vld [vmem:[#allocation2] sm:$0xff] }
  0xef   :  { %v133_v18 = vadd.f32 %v207_v15, %v124_v17 }
  0xf0   :  { %v125_v20 = vld [vmem:[#allocation2 + $0x8] sm:$0xff] }
  0xf1   :  { %v139_v21 = vadd.f32 %v216_v16, %v133_v18  ;;  %v134_v22 = vadd.f32 %v207_v15, %v125_v20 }
  0xf3   :  { %v141_v23 = vsel %vm28_vm0, %v139_v21, 0.0  ;;  %v140_v24 = vadd.f32 %v217_v19, %v134_v22 }
  0xf4   :  { %142 = vadd.xlane.f32.xlu0 %v141_v23 }
  0xf5   :  { %v144_v25 = vsel %vm28_vm0, %v140_v24, 0.0 }
  0xf8   :  { %145 = vadd.xlane.f32.xlu0 %v144_v25 }
 0x181   :  { %v143_v26 = vpop.xlane.xlu0 %142 }
 0x182   :  { %v148_v27 = vmul.f32 0.015625, %v143_v26 }
 0x184   :  { %v150_v28 = vsub.f32 %v139_v21, %v148_v27 }
 0x185   :  { %v146_v29 = vpop.xlane.xlu0 %145 }
 0x186   :  { %v149_v30 = vmul.f32 0.015625, %v146_v29  ;;  %v152_v31 = vmul.f32 %v150_v28, %v150_v28 }
 0x188   :  { %v151_v32 = vsub.f32 %v140_v24, %v149_v30  ;;  %v154_v33 = vsel %vm28_vm0, %v152_v31, 0.0 }
 0x189   :  { %155 = vadd.xlane.f32.xlu1 %v154_v33 }
 0x18a   :  { %v153_v34 = vmul.f32 %v151_v32, %v151_v32 }
 0x18c   :  { %v157_v35 = vsel %vm28_vm0, %v153_v34, 0.0 }
 0x18d   :  { %158 = vadd.xlane.f32.xlu1 %v157_v35 }
 0x216   :  { %v156_v36 = vpop.xlane.xlu1 %155 }
 0x217   :  { %v160_v37 = vmul.f32 0.015625, %v156_v36 }
 0x219   :  { %v162_v38 = vadd.f32 1e-05, %v160_v37 }
 0x21a   :  { %v159_v39 = vpop.xlane.xlu1 %158 }
 0x21b   :  { %242 = vrsqrt.f32 %v162_v38  ;;  %v161_v40 = vmul.f32 0.015625, %v159_v39 }
 0x21d   :  { %v163_v41 = vadd.f32 1e-05, %v161_v40 }
 0x21f   :  { %244 = vrsqrt.f32 %v163_v41 }
 0x225   :  { %v243_v42 = vpop.eup %242 }
 0x226   :  { %v166_v44 = vmul.f32 %v243_v42, %v150_v28 }
 0x228   :  { %v175_v46 = vmul.f32 %v208_v43, %v166_v44 }
 0x229   :  { %v245_v47 = vpop.eup %244 }
 0x22a   :  { %v184_v48 = vadd.f32 %v209_v45, %v175_v46  ;;  %v167_v49 = vmul.f32 %v245_v47, %v151_v32 }
 0x22c   :  { %v212_v50 = vpack.c.bf16 %v184_v48, %v184_v48  ;;  %v176_v51 = vmul.f32 %v208_v43, %v167_v49 }
 0x22e   :  { %195 = vst.msk [vmem:[%s331_s6] sm:$0xf] %vm194_vm2, %v212_v50  ;;  %v185_v52 = vadd.f32 %v209_v45, %v176_v51 }
 0x230   :  { %v213_v53 = vpack.c.bf16 %v185_v52, %v185_v52 }
 0x232   :  { %196 = vst.msk [vmem:[%s331_s6 + $0x4] sm:$0xf] %vm194_vm2, %v213_v53 }

// kernel: transformer_forward.42
= control target key start
LH: loop header
LB: loop body
LE: loop exit
PB: predicated region body
PF: predicated region fallthrough
CT: control target
= control target key end

     0   :  { %s667_s12 = smov 0   ;;  %s669_s13 = smov 0   ;;  %s732_s0 = inlined_call_operand.vmem [shape: bf16[2,4,8,16], index: 0, kind: input, shape index: {}]   ;;  %s733_s1 = inlined_call_operand.vmem [shape: bf16[2,4,16,16], index: 1, kind: input, shape index: {}]   ;;  %s734_s2 = inlined_call_operand.vmem [shape: bf16[2,4,16,16], index: 2, kind: input, shape index: {}]   ;;  %s735_s3 = inlined_call_operand.vmem [shape: bf16[2,4,8,16], index: 3, kind: output, shape index: {}]  }
   0x1   :  { %s671_s14 = smov 0   ;;  %s673_s15 = smov 0  }
   0x2   :  { %s675_s16 = smov 0  }
   0x3 LB: > { %s22_s17 = sadd.s32 1, %s635_s14  ;;  %s25_s18 = sadd.s32 1, %s639_s15  ;;  %s643_s16 = sphi %s675_s16, %s13_s16   ;;  %s639_s15 = sphi %s673_s15, %s739_s15   ;;  %s635_s14 = sphi %s671_s14, %s738_s14   ;;  %s631_s13 = sphi %s669_s13, %s737_s13   ;;  %s627_s12 = sphi %s667_s12, %s736_s12  }
   0x4   : > { %p23_p0 = scmp.ge.s32.totalorder %s22_s17, 4  ;;  %p524_p1 = scmp.ge.s32.totalorder %s643_s16, 1 }
   0x5   : > { %p188_p2 = scmp.lt.s32.totalorder %s643_s16, 9 }
   0x6   : > { %s741_s17 = smov (%p23_p0, %s22_s17), 0  ;;  %s743_s18 = smov (!%p23_p0, %s25_s18), %s639_s15 }
   0x7   : > { %p189_p3 = pnand %p524_p1, %p188_p2  ;;  %p27_p4 = scmp.ge.s32.totalorder %s743_s18, 2 }
   0x8   : > { %p236_p5 = scmp.lt.s32.totalorder (!%p189_p3), %s631_s13, 1  ;;  %p238_p6 = scmp.lt.s32.totalorder (!%p189_p3), %s627_s12, 3  ;;  %v645_v0 = vmov (!%p189_p3), 0.0   ;;  %vm646_vm0 = vmmov (!%p189_p3), 0   ;;  %vm281_vm1 = vcmask (!%p189_p3), 130048   ;;  %vm390_vm2 = vcmask (!%p189_p3), 125952  }
   0x9   : > { %s745_s18 = smov (%p27_p4, %s743_s18), 0  ;;  %192 = sbr.rel (%p189_p3) target bundleno = 774 (0x306), region = 32 }
   0xa   : > { %545 = vmatprep.subr.bf16.mxu0 (!%p189_p3), %v645_v0  ;;  %547 = vmatprep.mubr.msk.bf16.mxu0 (!%p189_p3), %vm646_vm0, %v645_v0 }
   0xb   : > { %551 = vmatprep.subr.bf16.mxu1 (!%p189_p3), %v645_v0  ;;  %553 = vmatprep.mubr.msk.bf16.mxu1 (!%p189_p3), %vm646_vm0, %v645_v0 }
  0x10   : > { %s747_s13 = smov (!%p236_p5, %s631_s13), 1  ;;  %s749_s12 = smov (!%p238_p6, %s627_s12), 3 }
  0x11   : > { %s528_s19 = sshll.u32 %s747_s13, 3  ;;  %s525_s20 = sshll.u32 %s747_s13, 2 }
  0x12   : > { %s527_s21 = sshll.u32 %s749_s12, 1  ;;  %s697_s24 = sadd.s32 %s525_s20, %s749_s12 }
  0x13   : > { %s250_s22 = sadd.s32 %s528_s19, %s527_s21  ;;  %s526_s28 = sshll.u32 %s697_s24, 2 }
  0x14   : > { %s529_s23 = sshll.u32 %s250_s22, 2  ;;  %s243_s4 = scalar_lea.vmem %s732_s0, %s526_s28 }
  0x15   : > { %s252_s27 = scalar_lea.vmem %s733_s1, %s529_s23  ;;  %v271_v3 = vld [vmem:[%s243_s4] sm:$0xf]  ;;  %s261_s7 = scalar_lea.vmem %s734_s2, %s529_s23 }
  0x16   : > { %v599_v1 = vld [vmem:[%s252_s27] sm:$0xff]   ;;  %s269_s10 = scalar_lea.vmem %s735_s3, %s526_s28 }
  0x17   : > { %v286_v2 = vsel %vm281_vm1, %v599_v1, 0  ;;  %v600_v14 = vld [vmem:[%s261_s7] sm:$0xff]  }
  0x18   : > { %546 = vmatpush3.bf16.xpose.msra.mxu0 %v286_v2  ;;  %552 = vmatpush3.bf16.msra.mxu1 %v600_v14 }
  0x1f   : > { %548 = vmatmul.mubr.msk.bf16.vlgmr.msra.gmra.mrb[0].mxu0 %vm281_vm1, %v271_v3 }
  0xf2   : > { %v322_v4 = vpop.f32.mrb[0].mxu0 }
  0xf3   : > { %v549_v5 = vpop.f32.mrb[1].mxu0  ;;  %v328_v6 = vsel %vm281_vm1, %v322_v4, -inf }
  0xf4   : > { %329 = vmax.xlane.f32.xlu0 %v328_v6  ;;  %v325_v7 = vpop.f32.mrb[2].mxu0 }
  0xf5   : > { %v550_v8 = vpop.f32.mrb[3].mxu0 }
 0x181   : > { %v330_v9 = vpop.xlane.xlu0 %329 }
 0x182   : > { %v331_v10 = vsub.f32 %v322_v4, %v330_v9 }
 0x184   : > { %v332_v11 = vmul.f32 1.442695, %v331_v10 }
 0x186   : > { %601 = vpow2.f32 %v332_v11 }
 0x190   : > { %v602_v12 = vpop.eup %601 }
 0x191   : > { %v334_v13 = vsel %vm281_vm1, %v602_v12, 0.0 }
 0x192   : > { %335 = vadd.xlane.f32.xlu0 %v334_v13 }
 0x21f   : > { %v336_v15 = vpop.xlane.xlu0 %335 }
 0x220   : > { %603 = vrcp.f32 %v336_v15 }
 0x22a   : > { %v604_v16 = vpop.eup %603 }
 0x22b   : > { %v338_v17 = vmul.f32 %v604_v16, %v602_v12 }
 0x22d   : > { %v339_v18 = vpack.c.bf16 %v338_v17, %v338_v17 }
 0x22f   : > { %554 = vmatmul.mubr.msk.bf16.vlgmr.msra.gmra.mrb[0].mxu1 %vm281_vm1, %v339_v18 }
 0x302   : > { %v383_v19 = vpop.f32.mrb[0].mxu1 }
 0x303   : > { %v389_v20 = vpack.c.bf16 %v383_v19, %v383_v19  ;;  %v555_v21 = vpop.f32.mrb[1].mxu1 }
 0x304   : > { %v386_v22 = vpop.f32.mrb[2].mxu1 }
 0x305   : > { %391 = vst.msk [vmem:[%s269_s10] sm:$0xf] %vm390_vm2, %v389_v20  ;;  %v556_v23 = vpop.f32.mrb[3].mxu1 }
 0x306 PF: > { %s13_s16 = sadd.s32 1, %s643_s16   ;;  %s736_s12 = smov %s635_s14 }
 0x307   : > { %p10_p7 = scmp.ge.s32.totalorder %s13_s16, 10   ;;  %s737_s13 = smov %s639_s15 }
 0x308   : > { %s738_s14 = smov %s741_s17  ;;  %s739_s15 = smov %s745_s18 }
 0x309   :  { %12 = sbr.rel (!%p10_p7) target bundleno = 3 (0x3), region = 68 }

// kernel: transformer_forward.44
= control target key start
LH: loop header
LB: loop body
LE: loop exit
PB: predicated region body
PF: predicated region fallthrough
CT: control target
= control target key end

     0   :  { %v385_v0 = vmov 0.0   ;;  %vm386_vm0 = vmmov 0   ;;  %vm73_vm1 = vcmask 523264   ;;  %vm290_vm2 = vcmask 519168   ;;  %s489_s1 = inlined_call_operand.vmem [shape: bf16[64,128], index: 1, kind: input, shape index: {}]   ;;  %s490_s3 = inlined_call_operand.vmem [shape: bf16[128,64], index: 3, kind: input, shape index: {}]   ;;  %s491_s0 = inlined_call_operand.vmem [shape: bf16[16,64], index: 0, kind: input, shape index: {}]   ;;  %s492_s2 = inlined_call_operand.vmem [shape: f32[1,128], index: 2, kind: input, shape index: {}]   ;;  %s493_s4 = inlined_call_operand.vmem [shape: f32[1,64], index: 4, kind: input, shape index: {}]   ;;  %s494_s5 = inlined_call_operand.vmem [shape: f32[1,64], index: 5, kind: input, shape index: {}]   ;;  %s495_s6 = inlined_call_operand.vmem [shape: f32[1,64], index: 6, kind: input, shape index: {}]   ;;  %s496_s7 = inlined_call_operand.vmem [shape: bf16[16,64], index: 7, kind: output, shape index: {}]  }
   0x1   :  { %333 = vmatprep.subr.bf16.mxu0 %v385_v0  ;;  %v367_v1 = vld [vmem:[%s489_s1] sm:$0xff]   ;;  %341 = vmatprep.mubr.msk.bf16.mxu0 %vm386_vm0, %v385_v0  ;;  %v368_v2 = vld [vmem:[%s489_s1 + $0x8] sm:$0xff]   ;;  %v369_v4 = vld [vmem:[%s489_s1 + $0x10] sm:$0xff]  }
   0x2   :  { %345 = vmatprep.subr.bf16.mxu1 %v385_v0  ;;  %361 = vmatprep.mubr.msk.bf16.mxu1 %vm386_vm0, %v385_v0  ;;  %v372_v3 = vld [vmem:[%s490_s3] sm:$0xff]   ;;  %v373_v5 = vld [vmem:[%s490_s3 + $0x8] sm:$0xff]   ;;  %v370_v6 = vld [vmem:[%s489_s1 + $0x18] sm:$0xff]  }
   0x3   :  { %334 = vmatpush3.bf16.msra.mxu0 %v367_v1  ;;  %346 = vmatpush3.bf16.msra.mxu1 %v372_v3  ;;  %v27_v7 = vld [vmem:[%s491_s0] sm:$0xff]   ;;  %v374_v8 = vld [vmem:[%s490_s3 + $0x10] sm:$0xff]   ;;  %v375_v9 = vld [vmem:[%s490_s3 + $0x18] sm:$0xff]  }
   0x4   :  { %335 = vmatprep.subr.bf16.mxu0 %v385_v0  ;;  %347 = vmatprep.subr.bf16.mxu1 %v385_v0  ;;  %v376_v10 = vld [vmem:[%s490_s3 + $0x20] sm:$0xff]   ;;  %v377_v11 = vld [vmem:[%s490_s3 + $0x28] sm:$0xff]   ;;  %v378_v12 = vld [vmem:[%s490_s3 + $0x30] sm:$0xff]   ;;  %v233_v25 = vunpack.c.l.bf16 %v27_v7  ;;  %v234_v29 = vunpack.c.h.bf16 %v27_v7 }
   0x5   :  { %v379_v13 = vld [vmem:[%s490_s3 + $0x38] sm:$0xff]   ;;  %v297_v14 = vld [vmem:[%s492_s2] ss:$0 sm:$0xff] }
   0x6   :  { %v304_v24 = vld [vmem:[%s493_s4] ss:$0 sm:$0xff] }
   0x7   :  { %336 = vmatpush3.bf16.msra.mxu0 %v368_v2  ;;  %348 = vmatpush3.bf16.msra.mxu1 %v373_v5  ;;  %v313_v54 = vld [vmem:[%s494_s5] ss:$0 sm:$0xff] }
   0x8   :  { %337 = vmatprep.subr.bf16.mxu0 %v385_v0  ;;  %349 = vmatprep.subr.bf16.mxu1 %v385_v0  ;;  %v314_v56 = vld [vmem:[%s495_s6] ss:$0 sm:$0xff] }
   0xb   :  { %338 = vmatpush3.bf16.msra.mxu0 %v369_v4  ;;  %350 = vmatpush3.bf16.msra.mxu1 %v374_v8 }
   0xc   :  { %339 = vmatprep.subr.bf16.mxu0 %v385_v0  ;;  %351 = vmatprep.subr.bf16.mxu1 %v385_v0 }
   0xf   :  { %340 = vmatpush3.bf16.msra.mxu0 %v370_v6  ;;  %352 = vmatpush3.bf16.msra.mxu1 %v375_v9 }
  0x10   :  { %353 = vmatprep.subr.bf16.mxu1 %v385_v0 }
  0x12   :  { %342 = vmatmul.mubr.msk.bf16.vlgmr.msra.gmra.mrb[0].mxu0 %vm73_vm1, %v27_v7 }
  0x13   :  { %354 = vmatpush3.bf16.msra.mxu1 %v376_v10 }
  0x14   :  { %355 = vmatprep.subr.bf16.mxu1 %v385_v0 }
  0x17   :  { %356 = vmatpush3.bf16.msra.mxu1 %v377_v11 }
  0x18   :  { %357 = vmatprep.subr.bf16.mxu1 %v385_v0 }
  0x1b   :  { %358 = vmatpush3.bf16.msra.mxu1 %v378_v12 }
  0x1c   :  { %359 = vmatprep.subr.bf16.mxu1 %v385_v0 }
  0x1f   :  { %360 = vmatpush3.bf16.msra.mxu1 %v379_v13 }
  0xe5   :  { %v111_v15 = vpop.f32.mrb[0].mxu0 }
  0xe6   :  { %v112_v16 = vadd.f32 %v297_v14, %v111_v15  ;;  %v343_v17 = vpop.f32.mrb[1].mxu0 }
  0xe7   :  { %v114_v18 = vpop.f32.mrb[2].mxu0 }
  0xe8   :  { %v115_v19 = vadd.f32 %v297_v14, %v114_v18  ;;  %v344_v20 = vpop.f32.mrb[3].mxu0  ;;  %v118_v21 = vmax.f32 %v112_v16, 0.0 }
  0xea   :  { %v119_v22 = vmax.f32 %v115_v19, 0.0 }
  0xec   :  { %v120_v23 = vpack.c.bf16 %v119_v22, %v118_v21 }
  0xee   :  { %362 = vmatmul.mubr.bf16.vlgmr.msra.gmra.mrb[0].mxu1 %v120_v23 }
 0x1c1   :  { %v226_v26 = vpop.f32.mrb[0].mxu1 }
 0x1c2   :  { %v227_v27 = vadd.f32 %v304_v24, %v226_v26  ;;  %v363_v28 = vpop.f32.mrb[1].mxu1 }
 0x1c3   :  { %v229_v30 = vpop.f32.mrb[2].mxu1 }
 0x1c4   :  { %v230_v31 = vadd.f32 %v304_v24, %v229_v30  ;;  %v364_v32 = vpop.f32.mrb[3].mxu1  ;;  %v235_v33 = vadd.f32 %v233_v25, %v227_v27 }
 0x1c6   :  { %v237_v34 = vsel %vm73_vm1, %v235_v33, 0.0  ;;  %v236_v35 = vadd.f32 %v234_v29, %v230_v31 }
 0x1c7   :  { %238 = vadd.xlane.f32.xlu0 %v237_v34 }
 0x1c8   :  { %v240_v36 = vsel %vm73_vm1, %v236_v35, 0.0 }
 0x1cb   :  { %241 = vadd.xlane.f32.xlu0 %v240_v36 }
 0x254   :  { %v239_v37 = vpop.xlane.xlu0 %238 }
 0x255   :  { %v244_v38 = vmul.f32 0.015625, %v239_v37 }
 0x257   :  { %v246_v39 = vsub.f32 %v235_v33, %v244_v38 }
 0x258   :  { %v242_v40 = vpop.xlane.xlu0 %241 }
 0x259   :  { %v245_v41 = vmul.f32 0.015625, %v242_v40  ;;  %v248_v42 = vmul.f32 %v246_v39, %v246_v39 }
 0x25b   :  { %v247_v43 = vsub.f32 %v236_v35, %v245_v41  ;;  %v250_v44 = vsel %vm73_vm1, %v248_v42, 0.0 }
 0x25c   :  { %251 = vadd.xlane.f32.xlu1 %v250_v44 }
 0x25d   :  { %v249_v45 = vmul.f32 %v247_v43, %v247_v43 }
 0x25f   :  { %v253_v46 = vsel %vm73_vm1, %v249_v45, 0.0 }
 0x260   :  { %254 = vadd.xlane.f32.xlu1 %v253_v46 }
 0x2e9   :  { %v252_v47 = vpop.xlane.xlu1 %251 }
 0x2ea   :  { %v256_v48 = vmul.f32 0.015625, %v252_v47 }
 0x2ec   :  { %v258_v49 = vadd.f32 1e-05, %v256_v48 }
 0x2ed   :  { %v255_v50 = vpop.xlane.xlu1 %254 }
 0x2ee   :  { %381 = vrsqrt.f32 %v258_v49  ;;  %v257_v51 = vmul.f32 0.015625, %v255_v50 }
 0x2f0   :  { %v259_v52 = vadd.f32 1e-05, %v257_v51 }
 0x2f2   :  { %383 = vrsqrt.f32 %v259_v52 }
 0x2f8   :  { %v382_v53 = vpop.eup %381 }
 0x2f9   :  { %v262_v55 = vmul.f32 %v382_v53, %v246_v39 }
 0x2fb   :  { %v271_v57 = vmul.f32 %v313_v54, %v262_v55 }
 0x2fc   :  { %v384_v58 = vpop.eup %383 }
 0x2fd   :  { %v280_v59 = vadd.f32 %v314_v56, %v271_v57  ;;  %v263_v60 = vmul.f32 %v384_v58, %v247_v43 }
 0x2ff   :  { %v317_v61 = vpack.c.bf16 %v280_v59, %v280_v59  ;;  %v272_v62 = vmul.f32 %v313_v54, %v263_v60 }
 0x301   :  { %291 = vst.msk [vmem:[%s496_s7] sm:$0xf] %vm290_vm2, %v317_v61  ;;  %v281_v63 = vadd.f32 %v314_v56, %v272_v62 }
 0x303   :  { %v318_v0 = vpack.c.bf16 %v281_v63, %v281_v63 }
 0x305   :  { %292 = vst.msk [vmem:[%s496_s7 + $0x4] sm:$0xf] %vm290_vm2, %v318_v0 }

// kernel: transformer_forward.53
= control target key start
LH: loop header
LB: loop body
LE: loop exit
PB: predicated region body
PF: predicated region fallthrough
CT: control target
= control target key end

     0   :  { %v179_v0 = vmov 0.0   ;;  %vm180_vm0 = vmmov 0   ;;  %vm62_vm1 = vcmask 523264   ;;  %s222_s1 = inlined_call_operand.vmem [shape: bf16[64,128], index: 1, kind: input, shape index: {}]   ;;  %s223_s0 = inlined_call_operand.vmem [shape: bf16[16,64], index: 0, kind: input, shape index: {}]   ;;  %s224_s2 = inlined_call_operand.vmem [shape: f32[1,128], index: 2, kind: input, shape index: {}]   ;;  %s225_s3 = inlined_call_operand.vmem [shape: bf16[16,128], index: 3, kind: output, shape index: {}]  }
   0x1   :  { %160 = vmatprep.subr.bf16.mxu0 %v179_v0  ;;  %v174_v1 = vld [vmem:[%s222_s1] sm:$0xff]   ;;  %168 = vmatprep.mubr.msk.bf16.mxu0 %vm180_vm0, %v179_v0  ;;  %v175_v2 = vld [vmem:[%s222_s1 + $0x8] sm:$0xff]   ;;  %v176_v3 = vld [vmem:[%s222_s1 + $0x10] sm:$0xff]  }
   0x2   :  { %161 = vmatpush3.bf16.msra.mxu0 %v174_v1  ;;  %v177_v4 = vld [vmem:[%s222_s1 + $0x18] sm:$0xff]   ;;  %v178_v5 = vld [vmem:[%s223_s0] sm:$0xff]  }
   0x3   :  { %162 = vmatprep.subr.bf16.mxu0 %v179_v0  ;;  %v145_v7 = vld [vmem:[%s224_s2] ss:$0 sm:$0xff] }
   0x6   :  { %163 = vmatpush3.bf16.msra.mxu0 %v175_v2 }
   0x7   :  { %164 = vmatprep.subr.bf16.mxu0 %v179_v0 }
   0xa   :  { %165 = vmatpush3.bf16.msra.mxu0 %v176_v3 }
   0xb   :  { %166 = vmatprep.subr.bf16.mxu0 %v179_v0 }
   0xe   :  { %167 = vmatpush3.bf16.msra.mxu0 %v177_v4 }
  0x11   :  { %169 = vmatmul.mubr.msk.bf16.vlgmr.msra.gmra.mrb[0].mxu0 %vm62_vm1, %v178_v5 }
  0xe4   :  { %v100_v6 = vpop.f32.mrb[0].mxu0 }
  0xe5   :  { %v170_v8 = vpop.f32.mrb[1].mxu0  ;;  %v123_v10 = vadd.f32 %v145_v7, %v100_v6 }
  0xe6   :  { %v103_v9 = vpop.f32.mrb[2].mxu0 }
  0xe7   :  { %v124_v11 = vadd.f32 %v145_v7, %v103_v9  ;;  %v171_v12 = vpop.f32.mrb[3].mxu0 }
  0xe9   :  { %v153_v13 = vpack.c.bf16 %v124_v11, %v123_v10 }
  0xeb   :  { %154 = vst [vmem:[%s225_s3] sm:$0xff] %v153_v13  }

</bundles_post_ra>
